<compile_context>
chip_gen: v7x
topology: tpu7x:2x2x1
jax: 0.10.0
libtpu: 0.0.40
codegen_flags: <defaults>
</compile_context>

<pallas_src>
import functools
import math

import jax
import jax.numpy as jnp
from jax.experimental import pallas as pl
from jax.experimental.pallas import tpu as pltpu

# quantile coefficients from BReLU_Layer.forward (q = 5)
_BRELU_COEFFS = (-2.02, -0.765, -0.195, 0.315, 0.93)
Q = len(_BRELU_COEFFS)
_BN_EPS = 1e-5
_LANE = 128


def _round_up(n, m):
    return ((n + m - 1) // m) * m


def _brelu_center_and_std(h, n_feat_real):
    """Fused-stat BReLU prep on a (B, Hp) block.

    Only the first `n_feat_real` feature columns are real; padded columns are
    exactly zero on entry, stay exactly zero through BatchNorm, and therefore
    contribute nothing to the global sums — so the stats below divide by the
    real element counts and need no masks.

    Returns (h_centered, std) so the caller forms branch q as
        max(0, h_centered - c_q * std)
    which equals the module's max(0, h_bn - (c_q*std + mean)).

    Note on stability: both variances use single-pass moment forms.  After the
    BatchNorm step the data is ~zero-mean/unit-var per feature, so the global
    moment form (sum(x^2) - sum(x)*m) has negligible cancellation here; the
    per-feature BN stats operate on O(1) pre-activations at these shapes.
    """
    B = h.shape[0]
    if B > 1:  # static shape -> Python-level branch, matches `if batch_size > 1`
        # nn.BatchNorm1d(affine=False), training mode: per-feature batch mean,
        # biased variance, eps=1e-5.  Single pass: sum and sum-of-squares.
        col_sum = jnp.sum(h, axis=0, keepdims=True)
        col_sumsq = jnp.sum(h * h, axis=0, keepdims=True)
        mu = col_sum * (1.0 / B)
        var = col_sumsq * (1.0 / B) - mu * mu
        h = (h - mu) * jax.lax.rsqrt(var + _BN_EPS)
    # torch.mean(x) / torch.var(x): scalar stats over the (real part of the)
    # whole tensor; unbiased variance: sum((x-m)^2) == sum(x^2) - sum(x)*m.
    n = B * n_feat_real
    tot_sum = jnp.sum(h)
    tot_sumsq = jnp.sum(h * h)
    m = tot_sum * (1.0 / n)
    v = (tot_sumsq - tot_sum * m) * (1.0 / (n - 1))
    std = jnp.sqrt(v)
    return h - m, std


def brelu_net_kernel(x_ref, w1_ref, w2_ref, w3_ref, b_ref, out_ref, *, h1, h2):
    # Pin f32 MXU accumulation explicitly (accuracy claim is load-bearing).
    dot = functools.partial(
        jnp.dot,
        preferred_element_type=jnp.float32,
        precision=jax.lax.Precision.HIGHEST,
    )

    x1 = dot(x_ref[...], w1_ref[...])
    h1c, std1 = _brelu_center_and_std(x1, h1)

    # Fused LHS: each ReLU branch is exactly one 128-lane vreg wide, so this
    # lane-concat is pure vreg placement (no XLU relayout).  One K=Q*128 dot
    # replaces 5 K=128 dots + 4 VPU adds.
    relu1 = jnp.concatenate(
        [jnp.maximum(jnp.float32(0.0), h1c - c * std1) for c in _BRELU_COEFFS],
        axis=1,
    )
    x2 = dot(relu1, w2_ref[...])

    h2c, std2 = _brelu_center_and_std(x2, h2)
    relu2 = jnp.concatenate(
        [jnp.maximum(jnp.float32(0.0), h2c - c * std2) for c in _BRELU_COEFFS],
        axis=1,
    )

    # (1, OUTp) bias broadcast; lane-dense store (OUTp is a multiple of 128).
    out_ref[...] = dot(relu2, w3_ref[...]) + b_ref[...]


def prepare_brelu_params(w1, w2, w3, biases):
    """One-time host-side prep: lane-pad + fuse weights (hoisted out of the
    per-call path per the performance review)."""
    in_size, h1 = w1.shape
    h2 = w2.shape[1]
    out_size = w3.shape[1]
    assert w2.shape[0] == h1 * Q and w3.shape[0] == h2 * Q

    h1p = _round_up(h1, _LANE)
    h2p = _round_up(h2, _LANE)
    outp = _round_up(out_size, _LANE)
    f32 = jnp.float32

    # Padded weight rows/cols are zero, so padded activation lanes never
    # contribute to any result or statistic.
    w1p = jnp.zeros((in_size, h1p), f32).at[:, :h1].set(w1.astype(f32))
    # Fused (Q*h1p, h2p): row q*h1p + j holds w2[q*h1 + j, :] for j < h1, else 0,
    # matching the kernel's lane-concatenated LHS layout.
    w2f = (
        jnp.zeros((Q, h1p, h2p), f32)
        .at[:, :h1, :h2].set(w2.astype(f32).reshape(Q, h1, h2))
        .reshape(Q * h1p, h2p)
    )
    w3f = (
        jnp.zeros((Q, h2p, outp), f32)
        .at[:, :h2, :out_size].set(w3.astype(f32).reshape(Q, h2, out_size))
        .reshape(Q * h2p, outp)
    )
    bp = jnp.zeros((1, outp), f32).at[:, :out_size].set(
        biases.astype(f32).reshape(1, out_size))

    return {
        "w1p": w1p, "w2f": w2f, "w3f": w3f, "bp": bp,
        "h1": h1, "h2": h2, "out_size": out_size,
    }


@functools.partial(jax.jit, static_argnames=("h1", "h2", "out_size"))
def _brelu_net_apply(x, w1p, w2f, w3f, bp, *, h1, h2, out_size):
    B = x.shape[0]
    outp = bp.shape[1]
    vmem = pl.BlockSpec(memory_space=pltpu.MemorySpace.VMEM)
    kernel = functools.partial(brelu_net_kernel, h1=h1, h2=h2)
    pre_y_p = pl.pallas_call(
        kernel,
        out_shape=jax.ShapeDtypeStruct((B, outp), jnp.float32),
        in_specs=[vmem] * 5,
        out_specs=vmem,
    )(x.astype(jnp.float32), w1p, w2f, w3f, bp)
    return pre_y_p[:, :out_size]


def brelu_net_forward(x, w1, w2, w3, biases, params=None):
    """Forward pass.  Pass `params=prepare_brelu_params(...)` to reuse the
    one-time padded/fused weights across calls (steady-state fast path)."""
    if params is None:
        params = prepare_brelu_params(w1, w2, w3, biases)
    pre_y = _brelu_net_apply(
        x, params["w1p"], params["w2f"], params["w3f"], params["bp"],
        h1=params["h1"], h2=params["h2"], out_size=params["out_size"])
    # The module also returns its (unpadded) weights.
    return pre_y, w1, w2, w3


# ----------------------------- reference & test -----------------------------


def _brelu_layer_ref(h):
    """Pure-JAX reference of BReLU_Layer (matches the PyTorch module)."""
    B, H = h.shape
    if B > 1:
        mu = jnp.mean(h, axis=0, keepdims=True)
        var = jnp.mean((h - mu) ** 2, axis=0, keepdims=True)
        h = (h - mu) / jnp.sqrt(var + _BN_EPS)
    m = jnp.mean(h)
    v = jnp.sum((h - m) ** 2) / float(B * H - 1)
    std = jnp.sqrt(v)
    return jnp.concatenate(
        [jnp.maximum(0.0, h - (c * std + m)) for c in _BRELU_COEFFS], axis=1
    )


def _forward_ref(x, w1, w2, w3, biases):
    out1 = _brelu_layer_ref(x @ w1)
    out2 = _brelu_layer_ref(out1 @ w2)
    return out2 @ w3 + biases


def _init_params(key, in_size, h1, h2, out_size):
    """Deterministic kaiming-uniform-style init (a=sqrt(5)) matching shapes."""
    k1, k2, k3, kb = jax.random.split(key, 4)

    def kaiming_uniform(k, shape):
        fan_in = shape[1]  # torch fan_in convention for 2-D weight = size(1)
        bound = math.sqrt(1.0 / fan_in)
        return jax.random.uniform(k, shape, jnp.float32, -bound, bound)

    w1 = kaiming_uniform(k1, (in_size, h1))
    w2 = kaiming_uniform(k2, (h1 * Q, h2))
    w3 = kaiming_uniform(k3, (h2 * Q, out_size))
    b_bound = 1.0 / math.sqrt(out_size)
    biases = jax.random.uniform(kb, (out_size,), jnp.float32, -b_bound, b_bound)
    return w1, w2, w3, biases


if __name__ == "__main__":
    # small shapes consistent with the module; q must be 5 (BReLU concatenates 5 maps)
    B, in_size, hidden1, hidden2, out_size = 8, 16, 32, 32, 8

    key = jax.random.PRNGKey(0)
    kx, kp = jax.random.split(key)
    x = jax.random.normal(kx, (B, in_size), jnp.float32)
    w1, w2, w3, biases = _init_params(kp, in_size, hidden1, hidden2, out_size)

    # One-time weight prep (hoisted out of the per-call path), then forward.
    params = prepare_brelu_params(w1, w2, w3, biases)
    pre_y, rw1, rw2, rw3 = brelu_net_forward(x, w1, w2, w3, biases, params=params)
    jax.block_until_ready(pre_y)

    ref = _forward_ref(x, w1, w2, w3, biases)
    assert pre_y.shape == (B, out_size)
    assert jnp.allclose(pre_y, ref, rtol=1e-4, atol=1e-4), "mismatch vs JAX reference"

    print("KERNEL_OK")
</pallas_src>

<mosaic_0001>
module attributes {stable_mosaic.version = 11 : i64} {
  func.func @brelu_net_kernel(%arg0: memref<8x16xf32, #tpu.memory_space<vmem>>, %arg1: memref<16x128xf32, #tpu.memory_space<vmem>>, %arg2: memref<640x128xf32, #tpu.memory_space<vmem>>, %arg3: memref<640x128xf32, #tpu.memory_space<vmem>>, %arg4: memref<1x128xf32, #tpu.memory_space<vmem>>, %arg5: memref<8x128xf32, #tpu.memory_space<vmem>>) attributes {dimension_semantics = [], scalar_prefetch = 0 : i64, scratch_operands = 0 : i64, tpu.core_type = #tpu.core_type<tc>} {
    %c0 = arith.constant 0 : index
    %c0_0 = arith.constant 0 : index
    %0 = vector.load %arg0[%c0, %c0_0] : memref<8x16xf32, #tpu.memory_space<vmem>>, vector<8x16xf32>
    %c0_1 = arith.constant 0 : index
    %c0_2 = arith.constant 0 : index
    %1 = vector.load %arg1[%c0_1, %c0_2] : memref<16x128xf32, #tpu.memory_space<vmem>>, vector<16x128xf32>
    %cst = arith.constant dense<0.000000e+00> : vector<8x128xf32>
    %2 = tpu.matmul %0, %1, %cst {dimension_numbers = #tpu.dot_dimension_numbers<[1], [0], [0], [1], [0, 0, 1, 1], [], []>, precision = #tpu.contract_precision<fp32>} : vector<8x16xf32>, vector<16x128xf32>, vector<8x128xf32> -> vector<8x128xf32>
    %cst_3 = arith.constant dense<0.000000e+00> : vector<128xf32>
    %3 = vector.multi_reduction <add>, %2, %cst_3 [0] : vector<8x128xf32> to vector<128xf32>
    %4 = vector.shape_cast %3 : vector<128xf32> to vector<1x128xf32>
    %5 = arith.mulf %2, %2 : vector<8x128xf32>
    %cst_4 = arith.constant dense<0.000000e+00> : vector<128xf32>
    %6 = vector.multi_reduction <add>, %5, %cst_4 [0] : vector<8x128xf32> to vector<128xf32>
    %7 = vector.shape_cast %6 : vector<128xf32> to vector<1x128xf32>
    %cst_5 = arith.constant 1.250000e-01 : f32
    %8 = vector.broadcast %cst_5 : f32 to vector<1x128xf32>
    %9 = arith.mulf %4, %8 : vector<1x128xf32>
    %cst_6 = arith.constant 1.250000e-01 : f32
    %10 = vector.broadcast %cst_6 : f32 to vector<1x128xf32>
    %11 = arith.mulf %7, %10 : vector<1x128xf32>
    %12 = arith.mulf %9, %9 : vector<1x128xf32>
    %13 = arith.subf %11, %12 : vector<1x128xf32>
    %14 = vector.broadcast %9 : vector<1x128xf32> to vector<8x128xf32>
    %15 = arith.subf %2, %14 : vector<8x128xf32>
    %cst_7 = arith.constant 9.99999974E-6 : f32
    %16 = vector.broadcast %cst_7 : f32 to vector<1x128xf32>
    %17 = arith.addf %13, %16 : vector<1x128xf32>
    %18 = math.rsqrt %17 : vector<1x128xf32>
    %19 = vector.broadcast %18 : vector<1x128xf32> to vector<8x128xf32>
    %20 = arith.mulf %15, %19 : vector<8x128xf32>
    %21 = vector.shape_cast %20 : vector<8x128xf32> to vector<1x8x128xf32>
    %cst_8 = arith.constant dense<0.000000e+00> : vector<1xf32>
    %22 = vector.multi_reduction <add>, %21, %cst_8 [1, 2] : vector<1x8x128xf32> to vector<1xf32>
    %23 = vector.shape_cast %22 : vector<1xf32> to vector<1x1x1xf32>
    %24 = vector.extract %23[0, 0, 0] : f32 from vector<1x1x1xf32>
    %25 = arith.mulf %20, %20 : vector<8x128xf32>
    %26 = vector.shape_cast %25 : vector<8x128xf32> to vector<1x8x128xf32>
    %cst_9 = arith.constant dense<0.000000e+00> : vector<1xf32>
    %27 = vector.multi_reduction <add>, %26, %cst_9 [1, 2] : vector<1x8x128xf32> to vector<1xf32>
    %28 = vector.shape_cast %27 : vector<1xf32> to vector<1x1x1xf32>
    %29 = vector.extract %28[0, 0, 0] : f32 from vector<1x1x1xf32>
    %cst_10 = arith.constant 3.906250e-03 : f32
    %30 = arith.mulf %24, %cst_10 : f32
    %31 = arith.mulf %24, %30 : f32
    %32 = arith.subf %29, %31 : f32
    %cst_11 = arith.constant 0.00392156886 : f32
    %33 = arith.mulf %32, %cst_11 : f32
    %34 = math.sqrt %33 : f32
    %35 = vector.broadcast %30 : f32 to vector<8x128xf32>
    %36 = arith.subf %20, %35 : vector<8x128xf32>
    %cst_12 = arith.constant -2.020000e+00 : f32
    %37 = arith.mulf %cst_12, %34 : f32
    %38 = vector.broadcast %37 : f32 to vector<8x128xf32>
    %39 = arith.subf %36, %38 : vector<8x128xf32>
    %cst_13 = arith.constant 0.000000e+00 : f32
    %40 = vector.broadcast %cst_13 : f32 to vector<8x128xf32>
    %41 = arith.maximumf %40, %39 : vector<8x128xf32>
    %cst_14 = arith.constant -0.764999985 : f32
    %42 = arith.mulf %cst_14, %34 : f32
    %43 = vector.broadcast %42 : f32 to vector<8x128xf32>
    %44 = arith.subf %36, %43 : vector<8x128xf32>
    %cst_15 = arith.constant 0.000000e+00 : f32
    %45 = vector.broadcast %cst_15 : f32 to vector<8x128xf32>
    %46 = arith.maximumf %45, %44 : vector<8x128xf32>
    %cst_16 = arith.constant -1.950000e-01 : f32
    %47 = arith.mulf %cst_16, %34 : f32
    %48 = vector.broadcast %47 : f32 to vector<8x128xf32>
    %49 = arith.subf %36, %48 : vector<8x128xf32>
    %cst_17 = arith.constant 0.000000e+00 : f32
    %50 = vector.broadcast %cst_17 : f32 to vector<8x128xf32>
    %51 = arith.maximumf %50, %49 : vector<8x128xf32>
    %cst_18 = arith.constant 3.150000e-01 : f32
    %52 = arith.mulf %cst_18, %34 : f32
    %53 = vector.broadcast %52 : f32 to vector<8x128xf32>
    %54 = arith.subf %36, %53 : vector<8x128xf32>
    %cst_19 = arith.constant 0.000000e+00 : f32
    %55 = vector.broadcast %cst_19 : f32 to vector<8x128xf32>
    %56 = arith.maximumf %55, %54 : vector<8x128xf32>
    %cst_20 = arith.constant 9.300000e-01 : f32
    %57 = arith.mulf %cst_20, %34 : f32
    %58 = vector.broadcast %57 : f32 to vector<8x128xf32>
    %59 = arith.subf %36, %58 : vector<8x128xf32>
    %cst_21 = arith.constant 0.000000e+00 : f32
    %60 = vector.broadcast %cst_21 : f32 to vector<8x128xf32>
    %61 = arith.maximumf %60, %59 : vector<8x128xf32>
    %62 = tpu.concatenate %41, %46, %51, %56, %61 in 1 : vector<8x128xf32>, vector<8x128xf32>, vector<8x128xf32>, vector<8x128xf32>, vector<8x128xf32> -> vector<8x640xf32>
    %c0_22 = arith.constant 0 : index
    %c0_23 = arith.constant 0 : index
    %63 = vector.load %arg2[%c0_22, %c0_23] : memref<640x128xf32, #tpu.memory_space<vmem>>, vector<640x128xf32>
    %cst_24 = arith.constant dense<0.000000e+00> : vector<8x128xf32>
    %64 = tpu.matmul %62, %63, %cst_24 {dimension_numbers = #tpu.dot_dimension_numbers<[1], [0], [0], [1], [0, 0, 1, 1], [], []>, precision = #tpu.contract_precision<fp32>} : vector<8x640xf32>, vector<640x128xf32>, vector<8x128xf32> -> vector<8x128xf32>
    %cst_25 = arith.constant dense<0.000000e+00> : vector<128xf32>
    %65 = vector.multi_reduction <add>, %64, %cst_25 [0] : vector<8x128xf32> to vector<128xf32>
    %66 = vector.shape_cast %65 : vector<128xf32> to vector<1x128xf32>
    %67 = arith.mulf %64, %64 : vector<8x128xf32>
    %cst_26 = arith.constant dense<0.000000e+00> : vector<128xf32>
    %68 = vector.multi_reduction <add>, %67, %cst_26 [0] : vector<8x128xf32> to vector<128xf32>
    %69 = vector.shape_cast %68 : vector<128xf32> to vector<1x128xf32>
    %cst_27 = arith.constant 1.250000e-01 : f32
    %70 = vector.broadcast %cst_27 : f32 to vector<1x128xf32>
    %71 = arith.mulf %66, %70 : vector<1x128xf32>
    %cst_28 = arith.constant 1.250000e-01 : f32
    %72 = vector.broadcast %cst_28 : f32 to vector<1x128xf32>
    %73 = arith.mulf %69, %72 : vector<1x128xf32>
    %74 = arith.mulf %71, %71 : vector<1x128xf32>
    %75 = arith.subf %73, %74 : vector<1x128xf32>
    %76 = vector.broadcast %71 : vector<1x128xf32> to vector<8x128xf32>
    %77 = arith.subf %64, %76 : vector<8x128xf32>
    %cst_29 = arith.constant 9.99999974E-6 : f32
    %78 = vector.broadcast %cst_29 : f32 to vector<1x128xf32>
    %79 = arith.addf %75, %78 : vector<1x128xf32>
    %80 = math.rsqrt %79 : vector<1x128xf32>
    %81 = vector.broadcast %80 : vector<1x128xf32> to vector<8x128xf32>
    %82 = arith.mulf %77, %81 : vector<8x128xf32>
    %83 = vector.shape_cast %82 : vector<8x128xf32> to vector<1x8x128xf32>
    %cst_30 = arith.constant dense<0.000000e+00> : vector<1xf32>
    %84 = vector.multi_reduction <add>, %83, %cst_30 [1, 2] : vector<1x8x128xf32> to vector<1xf32>
    %85 = vector.shape_cast %84 : vector<1xf32> to vector<1x1x1xf32>
    %86 = vector.extract %85[0, 0, 0] : f32 from vector<1x1x1xf32>
    %87 = arith.mulf %82, %82 : vector<8x128xf32>
    %88 = vector.shape_cast %87 : vector<8x128xf32> to vector<1x8x128xf32>
    %cst_31 = arith.constant dense<0.000000e+00> : vector<1xf32>
    %89 = vector.multi_reduction <add>, %88, %cst_31 [1, 2] : vector<1x8x128xf32> to vector<1xf32>
    %90 = vector.shape_cast %89 : vector<1xf32> to vector<1x1x1xf32>
    %91 = vector.extract %90[0, 0, 0] : f32 from vector<1x1x1xf32>
    %cst_32 = arith.constant 3.906250e-03 : f32
    %92 = arith.mulf %86, %cst_32 : f32
    %93 = arith.mulf %86, %92 : f32
    %94 = arith.subf %91, %93 : f32
    %cst_33 = arith.constant 0.00392156886 : f32
    %95 = arith.mulf %94, %cst_33 : f32
    %96 = math.sqrt %95 : f32
    %97 = vector.broadcast %92 : f32 to vector<8x128xf32>
    %98 = arith.subf %82, %97 : vector<8x128xf32>
    %cst_34 = arith.constant -2.020000e+00 : f32
    %99 = arith.mulf %cst_34, %96 : f32
    %100 = vector.broadcast %99 : f32 to vector<8x128xf32>
    %101 = arith.subf %98, %100 : vector<8x128xf32>
    %cst_35 = arith.constant 0.000000e+00 : f32
    %102 = vector.broadcast %cst_35 : f32 to vector<8x128xf32>
    %103 = arith.maximumf %102, %101 : vector<8x128xf32>
    %cst_36 = arith.constant -0.764999985 : f32
    %104 = arith.mulf %cst_36, %96 : f32
    %105 = vector.broadcast %104 : f32 to vector<8x128xf32>
    %106 = arith.subf %98, %105 : vector<8x128xf32>
    %cst_37 = arith.constant 0.000000e+00 : f32
    %107 = vector.broadcast %cst_37 : f32 to vector<8x128xf32>
    %108 = arith.maximumf %107, %106 : vector<8x128xf32>
    %cst_38 = arith.constant -1.950000e-01 : f32
    %109 = arith.mulf %cst_38, %96 : f32
    %110 = vector.broadcast %109 : f32 to vector<8x128xf32>
    %111 = arith.subf %98, %110 : vector<8x128xf32>
    %cst_39 = arith.constant 0.000000e+00 : f32
    %112 = vector.broadcast %cst_39 : f32 to vector<8x128xf32>
    %113 = arith.maximumf %112, %111 : vector<8x128xf32>
    %cst_40 = arith.constant 3.150000e-01 : f32
    %114 = arith.mulf %cst_40, %96 : f32
    %115 = vector.broadcast %114 : f32 to vector<8x128xf32>
    %116 = arith.subf %98, %115 : vector<8x128xf32>
    %cst_41 = arith.constant 0.000000e+00 : f32
    %117 = vector.broadcast %cst_41 : f32 to vector<8x128xf32>
    %118 = arith.maximumf %117, %116 : vector<8x128xf32>
    %cst_42 = arith.constant 9.300000e-01 : f32
    %119 = arith.mulf %cst_42, %96 : f32
    %120 = vector.broadcast %119 : f32 to vector<8x128xf32>
    %121 = arith.subf %98, %120 : vector<8x128xf32>
    %cst_43 = arith.constant 0.000000e+00 : f32
    %122 = vector.broadcast %cst_43 : f32 to vector<8x128xf32>
    %123 = arith.maximumf %122, %121 : vector<8x128xf32>
    %124 = tpu.concatenate %103, %108, %113, %118, %123 in 1 : vector<8x128xf32>, vector<8x128xf32>, vector<8x128xf32>, vector<8x128xf32>, vector<8x128xf32> -> vector<8x640xf32>
    %c0_44 = arith.constant 0 : index
    %c0_45 = arith.constant 0 : index
    %125 = vector.load %arg3[%c0_44, %c0_45] : memref<640x128xf32, #tpu.memory_space<vmem>>, vector<640x128xf32>
    %cst_46 = arith.constant dense<0.000000e+00> : vector<8x128xf32>
    %126 = tpu.matmul %124, %125, %cst_46 {dimension_numbers = #tpu.dot_dimension_numbers<[1], [0], [0], [1], [0, 0, 1, 1], [], []>, precision = #tpu.contract_precision<fp32>} : vector<8x640xf32>, vector<640x128xf32>, vector<8x128xf32> -> vector<8x128xf32>
    %c0_47 = arith.constant 0 : index
    %c0_48 = arith.constant 0 : index
    %127 = vector.load %arg4[%c0_47, %c0_48] : memref<1x128xf32, #tpu.memory_space<vmem>>, vector<1x128xf32>
    %128 = vector.broadcast %127 : vector<1x128xf32> to vector<8x128xf32>
    %129 = arith.addf %126, %128 : vector<8x128xf32>
    %c0_49 = arith.constant 0 : index
    %c0_50 = arith.constant 0 : index
    %130 = vector.load %arg5[%c0_49, %c0_50] : memref<8x128xf32, #tpu.memory_space<vmem>>, vector<8x128xf32>
    tpu.vector_store %arg5[%c0_49, %c0_50], %129 {strides = array<i32>} : memref<8x128xf32, #tpu.memory_space<vmem>>, vector<8x128xf32>,
    return
  }
}

</mosaic_0001>

<bundles_post_ra>
// kernel: _brelu_net_apply.1
= control target key start
LH: loop header
LB: loop body
LE: loop exit
PB: predicated region body
PF: predicated region fallthrough
CT: control target
= control target key end

     0   :  { %10 = vsyncpa [#allocation3], 0  ;;  %s11082_s0 = inlined_call_operand.hbm [shape: f32[8,16], index: 0, kind: input, shape index: {}]   ;;  %s11083_s1 = inlined_call_operand.hbm [shape: f32[16,128], index: 1, kind: input, shape index: {}]   ;;  %s11084_s2 = inlined_call_operand.hbm [shape: f32[640,128], index: 2, kind: input, shape index: {}]   ;;  %s11085_s3 = inlined_call_operand.hbm [shape: f32[640,128], index: 3, kind: input, shape index: {}]   ;;  %s11086_s4 = inlined_call_operand.vmem [shape: f32[1,128], index: 4, kind: input, shape index: {}]   ;;  %s11087_s5 = inlined_call_operand.hbm [shape: f32[8,128], index: 5, kind: output, shape index: {}]  }
   0x1   :  { %11 = vsyncpa [#allocation6], 0 }
   0x2   :  { %12 = vsyncpa [#allocation9], 0 }
   0x3   :  { %13 = vsyncpa [#allocation4], 0  ;;  %s8383_s18 = smov [#allocation5]   ;;  %s8265_s22 = scalar_lea.hbm %s11083_s1, 256 }
   0x4   :  { %s29_s19 = sshll.u32 %s8383_s18, 4  ;;  %p8266_p0 = scmp.ne.s32.totalorder %s11083_s1, %s8265_s22  ;;  %s30_s19 = int_to_ptr.vmem [resolvable:$true] %s29_s19 }
   0x5   :  { %p8269_p1 = scmp.lt.u32.totalorder %s8265_s22, %s11083_s1 }
   0x7   :  { %p8271_p2 = pnand %p8269_p1, %p8266_p0 }
   0x9   :  { %8274 = shalt.err (!%p8271_p2)
}
   0xa   :  { %s8275_s27 = scalar_lea.vmem %s30_s19, 256  ;;  %p8280_p4 = scmp.lt.s32.totalorder %s30_s19, %s30_s19 }
   0xb   :  { %p8276_p3 = scmp.ne.s32.totalorder %s30_s19, %s8275_s27  ;;  %p8281_p5 = scmp.lt.s32.totalorder %s8275_s27, %s8275_s27 }
   0xd   :  { %p8282_p6 = por %p8281_p5, %p8280_p4 }
   0xf   :  { %p8283_p7 = pnand %p8282_p6, %p8276_p3 }
  0x11   :  { %8286 = shalt.err (!%p8283_p7)
}
  0x12   :  { %s8384_s28 = smov 128   ;;  %s8385_s29 = smov 8  }
  0x13   :  { %35 = dma.hbm_to_vmem [thread:$0]  %s11083_s1, 256, %s30_s19, [#allocation6], %s8384_s28, %s8384_s28, %s8385_s29  }
  0x14   :  { %s8386_s7 = smov [#allocation2]   ;;  %s8387_s9 = smov [#allocation7]  }
  0x15   :  { %s20_s8 = sshll.u32 %s8386_s7, 4  ;;  %s41_s10 = sshll.u32 %s8387_s9, 4  ;;  %s21_s8 = int_to_ptr.vmem [resolvable:$true] %s20_s8  ;;  %s42_s10 = int_to_ptr.vmem [resolvable:$true] %s41_s10 }
  0x16   :  { %s8287_s13 = scalar_lea.hbm %s11082_s0, 128 }
  0x17   :  { %p8288_p8 = scmp.ne.s32.totalorder %s11082_s0, %s8287_s13  ;;  %p8291_p9 = scmp.lt.u32.totalorder %s8287_s13, %s11082_s0 }
  0x19   :  { %p8293_p10 = pnand %p8291_p9, %p8288_p8 }
  0x1b   :  { %8296 = shalt.err (!%p8293_p10)
}
  0x1c   :  { %s8297_s1 = scalar_lea.vmem %s21_s8, 128  ;;  %p8302_p12 = scmp.lt.s32.totalorder %s21_s8, %s21_s8 }
  0x1d   :  { %p8298_p11 = scmp.ne.s32.totalorder %s21_s8, %s8297_s1  ;;  %p8303_p13 = scmp.lt.s32.totalorder %s8297_s1, %s8297_s1 }
  0x1f   :  { %p8304_p0 = por %p8303_p13, %p8302_p12 }
  0x21   :  { %p8305_p1 = pnand %p8304_p0, %p8298_p11 }
  0x23   :  { %8308 = shalt.err (!%p8305_p1)
}
  0x24   :  { %23 = dma.hbm_to_vmem [thread:$0]  %s11082_s0, 128, %s21_s8, [#allocation3]  }
  0x25   :  { %s8309_s22 = scalar_lea.hbm %s11084_s2, 10240 }
  0x26   :  { %p8310_p2 = scmp.ne.s32.totalorder %s11084_s2, %s8309_s22  ;;  %p8313_p3 = scmp.lt.u32.totalorder %s8309_s22, %s11084_s2 }
  0x28   :  { %p8315_p4 = pnand %p8313_p3, %p8310_p2 }
  0x2a   :  { %8318 = shalt.err (!%p8315_p4)
}
  0x2b   :  { %s8319_s27 = scalar_lea.vmem %s42_s10, 10240  ;;  %p8324_p6 = scmp.lt.s32.totalorder %s42_s10, %s42_s10 }
  0x2c   :  { %p8320_p5 = scmp.ne.s32.totalorder %s42_s10, %s8319_s27  ;;  %p8325_p7 = scmp.lt.s32.totalorder %s8319_s27, %s8319_s27 }
  0x2e   :  { %p8326_p8 = por %p8325_p7, %p8324_p6 }
  0x30   :  { %p8327_p9 = pnand %p8326_p8, %p8320_p5 }
  0x32   :  { %8330 = shalt.err (!%p8327_p9)
}
  0x33   :  { %47 = dma.hbm_to_vmem [thread:$0]  %s11084_s2, 10240, %s42_s10, [#allocation6], %s8384_s28, %s8384_s28, %s8385_s29  }
  0x34   :  { %s8388_s6 = smov [#allocation8]   ;;  %s8331_s11 = scalar_lea.hbm %s11085_s3, 10240 }
  0x35   :  { %s53_s7 = sshll.u32 %s8388_s6, 4  ;;  %p8332_p10 = scmp.ne.s32.totalorder %s11085_s3, %s8331_s11  ;;  %s54_s7 = int_to_ptr.vmem [resolvable:$true] %s53_s7 }
  0x36   :  { %p8335_p11 = scmp.lt.u32.totalorder %s8331_s11, %s11085_s3 }
  0x38   :  { %p8337_p12 = pnand %p8335_p11, %p8332_p10 }
  0x3a   :  { %8340 = shalt.err (!%p8337_p12)
}
  0x3b   :  { %s8341_s16 = scalar_lea.vmem %s54_s7, 10240  ;;  %p8346_p0 = scmp.lt.s32.totalorder %s54_s7, %s54_s7 }
  0x3c   :  { %p8342_p13 = scmp.ne.s32.totalorder %s54_s7, %s8341_s16  ;;  %p8347_p1 = scmp.lt.s32.totalorder %s8341_s16, %s8341_s16 }
  0x3e   :  { %p8348_p2 = por %p8347_p1, %p8346_p0 }
  0x40   :  { %p8349_p3 = pnand %p8348_p2, %p8342_p13 }
  0x42   :  { %8352 = shalt.err (!%p8349_p3)
}
  0x43   :  { %59 = dma.hbm_to_vmem [thread:$0]  %s11085_s3, 10240, %s54_s7, [#allocation9], %s8384_s28, %s8384_s28, %s8385_s29  }
  0x44   :  { %8375 = dma.done.wait [#allocation3], 128  }
  0x45   :  { %8376 = vsyncadd [#allocation3], 4294967168 }
  0x46   :  { %8377 = dma.done.wait [#allocation6], 10496  }
  0x47   :  { %8378 = vsyncadd [#allocation6], 4294956800 }
  0x48   :  { %8379 = dma.done.wait [#allocation9], 10240  }
  0x49   :  { %8380 = vsyncadd [#allocation9], 4294957056  ;;  %v11090_v0 = vmov 0.0|0.0   ;;  %vm8390_vm0 = vmmov 0   ;;  %v11088_v1 = vmov 0.0   ;;  %vm77_vm1 = vcmask 130048  }
  0x4a   :  { %7139 = vmatprep.subr.bf16.mxu0 %v11090_v0  ;;  %6693 = vmatprep.mubr.msk.f32.mxu0 %vm8390_vm0, %v11088_v1  ;;  %v75_v2 = vld [vmem:[#allocation5] sm:$0xff]  ;;  %v76_v3 = vld [vmem:[#allocation5 + $0x8] sm:$0xff]  ;;  %v74_v4 = vld [vmem:[#allocation2] sm:$0xff] }
  0x4b   :  { %7130 = vmatprep.subr.bf16.mxu1 %v11090_v0  ;;  %6672 = vmatprep.mubr.msk.f32.mxu1 %vm8390_vm0, %v11088_v1  ;;  %v82_v5 = vand.u32 4294901760, %v75_v2  ;;  %v85_v6 = vand.u32 4294901760, %v76_v3  ;;  %v79_v7 = vsel %vm77_vm1, %v74_v4, 0  ;;  %v631_v52 = vld [vmem:[#allocation7 + $0x80] sm:$0xff]  ;;  %v632_v53 = vld [vmem:[#allocation7 + $0x88] sm:$0xff]  ;;  %v633_v4 = vld [vmem:[#allocation7 + $0x90] sm:$0xff] }
  0x4c   :  { %v148_v8 = vand.u32 4294901760, %v79_v7  ;;  %v663_v54 = vld [vmem:[#allocation7 + $0x180] sm:$0xff]  ;;  %v744_v55 = vand.u32 4294901760, %v631_v52  ;;  %v747_v56 = vand.u32 4294901760, %v632_v53  ;;  %v664_v57 = vld [vmem:[#allocation7 + $0x188] sm:$0xff] }
  0x4d   :  { %v7131_v9 = vpack.c.bf16 %v85_v6, %v82_v5  ;;  %v160_v10 = vsub.f32 %v75_v2, %v82_v5  ;;  %v167_v11 = vsub.f32 %v76_v3, %v85_v6  ;;  %v1606_v58 = vand.u32 4294901760, %v663_v54  ;;  %v615_v59 = vld [vmem:[#allocation7] sm:$0xff]  ;;  %v616_v60 = vld [vmem:[#allocation7 + $0x8] sm:$0xff] }
  0x4e   :  { %v149_v12 = vsub.f32 %v79_v7, %v148_v8  ;;  %v1609_v61 = vand.u32 4294901760, %v664_v57  ;;  %v696_v62 = vand.u32 4294901760, %v615_v59  ;;  %v699_v63 = vand.u32 4294901760, %v616_v60  ;;  %v647_v2 = vld [vmem:[#allocation7 + $0x100] sm:$0xff]  ;;  %v648_v3 = vld [vmem:[#allocation7 + $0x108] sm:$0xff] }
  0x4f   :  { %7141 = vmatpush3.bf16.msra.mxu0 %v7131_v9  ;;  %7132 = vmatpush3.bf16.msra.mxu1 %v7131_v9  ;;  %v161_v13 = vand.u32 4294901760, %v160_v10  ;;  %v168_v14 = vand.u32 4294901760, %v167_v11  ;;  %v7137_v24 = vpack.c.bf16 %v167_v11, %v160_v10  ;;  %v8503_v5 = vpack.c.bf16 %v747_v56, %v744_v55 }
  0x50   :  { %v150_v15 = vand.u32 4294901760, %v149_v12  ;;  %7133 = vmatprep.subr.bf16.mxu1 %v11090_v0  ;;  %7142 = vmatprep.subr.bf16.mxu0 %v11090_v0  ;;  %v8505_v6 = vsub.f32 %v631_v52, %v744_v55  ;;  %v8507_v7 = vsub.f32 %v632_v53, %v747_v56  ;;  %v651_v55 = vld [vmem:[#allocation7 + $0x120] sm:$0xff]  ;;  %v652_v56 = vld [vmem:[#allocation7 + $0x128] sm:$0xff] }
  0x51   :  { %v162_v16 = vsub.f32 %v160_v10, %v161_v13  ;;  %v169_v17 = vsub.f32 %v167_v11, %v168_v14  ;;  %v7143_v18 = vpack.c.bf16 %v168_v14, %v161_v13  ;;  %11633 = vst [vmem:[#allocation16_spill] sm:$0xff] %v8503_v5  ;;  %v665_v10 = vld [vmem:[#allocation7 + $0x190] sm:$0xff]  ;;  %v666_v11 = vld [vmem:[#allocation7 + $0x198] sm:$0xff]  ;;  %v8513_v13 = vsub.f32 %v664_v57, %v1609_v61 }
  0x52   :  { %6694 = vmatmul.mubr.f32.vlgmr.msra.gmra.mrb[0].mxu0 %v150_v15  ;;  %v151_v19 = vsub.f32 %v149_v12, %v150_v15  ;;  %v8515_v14 = vpack.c.bf16 %v699_v63, %v696_v62  ;;  %v8517_v15 = vsub.f32 %v615_v59, %v696_v62  ;;  %v637_v57 = vld [vmem:[#allocation7 + $0xb0] sm:$0xff]  ;;  %v638_v62 = vld [vmem:[#allocation7 + $0xb8] sm:$0xff] }
  0x53   :  { %v163_v20 = vand.u32 4294901760, %v162_v16  ;;  %v170_v21 = vand.u32 4294901760, %v169_v17  ;;  %7144 = vmatpush3.bf16.msra.mxu0 %v7143_v18  ;;  %6700 = vmatprep.mubr.msk.f32.mxu0 %vm8390_vm0, %v11088_v1  ;;  %11636 = vst [vmem:[#allocation19_spill] sm:$0xff] %v8513_v13  ;;  %v617_v16 = vld [vmem:[#allocation7 + $0x10] sm:$0xff]  ;;  %v8520_v17 = vsub.f32 %v616_v60, %v699_v63  ;;  %v1558_v18 = vand.u32 4294901760, %v647_v2 }
  0x54   :  { %v152_v22 = vand.u32 4294901760, %v151_v19  ;;  %7145 = vmatprep.subr.bf16.mxu0 %v11090_v0  ;;  %11637 = vst [vmem:[#allocation20_spill] sm:$0xff] %v8515_v14  ;;  %v1561_v19 = vand.u32 4294901760, %v648_v3  ;;  %v669_v63 = vld [vmem:[#allocation7 + $0x1b0] sm:$0xff] }
  0x55   :  { %v7134_v23 = vpack.c.bf16 %v170_v21, %v163_v20  ;;  %v750_v20 = vand.u32 4294901760, %v633_v4  ;;  %v618_v21 = vld [vmem:[#allocation7 + $0x18] sm:$0xff] }
  0x56   :  { %6673 = vmatmul.mubr.f32.vlgmr.msra.gmra.mrb[0].mxu1 %v152_v22 }
  0x57   :  { %7135 = vmatpush3.bf16.msra.mxu1 %v7134_v23  ;;  %6679 = vmatprep.mubr.msk.f32.mxu1 %vm8390_vm0, %v11088_v1  ;;  %v1612_v23 = vand.u32 4294901760, %v665_v10 }
  0x58   :  { %7136 = vmatprep.subr.bf16.mxu1 %v11090_v0  ;;  %v8615_v0 = vld [vmem:[#allocation7 + $0xc0] sm:$0xff] }
  0x5a   :  { %6701 = vmatmul.mubr.f32.vlgmr.msra.gmra.mrb[0].mxu0 %v148_v8 }
  0x5b   :  { %7147 = vmatpush3.bf16.msra.mxu0 %v7131_v9  ;;  %6707 = vmatprep.mubr.msk.f32.mxu0 %vm8390_vm0, %v11088_v1  ;;  %v634_v9 = vld [vmem:[#allocation7 + $0x98] sm:$0xff] }
  0x5c   :  { %7149 = vmatprep.subr.bf16.mxu0 %v8503_v5  ;;  %v753_v22 = vand.u32 4294901760, %v634_v9  ;;  %v626_v5 = vld [vmem:[#allocation7 + $0x58] sm:$0xff] }
  0x5e   :  { %6680 = vmatmul.mubr.f32.vlgmr.msra.gmra.mrb[0].mxu1 %v148_v8 }
  0x5f   :  { %7138 = vmatpush3.bf16.msra.mxu1 %v7137_v24  ;;  %6686 = vmatprep.mubr.msk.f32.mxu1 %vm8390_vm0, %v11088_v1  ;;  %v1615_v24 = vand.u32 4294901760, %v666_v11 }
  0x62   :  { %6708 = vmatmul.mubr.f32.vlgmr.msra.gmra.mrb[0].mxu0 %v148_v8  ;;  %v8509_v8 = vsub.f32 %v663_v54, %v1606_v58 }
  0x63   :  { %7151 = vmatpush3.bf16.msra.mxu0 %v8515_v14  ;;  %v625_v14 = vld [vmem:[#allocation7 + $0x50] sm:$0xff] }
  0x64   :  { %11634 = vst [vmem:[#allocation17_spill] sm:$0xff] %v8509_v8 }
  0x66   :  { %6687 = vmatmul.mubr.f32.vlgmr.msra.gmra.mrb[0].mxu1 %v149_v12  ;;  %v8511_v12 = vpack.c.bf16 %v1609_v61, %v1606_v58 }
  0x68   :  { %11635 = vst [vmem:[#allocation18_spill] sm:$0xff] %v8511_v12  ;;  %7341 = vmatprep.subr.bf16.mxu1 %v8511_v12 }
 0x135   :  { %v536_v25 = vpop.f32.mrb[0].mxu0 }
 0x136   :  { %v6709_v26 = vpop.f32.mrb[1].mxu0 }
 0x137   :  { %v649_v26 = vld [vmem:[#allocation7 + $0x110] sm:$0xff] }
 0x139   :  { %v311_v27 = vpop.f32.mrb[0].mxu1 }
 0x13a   :  { %v8204_v28 = vadd.f32 %v536_v25, %v311_v27  ;;  %v6688_v29 = vpop.f32.mrb[1].mxu1  ;;  %v702_v25 = vand.u32 4294901760, %v617_v16  ;;  %v650_v27 = vld [vmem:[#allocation7 + $0x118] sm:$0xff] }
 0x13b   :  { %v8526_v29 = vsub.f32 %v647_v2, %v1558_v18  ;;  %v670_v2 = vld [vmem:[#allocation7 + $0x1b8] sm:$0xff] }
 0x13c   :  { %v540_v30 = vrot.slane %v8204_v28, 4  ;;  %v546_v31 = vmul.f32 %v8204_v28, %v8204_v28 }
 0x13d   :  { %11639 = vst [vmem:[#allocation22_spill] sm:$0xff] %v8526_v29  ;;  %v628_v29 = vld [vmem:[#allocation7 + $0x68] sm:$0xff] }
 0x13e   :  { %v541_v32 = vadd.f32 %v8204_v28, %v540_v30  ;;  %v547_v33 = vrot.slane %v546_v31, 4  ;;  %v8528_v30 = vsub.f32 %v648_v3, %v1561_v19 }
 0x140   :  { %v542_v34 = vrot.slane %v541_v32, 2  ;;  %v548_v35 = vadd.f32 %v547_v33, %v546_v31  ;;  %11640 = vst [vmem:[#allocation23_spill] sm:$0xff] %v8528_v30  ;;  %v8530_v31 = vsub.f32 %v633_v4, %v750_v20  ;;  %v636_v33 = vld [vmem:[#allocation7 + $0xa8] sm:$0xff]  ;;  %v627_v30 = vld [vmem:[#allocation7 + $0x60] sm:$0xff] }
 0x142   :  { %v549_v36 = vrot.slane %v548_v35, 2  ;;  %v543_v37 = vadd.f32 %v542_v34, %v541_v32  ;;  %v635_v32 = vld [vmem:[#allocation7 + $0xa0] sm:$0xff] }
 0x143   :  { %v667_v34 = vld [vmem:[#allocation7 + $0x1a0] sm:$0xff] }
 0x144   :  { %v550_v38 = vadd.f32 %v549_v36, %v548_v35  ;;  %v544_v39 = vrot.slane %v543_v37, 1  ;;  %v8532_v35 = vpack.c.bf16 %v753_v22, %v750_v20  ;;  %v8534_v36 = vsub.f32 %v634_v9, %v753_v22 }
 0x145   :  { %v762_v20 = vand.u32 4294901760, %v637_v57  ;;  %v1624_v22 = vand.u32 4294901760, %v669_v63 }
 0x146   :  { %v551_v40 = vrot.slane %v550_v38, 1  ;;  %v545_v41 = vadd.f32 %v544_v39, %v543_v37  ;;  %11641 = vst [vmem:[#allocation24_spill] sm:$0xff] %v8532_v35  ;;  %v8536_v37 = vpack.c.bf16 %v1615_v24, %v1612_v23  ;;  %v668_v39 = vld [vmem:[#allocation7 + $0x1a8] sm:$0xff]  ;;  %7153 = vmatprep.subr.bf16.mxu0 %v8532_v35  ;;  %v674_v35 = vld [vmem:[#allocation7 + $0x1d8] sm:$0xff] }
 0x147   :  { %v1621_v54 = vand.u32 4294901760, %v668_v39 }
 0x148   :  { %v552_v42 = vadd.f32 %v551_v40, %v550_v38  ;;  %v553_v43 = vmul.f32 0.125, %v545_v41  ;;  %11642 = vst [vmem:[#allocation25_spill] sm:$0xff] %v8536_v37  ;;  %v8538_v38 = vsub.f32 %v665_v10, %v1612_v23  ;;  %v8541_v40 = vsub.f32 %v666_v11, %v1615_v24  ;;  %v621_v24 = vld [vmem:[#allocation7 + $0x30] sm:$0xff] }
 0x149   :  { %v705_v41 = vand.u32 4294901760, %v618_v21  ;;  %v8568_v10 = vsub.f32 %v668_v39, %v1621_v54  ;;  %v1627_v23 = vand.u32 4294901760, %v670_v2  ;;  %v654_v39 = vld [vmem:[#allocation7 + $0x138] sm:$0xff] }
 0x14a   :  { %v554_v44 = vmul.f32 0.125, %v552_v42  ;;  %v555_v45 = vmul.f32 %v553_v43, %v553_v43  ;;  %v557_v48 = vsub.f32 %v8204_v28, %v553_v43  ;;  %v8524_v28 = vpack.c.bf16 %v1561_v19, %v1558_v18  ;;  %11643 = vst [vmem:[#allocation26_spill] sm:$0xff] %v8538_v38  ;;  %11644 = vst [vmem:[#allocation27_spill] sm:$0xff] %v8541_v40 }
 0x14b   :  { %v8543_v42 = vsub.f32 %v617_v16, %v702_v25  ;;  %v1564_v43 = vand.u32 4294901760, %v649_v26  ;;  %v8549_v52 = vsub.f32 %v618_v21, %v705_v41  ;;  %11654 = vst [vmem:[#allocation37_spill] sm:$0xff] %v8568_v10  ;;  %v1570_v18 = vand.u32 4294901760, %v651_v55 }
 0x14c   :  { %v556_v46 = vsub.f32 %v554_v44, %v555_v45  ;;  %11638 = vst [vmem:[#allocation21_spill] sm:$0xff] %v8524_v28  ;;  %7343 = vmatpush3.bf16.msra.mxu1 %v8524_v28  ;;  %v1567_v44 = vand.u32 4294901760, %v650_v27  ;;  %v756_v45 = vand.u32 4294901760, %v635_v32  ;;  %v1573_v19 = vand.u32 4294901760, %v652_v56 }
 0x14d   :  { %7345 = vmatprep.subr.bf16.mxu1 %v8536_v37  ;;  %v8551_v53 = vsub.f32 %v649_v26, %v1564_v43  ;;  %v765_v21 = vand.u32 4294901760, %v638_v62 }
 0x14e   :  { %v558_v47 = vadd.f32 1e-05, %v556_v46  ;;  %v759_v46 = vand.u32 4294901760, %v636_v33  ;;  %v8553_v58 = vpack.c.bf16 %v1567_v44, %v1564_v43  ;;  %v8555_v59 = vsub.f32 %v650_v27, %v1567_v44 }
 0x14f   :  { %11646 = vst [vmem:[#allocation29_spill] sm:$0xff] %v8551_v53  ;;  %v8559_v61 = vsub.f32 %v635_v32, %v756_v45  ;;  %v8579_v32 = vpack.c.bf16 %v1573_v19, %v1570_v18  ;;  %v8583_v43 = vsub.f32 %v652_v56, %v1573_v19  ;;  %v8585_v44 = vpack.c.bf16 %v765_v21, %v762_v20 }
 0x150   :  { %8257 = vrsqrt.f32 %v558_v47  ;;  %v1618_v47 = vand.u32 4294901760, %v667_v34  ;;  %11647 = vst [vmem:[#allocation30_spill] sm:$0xff] %v8553_v58  ;;  %11648 = vst [vmem:[#allocation31_spill] sm:$0xff] %v8555_v59  ;;  %v8557_v60 = vpack.c.bf16 %v759_v46, %v756_v45  ;;  %v8562_v3 = vsub.f32 %v636_v33, %v759_v46  ;;  %7347 = vmatpush3.bf16.msra.mxu1 %v8553_v58  ;;  %v622_v33 = vld [vmem:[#allocation7 + $0x38] sm:$0xff] }
 0x151   :  { %11650 = vst [vmem:[#allocation33_spill] sm:$0xff] %v8559_v61  ;;  %11658 = vst [vmem:[#allocation41_spill] sm:$0xff] %v8579_v32  ;;  %v8587_v45 = vsub.f32 %v637_v57, %v762_v20  ;;  %v8591_v46 = vsub.f32 %v638_v62, %v765_v21 }
 0x152   :  { %11649 = vst [vmem:[#allocation32_spill] sm:$0xff] %v8557_v60  ;;  %11651 = vst [vmem:[#allocation34_spill] sm:$0xff] %v8562_v3  ;;  %v8564_v4 = vpack.c.bf16 %v1621_v54, %v1618_v47  ;;  %v8566_v9 = vsub.f32 %v667_v34, %v1618_v47  ;;  %v653_v34 = vld [vmem:[#allocation7 + $0x130] sm:$0xff]  ;;  %v8593_v47 = vpack.c.bf16 %v1627_v23, %v1624_v22 }
 0x153   :  { %11660 = vst [vmem:[#allocation43_spill] sm:$0xff] %v8583_v43  ;;  %11661 = vst [vmem:[#allocation44_spill] sm:$0xff] %v8585_v44  ;;  %v8598_v54 = vsub.f32 %v670_v2, %v1627_v23  ;;  %v1576_v56 = vand.u32 4294901760, %v653_v34  ;;  %v658_v43 = vld [vmem:[#allocation7 + $0x158] sm:$0xff] }
 0x154   :  { %11652 = vst [vmem:[#allocation35_spill] sm:$0xff] %v8564_v4  ;;  %11653 = vst [vmem:[#allocation36_spill] sm:$0xff] %v8566_v9  ;;  %7349 = vmatprep.subr.bf16.mxu1 %v8564_v4  ;;  %v656_v4 = vld [vmem:[#allocation7 + $0x148] sm:$0xff]  ;;  %v1591_v9 = vand.u32 4294901760, %v658_v43 }
 0x155   :  { %11662 = vst [vmem:[#allocation45_spill] sm:$0xff] %v8587_v45  ;;  %7351 = vmatpush3.bf16.msra.mxu1 %v8579_v32  ;;  %11663 = vst [vmem:[#allocation46_spill] sm:$0xff] %v8591_v46  ;;  %v1585_v12 = vand.u32 4294901760, %v656_v4 }
 0x156   :  { %11664 = vst [vmem:[#allocation47_spill] sm:$0xff] %v8593_v47  ;;  %11666 = vst [vmem:[#allocation49_spill] sm:$0xff] %v8598_v54  ;;  %7353 = vmatprep.subr.bf16.mxu1 %v8593_v47  ;;  %v624_v47 = vld [vmem:[#allocation7 + $0x48] sm:$0xff]  ;;  %v726_v54 = vand.u32 4294901760, %v625_v14 }
 0x157   :  { %v723_v37 = vand.u32 4294901760, %v624_v47  ;;  %v8664_v61 = vsub.f32 %v656_v4, %v1585_v12  ;;  %v645_v4 = vld [vmem:[#allocation7 + $0xf0] sm:$0xff] }
 0x159   :  { %11686 = vst [vmem:[#allocation69_spill] sm:$0xff] %v8664_v61 }
 0x15a   :  { %v8258_v49 = vpop.eup %8257 }
 0x15b   :  { %v8498_v50 = vmul.f32 %v8258_v49, %v557_v48  ;;  %v619_v48 = vld [vmem:[#allocation7 + $0x20] sm:$0xff]  ;;  %v620_v49 = vld [vmem:[#allocation7 + $0x28] sm:$0xff] }
 0x15c   :  { %v708_v11 = vand.u32 4294901760, %v619_v48  ;;  %v711_v16 = vand.u32 4294901760, %v620_v49 }
 0x15d   :  { %11632 = vst [vmem:[#allocation15_spill] sm:$0xff] %v8498_v50  ;;  %561 = vadd.xlane.f32.xlu0 %v8498_v50  ;;  %v570_v51 = vmul.f32 %v8498_v50, %v8498_v50 }
 0x15e   :  { %v8575_v26 = vsub.f32 %v619_v48, %v708_v11  ;;  %v8577_v27 = vsub.f32 %v620_v49, %v711_v16  ;;  %v8595_v48 = vsub.f32 %v669_v63, %v1624_v22  ;;  %v714_v49 = vand.u32 4294901760, %v621_v24 }
 0x15f   :  { %v8609_v63 = vsub.f32 %v653_v34, %v1576_v56  ;;  %v8617_v34 = vld [vmem:[#allocation7 + $0xc8] sm:$0xff] }
 0x160   :  { %11656 = vst [vmem:[#allocation39_spill] sm:$0xff] %v8575_v26  ;;  %11657 = vst [vmem:[#allocation40_spill] sm:$0xff] %v8577_v27  ;;  %v8601_v57 = vsub.f32 %v621_v24, %v714_v49 }
 0x161   :  { %571 = vadd.xlane.f32.xlu0 %v570_v51  ;;  %v8547_v51 = vpack.c.bf16 %v705_v41, %v702_v25  ;;  %v8573_v25 = vpack.c.bf16 %v711_v16, %v708_v11  ;;  %v8581_v41 = vsub.f32 %v651_v55, %v1570_v18  ;;  %11665 = vst [vmem:[#allocation48_spill] sm:$0xff] %v8595_v48  ;;  %v717_v55 = vand.u32 4294901760, %v622_v33  ;;  %v657_v48 = vld [vmem:[#allocation7 + $0x150] sm:$0xff] }
 0x162   :  { %v1579_v11 = vand.u32 4294901760, %v654_v39  ;;  %11667 = vst [vmem:[#allocation50_spill] sm:$0xff] %v8601_v57  ;;  %11671 = vst [vmem:[#allocation54_spill] sm:$0xff] %v8609_v63  ;;  %v1639_v63 = vand.u32 4294901760, %v674_v35  ;;  %v1588_v10 = vand.u32 4294901760, %v657_v48  ;;  %v735_v57 = vand.u32 4294901760, %v628_v29 }
 0x163   :  { %11645 = vst [vmem:[#allocation28_spill] sm:$0xff] %v8547_v51  ;;  %7155 = vmatpush3.bf16.msra.mxu0 %v8547_v51  ;;  %11655 = vst [vmem:[#allocation38_spill] sm:$0xff] %v8573_v25  ;;  %v8603_v16 = vpack.c.bf16 %v717_v55, %v714_v49  ;;  %v8605_v62 = vsub.f32 %v622_v33, %v717_v55  ;;  %v673_v51 = vld [vmem:[#allocation7 + $0x1d0] sm:$0xff] }
 0x164   :  { %7157 = vmatprep.subr.bf16.mxu0 %v8557_v60  ;;  %11659 = vst [vmem:[#allocation42_spill] sm:$0xff] %v8581_v41  ;;  %v8607_v18 = vpack.c.bf16 %v1579_v11, %v1576_v56  ;;  %v8611_v19 = vsub.f32 %v654_v39, %v1579_v11  ;;  %v8619_v39 = vld [vmem:[#allocation7 + $0x1c0] sm:$0xff]  ;;  %v768_v56 = vand.u32 4294901760, %v8615_v0  ;;  %v771_v11 = vand.u32 4294901760, %v8617_v34  ;;  %v642_v60 = vld [vmem:[#allocation7 + $0xd8] sm:$0xff] }
 0x165   :  { %11668 = vst [vmem:[#allocation51_spill] sm:$0xff] %v8603_v16  ;;  %11669 = vst [vmem:[#allocation52_spill] sm:$0xff] %v8605_v62  ;;  %v729_v41 = vand.u32 4294901760, %v626_v5  ;;  %v8643_v40 = vpack.c.bf16 %v1591_v9, %v1588_v10  ;;  %v732_v62 = vand.u32 4294901760, %v627_v30 }
 0x166   :  { %11670 = vst [vmem:[#allocation53_spill] sm:$0xff] %v8607_v18  ;;  %11672 = vst [vmem:[#allocation55_spill] sm:$0xff] %v8611_v19  ;;  %7355 = vmatpush3.bf16.msra.mxu1 %v8607_v18  ;;  %v672_v18 = vld [vmem:[#allocation7 + $0x1c8] sm:$0xff]  ;;  %v8624_v58 = vpack.c.bf16 %v771_v11, %v768_v56  ;;  %v8647_v46 = vsub.f32 %v8615_v0, %v768_v56  ;;  %v659_v56 = vld [vmem:[#allocation7 + $0x160] sm:$0xff] }
 0x167   :  { %7159 = vmatpush3.bf16.msra.mxu0 %v8573_v25  ;;  %v641_v25 = vld [vmem:[#allocation7 + $0xd0] sm:$0xff]  ;;  %v8641_v53 = vpack.c.bf16 %v729_v41, %v726_v54  ;;  %11680 = vst [vmem:[#allocation63_spill] sm:$0xff] %v8643_v40 }
 0x168   :  { %7161 = vmatprep.subr.bf16.mxu0 %v8585_v44  ;;  %11673 = vst [vmem:[#allocation56_spill] sm:$0xff] %v8624_v58 }
 0x169   :  { %11679 = vst [vmem:[#allocation62_spill] sm:$0xff] %v8641_v53 }
 0x16b   :  { %7163 = vmatpush3.bf16.msra.mxu0 %v8603_v16 }
 0x16c   :  { %7165 = vmatprep.subr.bf16.mxu0 %v8624_v58 }
 0x1ea   :  { %v562_v2 = vpop.xlane.xlu0 %561 }
 0x1eb   :  { %v563_v20 = vrot.slane %v562_v2, 4 }
 0x1ed   :  { %v564_v21 = vadd.f32 %v563_v20, %v562_v2  ;;  %v1630_v2 = vand.u32 4294901760, %v8619_v39  ;;  %v623_v20 = vld [vmem:[#allocation7 + $0x40] sm:$0xff] }
 0x1ee   :  { %v572_v22 = vpop.xlane.xlu0 %571 }
 0x1ef   :  { %v565_v23 = vrot.slane %v564_v21, 2  ;;  %v573_v24 = vrot.slane %v572_v22, 4  ;;  %v8653_v45 = vsub.f32 %v8619_v39, %v1630_v2 }
 0x1f1   :  { %v574_v49 = vadd.f32 %v573_v24, %v572_v22  ;;  %v566_v1 = vadd.f32 %v565_v23, %v564_v21  ;;  %v1633_v21 = vand.u32 4294901760, %v672_v18  ;;  %v720_v23 = vand.u32 4294901760, %v623_v20  ;;  %v655_v24 = vld [vmem:[#allocation7 + $0x140] sm:$0xff]  ;;  %11681 = vst [vmem:[#allocation64_spill] sm:$0xff] %v8653_v45 }
 0x1f2   :  { %v1582_v28 = vand.u32 4294901760, %v655_v24 }
 0x1f3   :  { %v575_v33 = vrot.slane %v574_v49, 2  ;;  %v567_v55 = vrot.slane %v566_v1, 1  ;;  %v8626_v44 = vpack.c.bf16 %v1633_v21, %v1630_v2  ;;  %v8655_v27 = vsub.f32 %v672_v18, %v1633_v21 }
 0x1f4   :  { %v8658_v26 = vsub.f32 %v623_v20, %v720_v23  ;;  %v8662_v3 = vsub.f32 %v655_v24, %v1582_v28  ;;  %v8673_v18 = vsub.f32 %v674_v35, %v1639_v63  ;;  %v8677_v2 = vsub.f32 %v626_v5, %v729_v41 }
 0x1f5   :  { %v576_v32 = vadd.f32 %v575_v33, %v574_v49  ;;  %v568_v22 = vadd.f32 %v567_v55, %v566_v1  ;;  %11674 = vst [vmem:[#allocation57_spill] sm:$0xff] %v8626_v44  ;;  %v8629_v49 = vpack.c.bf16 %v723_v37, %v720_v23  ;;  %v8631_v1 = vpack.c.bf16 %v1585_v12, %v1582_v28  ;;  %v660_v12 = vld [vmem:[#allocation7 + $0x168] sm:$0xff]  ;;  %v630_v23 = vld [vmem:[#allocation7 + $0x78] sm:$0xff] }
 0x1f6   :  { %v774_v33 = vand.u32 4294901760, %v641_v25  ;;  %v777_v55 = vand.u32 4294901760, %v642_v60  ;;  %7357 = vmatprep.subr.bf16.mxu1 %v8626_v44  ;;  %v675_v44 = vld [vmem:[#allocation7 + $0x1e0] sm:$0xff]  ;;  %11682 = vst [vmem:[#allocation65_spill] sm:$0xff] %v8655_v27  ;;  %11683 = vst [vmem:[#allocation66_spill] sm:$0xff] %v8658_v26  ;;  %v8681_v28 = vsub.f32 %v658_v43, %v1591_v9  ;;  %v8695_v9 = vpack.c.bf16 %v735_v57, %v732_v62 }
 0x1f7   :  { %8235 = vpush %v568_v22  ;;  %v577_v16 = vrot.slane %v576_v32, 1  ;;  %11675 = vst [vmem:[#allocation58_spill] sm:$0xff] %v8629_v49  ;;  %v1636_v22 = vand.u32 4294901760, %v673_v51  ;;  %7167 = vmatpush3.bf16.msra.mxu0 %v8629_v49  ;;  %7359 = vmatpush3.bf16.msra.mxu1 %v8631_v1  ;;  %v1642_v50 = vand.u32 4294901760, %v675_v44  ;;  %v8697_v41 = vsub.f32 %v627_v30, %v732_v62 }
 0x1f8   :  { %11676 = vst [vmem:[#allocation59_spill] sm:$0xff] %v8631_v1  ;;  %v8636_v58 = vpack.c.bf16 %v777_v55, %v774_v33  ;;  %v676_v1 = vld [vmem:[#allocation7 + $0x1e8] sm:$0xff]  ;;  %11685 = vst [vmem:[#allocation68_spill] sm:$0xff] %v8662_v3  ;;  %v8667_v0 = vsub.f32 %v641_v25, %v774_v33  ;;  %v8701_v43 = vsub.f32 %v628_v29, %v735_v57  ;;  %v786_v20 = vand.u32 4294901760, %v645_v4  ;;  %v662_v29 = vld [vmem:[#allocation7 + $0x178] sm:$0xff] }
 0x1f9   :  { %v578_v19 = vadd.f32 %v577_v16, %v576_v32  ;;  %v8638_v59 = vpack.c.bf16 %v1639_v63, %v1636_v22  ;;  %v643_v32 = vld [vmem:[#allocation7 + $0xe0] sm:$0xff]  ;;  %v644_v16 = vld [vmem:[#allocation7 + $0xe8] sm:$0xff]  ;;  %v8671_v39 = vsub.f32 %v673_v51, %v1636_v22  ;;  %11690 = vst [vmem:[#allocation73_spill] sm:$0xff] %v8673_v18  ;;  %11692 = vst [vmem:[#allocation75_spill] sm:$0xff] %v8677_v2 }
 0x1fa   :  { %11677 = vst [vmem:[#allocation60_spill] sm:$0xff] %v8636_v58  ;;  %7169 = vmatprep.subr.bf16.mxu0 %v8636_v58  ;;  %v780_v49 = vand.u32 4294901760, %v643_v32  ;;  %v783_v38 = vand.u32 4294901760, %v644_v16  ;;  %v8650_v58 = vsub.f32 %v8617_v34, %v771_v11  ;;  %11687 = vst [vmem:[#allocation70_spill] sm:$0xff] %v8667_v0  ;;  %v8669_v34 = vsub.f32 %v642_v60, %v777_v55  ;;  %v677_v63 = vld [vmem:[#allocation7 + $0x1f0] sm:$0xff] }
 0x1fb   :  { %8237 = vpush %v578_v19  ;;  %11678 = vst [vmem:[#allocation61_spill] sm:$0xff] %v8638_v59  ;;  %7361 = vmatprep.subr.bf16.mxu1 %v8638_v59  ;;  %v1645_v19 = vand.u32 4294901760, %v676_v1  ;;  %7171 = vmatpush3.bf16.msra.mxu0 %v8641_v53  ;;  %v8660_v59 = vsub.f32 %v624_v47, %v723_v37  ;;  %v8675_v11 = vsub.f32 %v625_v14, %v726_v54  ;;  %v646_v47 = vld [vmem:[#allocation7 + $0xf8] sm:$0xff]  ;;  %v629_v54 = vld [vmem:[#allocation7 + $0x70] sm:$0xff] }
 0x1fc   :  { %7363 = vmatpush3.bf16.msra.mxu1 %v8643_v40  ;;  %11688 = vst [vmem:[#allocation71_spill] sm:$0xff] %v8669_v34  ;;  %11689 = vst [vmem:[#allocation72_spill] sm:$0xff] %v8671_v39  ;;  %v8679_v37 = vsub.f32 %v657_v48, %v1588_v10  ;;  %v8683_v25 = vpack.c.bf16 %v783_v38, %v780_v49  ;;  %v8685_v60 = vsub.f32 %v643_v32, %v780_v49  ;;  %v678_v14 = vld [vmem:[#allocation7 + $0x1f8] sm:$0xff]  ;;  %v661_v49 = vld [vmem:[#allocation7 + $0x170] sm:$0xff] }
 0x1fd   :  { %11684 = vst [vmem:[#allocation67_spill] sm:$0xff] %v8660_v59  ;;  %11691 = vst [vmem:[#allocation74_spill] sm:$0xff] %v8675_v11  ;;  %v8687_v51 = vsub.f32 %v644_v16, %v783_v38  ;;  %v8689_v35 = vpack.c.bf16 %v1645_v19, %v1642_v50  ;;  %v8691_v5 = vsub.f32 %v675_v44, %v1642_v50  ;;  %v1594_v38 = vand.u32 4294901760, %v659_v56 }
 0x1fe   :  { %11693 = vst [vmem:[#allocation76_spill] sm:$0xff] %v8679_v37  ;;  %11694 = vst [vmem:[#allocation77_spill] sm:$0xff] %v8681_v28  ;;  %v8693_v10 = vsub.f32 %v676_v1, %v1645_v19  ;;  %7173 = vmatprep.subr.bf16.mxu0 %v8683_v25  ;;  %v1597_v48 = vand.u32 4294901760, %v660_v12  ;;  %v789_v21 = vand.u32 4294901760, %v646_v47  ;;  %v1648_v50 = vand.u32 4294901760, %v677_v63 }
 0x1ff   :  { %11695 = vst [vmem:[#allocation78_spill] sm:$0xff] %v8683_v25  ;;  %11696 = vst [vmem:[#allocation79_spill] sm:$0xff] %v8685_v60  ;;  %7365 = vmatprep.subr.bf16.mxu1 %v8689_v35  ;;  %7175 = vmatpush3.bf16.msra.mxu0 %v8695_v9  ;;  %v1651_v44 = vand.u32 4294901760, %v678_v14  ;;  %v738_v24 = vand.u32 4294901760, %v629_v54  ;;  %v8706_v30 = vsub.f32 %v659_v56, %v1594_v38  ;;  %v741_v19 = vand.u32 4294901760, %v630_v23 }
 0x200   :  { %11697 = vst [vmem:[#allocation80_spill] sm:$0xff] %v8687_v51  ;;  %11698 = vst [vmem:[#allocation81_spill] sm:$0xff] %v8689_v35  ;;  %v8704_v1 = vpack.c.bf16 %v1597_v48, %v1594_v38  ;;  %v8708_v62 = vsub.f32 %v660_v12, %v1597_v48  ;;  %v8710_v33 = vsub.f32 %v645_v4, %v786_v20  ;;  %v1600_v12 = vand.u32 4294901760, %v661_v49 }
 0x201   :  { %11699 = vst [vmem:[#allocation82_spill] sm:$0xff] %v8691_v5  ;;  %11700 = vst [vmem:[#allocation83_spill] sm:$0xff] %v8693_v10  ;;  %v8712_v57 = vpack.c.bf16 %v789_v21, %v786_v20  ;;  %v8714_v55 = vsub.f32 %v646_v47, %v789_v21  ;;  %v8716_v22 = vpack.c.bf16 %v1651_v44, %v1648_v50  ;;  %v1603_v4 = vand.u32 4294901760, %v662_v29 }
 0x202   :  { %11701 = vst [vmem:[#allocation84_spill] sm:$0xff] %v8695_v9  ;;  %11702 = vst [vmem:[#allocation85_spill] sm:$0xff] %v8697_v41  ;;  %v8718_v32 = vsub.f32 %v677_v63, %v1648_v50  ;;  %7367 = vmatpush3.bf16.msra.mxu1 %v8704_v1  ;;  %v8721_v16 = vsub.f32 %v678_v14, %v1651_v44  ;;  %v8723_v56 = vsub.f32 %v629_v54, %v738_v24 }
 0x203   :  { %11703 = vst [vmem:[#allocation86_spill] sm:$0xff] %v8701_v43  ;;  %11704 = vst [vmem:[#allocation87_spill] sm:$0xff] %v8704_v1  ;;  %7177 = vmatprep.subr.bf16.mxu0 %v8712_v57  ;;  %7369 = vmatprep.subr.bf16.mxu1 %v8716_v22  ;;  %v11163_v47 = vand.u32 4294901760, %v8505_v6  ;;  %v11161_v38 = vand.u32 4294901760, %v8507_v7  ;;  %v7404_v63 = vpack.c.bf16 %v8513_v13, %v8509_v8  ;;  %v11162_v54 = vand.u32 4294901760, %v8517_v15 }
 0x204   :  { %11705 = vst [vmem:[#allocation88_spill] sm:$0xff] %v8706_v30  ;;  %11706 = vst [vmem:[#allocation89_spill] sm:$0xff] %v8708_v62  ;;  %v8731_v48 = vpack.c.bf16 %v741_v19, %v738_v24  ;;  %v8733_v14 = vsub.f32 %v630_v23, %v741_v19  ;;  %v8735_v20 = vsub.f32 %v661_v49, %v1600_v12  ;;  %v11168_v24 = vand.u32 4294901760, %v8520_v17 }
 0x205   :  { %11707 = vst [vmem:[#allocation90_spill] sm:$0xff] %v8710_v33  ;;  %11708 = vst [vmem:[#allocation91_spill] sm:$0xff] %v8712_v57  ;;  %v8738_v21 = vpack.c.bf16 %v1603_v4, %v1600_v12  ;;  %v8740_v50 = vsub.f32 %v662_v29, %v1603_v4  ;;  %v923_v44 = vsub.f32 %v8505_v6, %v11163_v47  ;;  %v11173_v49 = vand.u32 4294901760, %v8530_v31 }
 0x206   :  { %11709 = vst [vmem:[#allocation92_spill] sm:$0xff] %v8714_v55  ;;  %11710 = vst [vmem:[#allocation93_spill] sm:$0xff] %v8716_v22  ;;  %v930_v22 = vsub.f32 %v8507_v7, %v11161_v38  ;;  %7179 = vmatpush3.bf16.msra.mxu0 %v8731_v48  ;;  %v811_v23 = vsub.f32 %v8517_v15, %v11162_v54  ;;  %v11176_v12 = vand.u32 4294901760, %v8534_v36  ;;  %v11179_v47 = vand.u32 4294901760, %v8543_v42 }
 0x207   :  { %11711 = vst [vmem:[#allocation94_spill] sm:$0xff] %v8718_v32  ;;  %11712 = vst [vmem:[#allocation95_spill] sm:$0xff] %v8721_v16  ;;  %7371 = vmatpush3.bf16.msra.mxu1 %v8738_v21  ;;  %v924_v29 = vand.u32 4294901760, %v923_v44  ;;  %v818_v38 = vsub.f32 %v8520_v17, %v11168_v24  ;;  %v937_v54 = vsub.f32 %v8530_v31, %v11173_v49  ;;  %v11719_v24 = vld [vmem:[#allocation33_spill] sm:$0xff] }
 0x208   :  { %11713 = vst [vmem:[#allocation96_spill] sm:$0xff] %v8723_v56  ;;  %11714 = vst [vmem:[#allocation97_spill] sm:$0xff] %v8731_v48  ;;  %v931_v19 = vand.u32 4294901760, %v930_v22  ;;  %7405 = vmatprep.subr.bf16.mxu1 %v7404_v63  ;;  %v812_v4 = vand.u32 4294901760, %v811_v23  ;;  %v944_v44 = vsub.f32 %v8534_v36, %v11176_v12  ;;  %v11182_v22 = vand.u32 4294901760, %v8549_v52 }
 0x209   :  { %11715 = vst [vmem:[#allocation98_spill] sm:$0xff] %v8733_v14  ;;  %11716 = vst [vmem:[#allocation99_spill] sm:$0xff] %v8735_v20  ;;  %v938_v63 = vand.u32 4294901760, %v937_v54  ;;  %v825_v23 = vsub.f32 %v8543_v42, %v11179_v47  ;;  %v11187_v35 = vand.u32 4294901760, %v11719_v24  ;;  %v11721_v54 = vld [vmem:[#allocation39_spill] sm:$0xff] }
 0x20a   :  { %11717 = vst [vmem:[#allocation100_spill] sm:$0xff] %v8738_v21  ;;  %11718 = vst [vmem:[#allocation101_spill] sm:$0xff] %v8740_v50  ;;  %v7180_v1 = vpack.c.bf16 %v931_v19, %v924_v29  ;;  %v819_v21 = vand.u32 4294901760, %v818_v38  ;;  %v945_v40 = vand.u32 4294901760, %v944_v44  ;;  %v832_v29 = vsub.f32 %v8549_v52, %v11182_v22  ;;  %v11720_v19 = vld [vmem:[#allocation34_spill] sm:$0xff]  ;;  %v11722_v44 = vld [vmem:[#allocation40_spill] sm:$0xff] }
 0x20b   :  { %v11189_v49 = vand.u32 4294901760, %v11720_v19  ;;  %v826_v12 = vand.u32 4294901760, %v825_v23  ;;  %v951_v38 = vsub.f32 %v11719_v24, %v11187_v35  ;;  %v11193_v57 = vand.u32 4294901760, %v11721_v54 }
 0x20c   :  { %7181 = vmatprep.subr.bf16.mxu0 %v7180_v1  ;;  %v8775_v48 = vpack.c.bf16 %v819_v21, %v812_v4  ;;  %v8781_v47 = vpack.c.bf16 %v945_v40, %v938_v63  ;;  %v833_v9 = vand.u32 4294901760, %v832_v29  ;;  %v11196_v22 = vand.u32 4294901760, %v11722_v44  ;;  %v11723_v4 = vld [vmem:[#allocation45_spill] sm:$0xff]  ;;  %v11724_v63 = vld [vmem:[#allocation46_spill] sm:$0xff] }
 0x20d   :  { %v958_v1 = vsub.f32 %v11720_v19, %v11189_v49  ;;  %v952_v25 = vand.u32 4294901760, %v951_v38  ;;  %v839_v21 = vsub.f32 %v11721_v54, %v11193_v57  ;;  %v11198_v23 = vand.u32 4294901760, %v11723_v4  ;;  %v11725_v49 = vld [vmem:[#allocation50_spill] sm:$0xff] }
 0x20e   :  { %v8791_v53 = vpack.c.bf16 %v833_v9, %v826_v12  ;;  %v846_v40 = vsub.f32 %v11722_v44, %v11196_v22  ;;  %v11199_v29 = vand.u32 4294901760, %v11724_v63  ;;  %v11201_v20 = vand.u32 4294901760, %v11725_v49  ;;  %v11726_v12 = vld [vmem:[#allocation52_spill] sm:$0xff] }
 0x20f   :  { %v959_v35 = vand.u32 4294901760, %v958_v1  ;;  %v840_v50 = vand.u32 4294901760, %v839_v21  ;;  %v965_v38 = vsub.f32 %v11723_v4, %v11198_v23  ;;  %v11202_v1 = vand.u32 4294901760, %v11726_v12 }
 0x210   :  { %v847_v57 = vand.u32 4294901760, %v846_v40  ;;  %v972_v9 = vsub.f32 %v11724_v63, %v11199_v29  ;;  %v853_v21 = vsub.f32 %v11725_v49, %v11201_v20  ;;  %v11204_v22 = vand.u32 4294901760, %v8647_v46 }
 0x211   :  { %v8801_v13 = vpack.c.bf16 %v959_v35, %v952_v25  ;;  %v966_v8 = vand.u32 4294901760, %v965_v38  ;;  %v860_v25 = vsub.f32 %v11726_v12, %v11202_v1  ;;  %v11205_v35 = vand.u32 4294901760, %v8650_v58 }
 0x212   :  { %v8811_v16 = vpack.c.bf16 %v847_v57, %v840_v50  ;;  %v973_v23 = vand.u32 4294901760, %v972_v9  ;;  %v854_v40 = vand.u32 4294901760, %v853_v21  ;;  %v979_v38 = vsub.f32 %v8647_v46, %v11204_v22 }
 0x213   :  { %v11207_v29 = vand.u32 4294901760, %v8658_v26  ;;  %v861_v20 = vand.u32 4294901760, %v860_v25  ;;  %v986_v57 = vsub.f32 %v8650_v58, %v11205_v35  ;;  %v11208_v50 = vand.u32 4294901760, %v8660_v59 }
 0x214   :  { %v8821_v32 = vpack.c.bf16 %v973_v23, %v966_v8  ;;  %v980_v9 = vand.u32 4294901760, %v979_v38  ;;  %v11210_v1 = vand.u32 4294901760, %v8667_v0  ;;  %v11211_v23 = vand.u32 4294901760, %v8669_v34 }
 0x215   :  { %v867_v21 = vsub.f32 %v8658_v26, %v11207_v29  ;;  %v8831_v62 = vpack.c.bf16 %v861_v20, %v854_v40  ;;  %v987_v22 = vand.u32 4294901760, %v986_v57  ;;  %v874_v8 = vsub.f32 %v8660_v59, %v11208_v50  ;;  %v11759_v26 = vld [vmem:[#allocation19_spill] sm:$0xff] }
 0x216   :  { %v993_v38 = vsub.f32 %v8667_v0, %v11210_v1  ;;  %v11213_v35 = vand.u32 4294901760, %v8675_v11  ;;  %v1000_v20 = vsub.f32 %v8669_v34, %v11211_v23  ;;  %v11214_v40 = vand.u32 4294901760, %v8677_v2 }
 0x217   :  { %v868_v25 = vand.u32 4294901760, %v867_v21  ;;  %v8841_v30 = vpack.c.bf16 %v987_v22, %v980_v9  ;;  %v875_v29 = vand.u32 4294901760, %v874_v8  ;;  %v11216_v50 = vand.u32 4294901760, %v8685_v60 }
 0x218   :  { %v994_v57 = vand.u32 4294901760, %v993_v38  ;;  %v881_v21 = vsub.f32 %v8675_v11, %v11213_v35  ;;  %v1001_v1 = vand.u32 4294901760, %v1000_v20  ;;  %v888_v22 = vsub.f32 %v8677_v2, %v11214_v40  ;;  %v11739_v2 = vld [vmem:[#allocation27_spill] sm:$0xff] }
 0x219   :  { %v8851_v10 = vpack.c.bf16 %v875_v29, %v868_v25  ;;  %v11217_v9 = vand.u32 4294901760, %v8687_v51  ;;  %v1007_v38 = vsub.f32 %v8685_v60, %v11216_v50  ;;  %v11219_v23 = vand.u32 4294901760, %v8697_v41 }
 0x21a   :  { %v882_v8 = vand.u32 4294901760, %v881_v21  ;;  %v8861_v5 = vpack.c.bf16 %v1001_v1, %v994_v57  ;;  %v889_v35 = vand.u32 4294901760, %v888_v22  ;;  %v11222_v25 = vand.u32 4294901760, %v8701_v43 }
 0x21b   :  { %v1014_v29 = vsub.f32 %v8687_v51, %v11217_v9  ;;  %v1008_v20 = vand.u32 4294901760, %v1007_v38  ;;  %v895_v21 = vsub.f32 %v8697_v41, %v11219_v23  ;;  %v11221_v40 = vand.u32 4294901760, %v8710_v33  ;;  %v11737_v51 = vld [vmem:[#allocation23_spill] sm:$0xff] }
 0x21c   :  { %v8871_v28 = vpack.c.bf16 %v889_v35, %v882_v8  ;;  %v902_v1 = vsub.f32 %v8701_v43, %v11222_v25  ;;  %v11220_v57 = vand.u32 4294901760, %v8714_v55  ;;  %v11223_v9 = vand.u32 4294901760, %v8723_v56 }
 0x21d   :  { %v1015_v50 = vand.u32 4294901760, %v1014_v29  ;;  %v896_v22 = vand.u32 4294901760, %v895_v21  ;;  %v1021_v38 = vsub.f32 %v8710_v33, %v11221_v40  ;;  %v11224_v8 = vand.u32 4294901760, %v8733_v14 }
 0x21e   :  { %v903_v23 = vand.u32 4294901760, %v902_v1  ;;  %v1028_v35 = vsub.f32 %v8714_v55, %v11220_v57  ;;  %v909_v21 = vsub.f32 %v8723_v56, %v11223_v9  ;;  %v11265_v59 = vand.u32 4294901760, %v11759_v26  ;;  %v9216_v26 = vld [vmem:[#allocation7 + $0x240] sm:$0xff] }
 0x21f   :  { %v8881_v37 = vpack.c.bf16 %v1015_v50, %v1008_v20  ;;  %v1022_v29 = vand.u32 4294901760, %v1021_v38  ;;  %v916_v57 = vsub.f32 %v8733_v14, %v11224_v8 }
 0x220   :  { %v8895_v20 = vpack.c.bf16 %v903_v23, %v896_v22  ;;  %v1029_v1 = vand.u32 4294901760, %v1028_v35  ;;  %v910_v40 = vand.u32 4294901760, %v909_v21 }
 0x221   :  { %v917_v9 = vand.u32 4294901760, %v916_v57 }
 0x222   :  { %v8905_v38 = vpack.c.bf16 %v1029_v1, %v1022_v29 }
 0x223   :  { %v8909_v23 = vpack.c.bf16 %v917_v9, %v910_v40  ;;  %v11727_v40 = vld [vmem:[#allocation15_spill] sm:$0xff] }
 0x228   :  { %s8887_s3 = spop %8235 }
 0x229   :  { %s580_s28 = smul.f32 0.00390625, %s8887_s3 }
 0x22b   :  { %s581_s29 = smul.f32 %s8887_s3, %s580_s28 }
 0x22c   :  { %s8238_s17 = spop %8237 }
 0x22d   :  { %s582_s1 = ssub.f32 %s8238_s17, %s581_s29 }
 0x22f   :  { %s583_s18 = smul.f32 0.003921569, %s582_s1 }
 0x231   :  { %v584_v29 = vstv %s583_s18 }
 0x232   :  { %8259 = vrsqrt.f32 %v584_v29  ;;  %vm587_vm2 = vcmp.eq.f32.partialorder %v584_v29, inf  ;;  %v590_v1 = vand.u32 2147483648, %v584_v29  ;;  %vm589_vm3 = vcmp.eq.f32.partialorder %v584_v29, 0.0 }
 0x23c   :  { %v8260_v35 = vpop.eup %8259 }
 0x23d   :  { %v586_v22 = vmul.f32 %v8260_v35, %v584_v29  ;;  %v593_v35 = vstv %s580_s28 }
 0x23f   :  { %v588_v50 = vsel %vm587_vm2, %v584_v29, %v586_v22  ;;  %v8943_v22 = vsub.f32 %v11727_v40, %v593_v35 }
 0x240   :  { %v591_v25 = vsel %vm589_vm3, %v590_v1, %v588_v50 }
 0x241   :  { %8239 = vpush %v591_v25  ;;  %11728 = vst [vmem:[#allocation33_spill] sm:$0xff] %v8943_v22 }
 0x272   :  { %s8939_s19 = spop %8239 }
 0x273   :  { %s595_s20 = smul.f32 -2.02, %s8939_s19 }
 0x274   :  { %s599_s21 = smul.f32 -0.765, %s8939_s19 }
 0x275   :  { %v596_v25 = vstv %s595_s20  ;;  %s603_s22 = smul.f32 -0.195, %s8939_s19 }
 0x276   :  { %v597_v50 = vsub.f32 %v8943_v22, %v596_v25  ;;  %v600_v29 = vstv %s599_s21  ;;  %s607_s23 = smul.f32 0.315, %s8939_s19 }
 0x277   :  { %v601_v1 = vsub.f32 %v8943_v22, %v600_v29  ;;  %v604_v21 = vstv %s603_s22  ;;  %s611_s24 = smul.f32 0.93, %s8939_s19 }
 0x278   :  { %v598_v8 = vmax.f32 %v597_v50, 0.0  ;;  %v605_v57 = vsub.f32 %v8943_v22, %v604_v21  ;;  %v608_v9 = vstv %s607_s23 }
 0x279   :  { %v602_v56 = vmax.f32 %v601_v1, 0.0  ;;  %v609_v14 = vsub.f32 %v8943_v22, %v608_v9 }
 0x27a   :  { %v606_v33 = vmax.f32 %v605_v57, 0.0  ;;  %v8952_v40 = vand.u32 4294901760, %v598_v8 }
 0x27b   :  { %v610_v35 = vmax.f32 %v609_v14, 0.0  ;;  %v8954_v55 = vand.u32 4294901760, %v602_v56 }
 0x27c   :  { %11729 = vst [vmem:[#allocation34_spill] sm:$0xff] %v8952_v40  ;;  %v8956_v41 = vand.u32 4294901760, %v606_v33  ;;  %v8959_v25 = vsub.f32 %v598_v8, %v8952_v40 }
 0x27d   :  { %11730 = vst [vmem:[#allocation39_spill] sm:$0xff] %v8954_v55  ;;  %v8961_v29 = vand.u32 4294901760, %v610_v35  ;;  %v8964_v50 = vsub.f32 %v602_v56, %v8954_v55 }
 0x27e   :  { %11731 = vst [vmem:[#allocation40_spill] sm:$0xff] %v8956_v41  ;;  %11732 = vst [vmem:[#allocation45_spill] sm:$0xff] %v8959_v25  ;;  %v11242_v21 = vand.u32 4294901760, %v8959_v25  ;;  %v8968_v9 = vsub.f32 %v606_v33, %v8956_v41 }
 0x27f   :  { %11733 = vst [vmem:[#allocation46_spill] sm:$0xff] %v8961_v29  ;;  %v11249_v57 = vand.u32 4294901760, %v8964_v50  ;;  %v8972_v14 = vsub.f32 %v610_v35, %v8961_v29 }
 0x280   :  { %11734 = vst [vmem:[#allocation50_spill] sm:$0xff] %v8968_v9  ;;  %v800_v8 = vsub.f32 %v8959_v25, %v11242_v21  ;;  %v11254_v1 = vand.u32 4294901760, %v8968_v9  ;;  %v11736_v25 = vld [vmem:[#allocation22_spill] sm:$0xff] }
 0x281   :  { %11735 = vst [vmem:[#allocation52_spill] sm:$0xff] %v8972_v14  ;;  %v794_v56 = vsub.f32 %v8964_v50, %v11249_v57  ;;  %v11255_v22 = vand.u32 4294901760, %v8972_v14  ;;  %v7406_v11 = vpack.c.bf16 %v11737_v51, %v11736_v25  ;;  %v11738_v57 = vld [vmem:[#allocation26_spill] sm:$0xff] }
 0x282   :  { %v801_v43 = vand.u32 4294901760, %v800_v8  ;;  %v1662_v33 = vsub.f32 %v8968_v9, %v11254_v1  ;;  %v7408_v0 = vpack.c.bf16 %v11739_v2, %v11738_v57  ;;  %v11740_v8 = vld [vmem:[#allocation29_spill] sm:$0xff] }
 0x283   :  { %v795_v41 = vand.u32 4294901760, %v794_v56  ;;  %v1656_v35 = vsub.f32 %v8972_v14, %v11255_v22  ;;  %v11741_v56 = vld [vmem:[#allocation31_spill] sm:$0xff]  ;;  %v11747_v1 = vld [vmem:[#allocation49_spill] sm:$0xff] }
 0x284   :  { %v1663_v60 = vand.u32 4294901760, %v1662_v33  ;;  %v11742_v33 = vld [vmem:[#allocation36_spill] sm:$0xff] }
 0x285   :  { %796 = vmatprep.mubr.f32.mxu0 %v795_v41  ;;  %v1657_v21 = vand.u32 4294901760, %v1656_v35  ;;  %v7410_v41 = vpack.c.bf16 %v11741_v56, %v11740_v8 }
 0x286   :  { %802 = vmatmul.mubr.f32.vlgmr.msra.gmra.mrb[2].mxu0 %v801_v43  ;;  %v11743_v43 = vld [vmem:[#allocation37_spill] sm:$0xff] }
 0x287   :  { %1658 = vmatprep.mubr.f32.mxu1 %v1657_v21  ;;  %7183 = vmatpush3.bf16.msra.mxu0 %v8775_v48  ;;  %v7412_v35 = vpack.c.bf16 %v11743_v43, %v11742_v33  ;;  %v11745_v48 = vld [vmem:[#allocation43_spill] sm:$0xff] }
 0x288   :  { %1664 = vmatmul.mubr.f32.vlgmr.msra.gmra.mrb[2].mxu1 %v1663_v60  ;;  %1032 = vmatprep.mubr.f32.mxu0 %v8954_v55  ;;  %v11744_v60 = vld [vmem:[#allocation42_spill] sm:$0xff]  ;;  %v11757_v55 = vld [vmem:[#allocation95_spill] sm:$0xff] }
 0x289   :  { %7407 = vmatpush3.bf16.msra.mxu1 %v7406_v11  ;;  %2031 = vmatprep.mubr.f32.mxu1 %v8972_v14  ;;  %v7414_v21 = vpack.c.bf16 %v11745_v48, %v11744_v60  ;;  %v11746_v11 = vld [vmem:[#allocation48_spill] sm:$0xff] }
 0x28a   :  { %7185 = vmatprep.subr.bf16.mxu0 %v8781_v47  ;;  %7409 = vmatprep.subr.bf16.mxu1 %v7408_v0  ;;  %v7416_v22 = vpack.c.bf16 %v11747_v1, %v11746_v11  ;;  %v11748_v0 = vld [vmem:[#allocation54_spill] sm:$0xff]  ;;  %v11749_v47 = vld [vmem:[#allocation55_spill] sm:$0xff] }
 0x28b   :  { %7187 = vmatpush3.bf16.msra.mxu0 %v8791_v53  ;;  %v7418_v14 = vpack.c.bf16 %v11749_v47, %v11748_v0  ;;  %v7422_v53 = vpack.c.bf16 %v8664_v61, %v8662_v3 }
 0x28c   :  { %7189 = vmatprep.subr.bf16.mxu0 %v8801_v13  ;;  %v7420_v13 = vpack.c.bf16 %v8655_v27, %v8653_v45 }
 0x28d   :  { %7411 = vmatpush3.bf16.msra.mxu1 %v7410_v41 }
 0x28e   :  { %7413 = vmatprep.subr.bf16.mxu1 %v7412_v35  ;;  %v11753_v35 = vld [vmem:[#allocation83_spill] sm:$0xff] }
 0x28f   :  { %7191 = vmatpush3.bf16.msra.mxu0 %v8811_v16  ;;  %v11750_v16 = vld [vmem:[#allocation76_spill] sm:$0xff] }
 0x290   :  { %7193 = vmatprep.subr.bf16.mxu0 %v8821_v32  ;;  %v7424_v32 = vpack.c.bf16 %v8673_v18, %v8671_v39 }
 0x291   :  { %7415 = vmatpush3.bf16.msra.mxu1 %v7414_v21  ;;  %v11755_v21 = vld [vmem:[#allocation89_spill] sm:$0xff] }
 0x292   :  { %7417 = vmatprep.subr.bf16.mxu1 %v7416_v22  ;;  %v11751_v22 = vld [vmem:[#allocation77_spill] sm:$0xff] }
 0x293   :  { %7195 = vmatpush3.bf16.msra.mxu0 %v8831_v62  ;;  %v7426_v41 = vpack.c.bf16 %v11751_v22, %v11750_v16  ;;  %v11752_v62 = vld [vmem:[#allocation82_spill] sm:$0xff] }
 0x294   :  { %7197 = vmatprep.subr.bf16.mxu0 %v8841_v30  ;;  %v7428_v30 = vpack.c.bf16 %v11753_v35, %v11752_v62 }
 0x295   :  { %7419 = vmatpush3.bf16.msra.mxu1 %v7418_v14  ;;  %v11754_v14 = vld [vmem:[#allocation88_spill] sm:$0xff] }
 0x296   :  { %7421 = vmatprep.subr.bf16.mxu1 %v7420_v13  ;;  %v7430_v13 = vpack.c.bf16 %v11755_v21, %v11754_v14  ;;  %v11269_v21 = vand.u32 4294901760, %v11737_v51  ;;  %v11809_v51 = vld [vmem:[#allocation33_spill] sm:$0xff] }
 0x297   :  { %7199 = vmatpush3.bf16.msra.mxu0 %v8851_v10  ;;  %v11756_v10 = vld [vmem:[#allocation94_spill] sm:$0xff] }
 0x298   :  { %7201 = vmatprep.subr.bf16.mxu0 %v8861_v5  ;;  %v7432_v5 = vpack.c.bf16 %v11757_v55, %v11756_v10  ;;  %v11268_v55 = vand.u32 4294901760, %v11738_v57 }
 0x299   :  { %7423 = vmatpush3.bf16.msra.mxu1 %v7422_v53  ;;  %v11758_v53 = vld [vmem:[#allocation17_spill] sm:$0xff] }
 0x29a   :  { %7425 = vmatprep.subr.bf16.mxu1 %v7424_v32  ;;  %v11266_v34 = vand.u32 4294901760, %v11758_v53  ;;  %v11761_v32 = vld [vmem:[#allocation101_spill] sm:$0xff]  ;;  %v9218_v53 = vld [vmem:[#allocation7 + $0x248] sm:$0xff] }
 0x29b   :  { %7203 = vmatpush3.bf16.msra.mxu0 %v8871_v28  ;;  %v11760_v28 = vld [vmem:[#allocation99_spill] sm:$0xff] }
 0x29c   :  { %7205 = vmatprep.subr.bf16.mxu0 %v8881_v37  ;;  %v7434_v37 = vpack.c.bf16 %v11761_v32, %v11760_v28 }
 0x29d   :  { %7427 = vmatpush3.bf16.msra.mxu1 %v7426_v41  ;;  %v11270_v41 = vand.u32 4294901760, %v11736_v25 }
 0x29e   :  { %7429 = vmatprep.subr.bf16.mxu1 %v7428_v30  ;;  %v7468_v30 = vpack.c.bf16 %v11265_v59, %v11266_v34  ;;  %v11271_v59 = vand.u32 4294901760, %v11741_v56  ;;  %v11763_v34 = vpack.c.bf16 %v8520_v17, %v8517_v15  ;;  %v9203_v56 = vld [vmem:[#allocation7 + $0x230] sm:$0xff] }
 0x29f   :  { %7207 = vmatpush3.bf16.msra.mxu0 %v8895_v20  ;;  %v11267_v20 = vand.u32 4294901760, %v11739_v2  ;;  %v2438_v2 = vand.u32 4294901760, %v9203_v56 }
 0x2a0   :  { %7209 = vmatprep.subr.bf16.mxu0 %v8905_v38  ;;  %v11762_v38 = vpack.c.bf16 %v8507_v7, %v8505_v6 }
 0x2a1   :  { %7431 = vmatpush3.bf16.msra.mxu1 %v7430_v13  ;;  %v7470_v13 = vpack.c.bf16 %v11269_v21, %v11270_v41  ;;  %v11765_v41 = vpack.c.bf16 %v8549_v52, %v8543_v42 }
 0x2a2   :  { %7433 = vmatprep.subr.bf16.mxu1 %v7432_v5  ;;  %v11274_v5 = vand.u32 4294901760, %v11740_v8  ;;  %v11807_v8 = vld [vmem:[#allocation32_spill] sm:$0xff] }
 0x2a3   :  { %7211 = vmatpush3.bf16.msra.mxu0 %v8909_v23  ;;  %v7472_v23 = vpack.c.bf16 %v11267_v20, %v11268_v55  ;;  %v11278_v55 = vand.u32 4294901760, %v11744_v60 }
 0x2a4   :  { %7213 = vmatprep.subr.bf16.mxu0 %v11762_v38  ;;  %v11273_v38 = vand.u32 4294901760, %v11742_v33  ;;  %v7474_v20 = vpack.c.bf16 %v11271_v59, %v11274_v5  ;;  %v11766_v59 = vpack.c.bf16 %v11720_v19, %v11719_v24  ;;  %v11281_v5 = vand.u32 4294901760, %v8653_v45  ;;  %v11782_v45 = vld [vmem:[#allocation74_spill] sm:$0xff] }
 0x2a5   :  { %7435 = vmatpush3.bf16.msra.mxu1 %v7434_v37  ;;  %v11272_v37 = vand.u32 4294901760, %v11743_v43  ;;  %v11805_v33 = vmov 0.0  }
 0x2a6   :  { %1034 = vmatmul.mubr.f32.vlgmr.msra.gmra.mrb[4].mxu0 %v8952_v40  ;;  %7469 = vmatprep.subr.bf16.mxu1 %v7468_v30  ;;  %v11764_v30 = vpack.c.bf16 %v8534_v36, %v8530_v31  ;;  %v9232_v40 = vld [vmem:[#allocation7 + $0x258] sm:$0xff] }
 0x2a7   :  { %7215 = vmatpush3.bf16.msra.mxu0 %v11763_v34  ;;  %1169 = vmatprep.mubr.f32.mxu0 %v8964_v50  ;;  %v11275_v34 = vand.u32 4294901760, %v11745_v48  ;;  %v7476_v21 = vpack.c.bf16 %v11272_v37, %v11273_v38  ;;  %v11282_v37 = vand.u32 4294901760, %v11748_v0  ;;  %v11279_v38 = vand.u32 4294901760, %v11749_v47  ;;  %v11791_v47 = vld [vmem:[#allocation90_spill] sm:$0xff] }
 0x2a8   :  { %2034 = vmatmul.mubr.f32.vlgmr.msra.gmra.mrb[4].mxu1 %v8968_v9  ;;  %7217 = vmatprep.subr.bf16.mxu0 %v11764_v30  ;;  %v11277_v30 = vand.u32 4294901760, %v11746_v11  ;;  %v11772_v9 = vld [vmem:[#allocation66_spill] sm:$0xff]  ;;  %v11801_v11 = vand.u32 4294901760, %v8964_v50  ;;  %v9205_v50 = vld [vmem:[#allocation7 + $0x238] sm:$0xff] }
 0x2a9   :  { %7471 = vmatpush3.bf16.msra.mxu1 %v7470_v13  ;;  %2308 = vmatprep.mubr.f32.mxu1 %v8961_v29  ;;  %v11276_v13 = vand.u32 4294901760, %v11747_v1  ;;  %v11787_v29 = vld [vmem:[#allocation86_spill] sm:$0xff]  ;;  %v11798_v1 = vld [vmem:[#allocation45_spill] sm:$0xff]  ;;  %v11344_v57 = vand.u32 4294901760, %v9205_v50 }
 0x2aa   :  { %7473 = vmatprep.subr.bf16.mxu1 %v7472_v23  ;;  %v7478_v23 = vpack.c.bf16 %v11275_v34, %v11278_v55  ;;  %v11768_v34 = vpack.c.bf16 %v11724_v63, %v11723_v4  ;;  %v11291_v55 = vand.u32 4294901760, %v8671_v39  ;;  %v11314_v39 = vand.u32 4294901760, %v11756_v10  ;;  %v11794_v10 = vld [vmem:[#allocation96_spill] sm:$0xff] }
 0x2ab   :  { %7219 = vmatpush3.bf16.msra.mxu0 %v11765_v41  ;;  %v7480_v41 = vpack.c.bf16 %v11276_v13, %v11277_v30  ;;  %v11289_v13 = vand.u32 4294901760, %v8662_v3  ;;  %v11288_v30 = vand.u32 4294901760, %v8664_v61  ;;  %v11774_v61 = vld [vmem:[#allocation71_spill] sm:$0xff] }
 0x2ac   :  { %7221 = vmatprep.subr.bf16.mxu0 %v11766_v59  ;;  %v11280_v59 = vand.u32 4294901760, %v8655_v27  ;;  %v11780_v27 = vld [vmem:[#allocation95_spill] sm:$0xff] }
 0x2ad   :  { %7475 = vmatpush3.bf16.msra.mxu1 %v7474_v20  ;;  %v11767_v20 = vpack.c.bf16 %v11722_v44, %v11721_v54 }
 0x2ae   :  { %7477 = vmatprep.subr.bf16.mxu1 %v7476_v21  ;;  %v7482_v21 = vpack.c.bf16 %v11279_v38, %v11282_v37  ;;  %v11770_v38 = vpack.c.bf16 %v8650_v58, %v8647_v46 }
 0x2af   :  { %7223 = vmatpush3.bf16.msra.mxu0 %v11767_v20  ;;  %v7484_v20 = vpack.c.bf16 %v11280_v59, %v11281_v5  ;;  %v11303_v59 = vand.u32 4294901760, %v11750_v16  ;;  %v11302_v5 = vand.u32 4294901760, %v11751_v22  ;;  %v11784_v22 = vld [vmem:[#allocation80_spill] sm:$0xff] }
 0x2b0   :  { %7225 = vmatprep.subr.bf16.mxu0 %v11768_v34  ;;  %v11290_v34 = vand.u32 4294901760, %v8673_v18  ;;  %v11779_v18 = vand.u32 4294901760, %v11753_v35  ;;  %v679_v35 = vld [vmem:[#allocation7 + $0x200] sm:$0xff] }
 0x2b1   :  { %7479 = vmatpush3.bf16.msra.mxu1 %v7478_v23  ;;  %v11769_v23 = vpack.c.bf16 %v11726_v12, %v11725_v49 }
 0x2b2   :  { %7481 = vmatprep.subr.bf16.mxu1 %v7480_v41  ;;  %v7486_v41 = vpack.c.bf16 %v11288_v30, %v11289_v13  ;;  %v11775_v30 = vld [vmem:[#allocation70_spill] sm:$0xff] }
 0x2b3   :  { %7227 = vmatpush3.bf16.msra.mxu0 %v11769_v23  ;;  %v7488_v23 = vpack.c.bf16 %v11290_v34, %v11291_v55  ;;  %v11776_v13 = vpack.c.bf16 %v11774_v61, %v11775_v30  ;;  %v11312_v34 = vand.u32 4294901760, %v11754_v14  ;;  %v11777_v55 = vld [vmem:[#allocation89_spill] sm:$0xff]  ;;  %v11790_v14 = vld [vmem:[#allocation92_spill] sm:$0xff] }
 0x2b4   :  { %7229 = vmatprep.subr.bf16.mxu0 %v11770_v38  ;;  %v11311_v37 = vand.u32 4294901760, %v11777_v55  ;;  %v11778_v38 = vand.u32 4294901760, %v11752_v62  ;;  %v680_v62 = vld [vmem:[#allocation7 + $0x208] sm:$0xff]  ;;  %v11792_v55 = vpack.c.bf16 %v11790_v14, %v11791_v47  ;;  %v9248_v14 = vld [vmem:[#allocation7 + $0x260] sm:$0xff] }
 0x2b5   :  { %7483 = vmatpush3.bf16.msra.mxu1 %v7482_v21  ;;  %v11771_v21 = vld [vmem:[#allocation67_spill] sm:$0xff] }
 0x2b6   :  { %7485 = vmatprep.subr.bf16.mxu1 %v7484_v20  ;;  %v11773_v3 = vpack.c.bf16 %v11771_v21, %v11772_v9  ;;  %v7490_v20 = vpack.c.bf16 %v11302_v5, %v11303_v59  ;;  %v11785_v5 = vld [vmem:[#allocation79_spill] sm:$0xff] }
 0x2b7   :  { %v11786_v59 = vpack.c.bf16 %v11784_v22, %v11785_v5 }
 0x2b8   :  { %7231 = vmatpush3.bf16.msra.mxu0 %v11773_v3  ;;  %v7492_v3 = vpack.c.bf16 %v11779_v18, %v11778_v38  ;;  %v11321_v18 = vand.u32 4294901760, %v11760_v28  ;;  %v11320_v38 = vand.u32 4294901760, %v11761_v32  ;;  %v9188_v32 = vld [vmem:[#allocation7 + $0x228] sm:$0xff] }
 0x2b9   :  { %7233 = vmatprep.subr.bf16.mxu0 %v11776_v13  ;;  %7487 = vmatpush3.bf16.msra.mxu1 %v7486_v41  ;;  %v11313_v13 = vand.u32 4294901760, %v11780_v27  ;;  %v11781_v41 = vld [vmem:[#allocation75_spill] sm:$0xff]  ;;  %v11793_v27 = vld [vmem:[#allocation98_spill] sm:$0xff]  ;;  %v2435_v43 = vand.u32 4294901760, %v9188_v32 }
 0x2ba   :  { %7489 = vmatprep.subr.bf16.mxu1 %v7488_v23  ;;  %v11783_v16 = vpack.c.bf16 %v11781_v41, %v11782_v45  ;;  %v7494_v23 = vpack.c.bf16 %v11311_v37, %v11312_v34  ;;  %v2420_v37 = vand.u32 4294901760, %v679_v35  ;;  %v2423_v34 = vand.u32 4294901760, %v680_v62 }
 0x2bb   :  { %v11795_v0 = vpack.c.bf16 %v11793_v27, %v11794_v10 }
 0x2bc   :  { %7235 = vmatpush3.bf16.msra.mxu0 %v11783_v16  ;;  %v7496_v16 = vpack.c.bf16 %v11313_v13, %v11314_v39  ;;  %v681_v13 = vld [vmem:[#allocation7 + $0x210] sm:$0xff]  ;;  %v682_v39 = vld [vmem:[#allocation7 + $0x218] sm:$0xff] }
 0x2bd   :  { %7237 = vmatprep.subr.bf16.mxu0 %v11786_v59  ;;  %7491 = vmatpush3.bf16.msra.mxu1 %v7490_v20  ;;  %v11788_v59 = vld [vmem:[#allocation85_spill] sm:$0xff]  ;;  %v2429_v28 = vand.u32 4294901760, %v682_v39 }
 0x2be   :  { %7493 = vmatprep.subr.bf16.mxu1 %v7492_v3  ;;  %v11789_v20 = vpack.c.bf16 %v11787_v29, %v11788_v59  ;;  %v7498_v3 = vpack.c.bf16 %v11320_v38, %v11321_v18  ;;  %v11799_v38 = vmov 0.0|0.0   ;;  %v683_v18 = vld [vmem:[#allocation7 + $0x220] sm:$0xff]  ;;  %v9304_v29 = vsub.f32 %v9203_v56, %v2438_v2 }
 0x2bf   :  { %v2432_v60 = vand.u32 4294901760, %v683_v18  ;;  %v11836_v56 = vand.u32 4294901760, %v9205_v50 }
 0x2c0   :  { %7239 = vmatpush3.bf16.msra.mxu0 %v11789_v20  ;;  %v11796_v20 = vld [vmem:[#allocation16_spill] sm:$0xff] }
 0x2c1   :  { %7241 = vmatprep.subr.bf16.mxu0 %v11792_v55  ;;  %7495 = vmatpush3.bf16.msra.mxu1 %v7494_v23  ;;  %v9184_v55 = vpack.c.bf16 %v2423_v34, %v2420_v37  ;;  %v2426_v23 = vand.u32 4294901760, %v681_v13  ;;  %v9277_v27 = vsub.f32 %v683_v18, %v2432_v60 }
 0x2c2   :  { %7497 = vmatprep.subr.bf16.mxu1 %v7496_v16  ;;  %v11800_v16 = vld [vmem:[#allocation20_spill] sm:$0xff] }
 0x2c3   :  { %11797 = vst [vmem:[#allocation15_spill] sm:$0xff] %v9184_v55  ;;  %v9197_v48 = vpack.c.bf16 %v2429_v28, %v2426_v23 }
 0x2c4   :  { %7243 = vmatpush3.bf16.msra.mxu0 %v11795_v0  ;;  %v11802_v0 = vld [vmem:[#allocation40_spill] sm:$0xff] }
 0x2c5   :  { %7245 = vmatprep.subr.bf16.mxu0 %v11796_v20  ;;  %7499 = vmatpush3.bf16.msra.mxu1 %v7498_v3  ;;  %v11803_v3 = vld [vmem:[#allocation24_spill] sm:$0xff]  ;;  %11804 = vst [vmem:[#allocation67_spill] sm:$0xff] %v9197_v48 }
 0x2c6   :  { %7532 = vmatprep.subr.bf16.mxu1 %v11799_v38  ;;  %v11814_v20 = vld [vmem:[#allocation56_spill] sm:$0xff] }
 0x2c7   :  { %1172 = vmatmul.mubr.f32.vlgmr.msra.gmra.mrb[6].mxu0 %v11798_v1 }
 0x2c8   :  { %7247 = vmatpush3.bf16.msra.mxu0 %v11800_v16  ;;  %1276 = vmatprep.mubr.f32.mxu0 %v11801_v11  ;;  %v612_v11 = vstv %s611_s24  ;;  %v9230_v16 = vld [vmem:[#allocation7 + $0x250] sm:$0xff] }
 0x2c9   :  { %2310 = vmatmul.mubr.f32.vlgmr.msra.gmra.mrb[6].mxu1 %v11802_v0  ;;  %7249 = vmatprep.subr.bf16.mxu0 %v11803_v3  ;;  %v11806_v0 = vld [vmem:[#allocation28_spill] sm:$0xff]  ;;  %v613_v25 = vsub.f32 %v11809_v51, %v612_v11  ;;  %v11810_v3 = vld [vmem:[#allocation38_spill] sm:$0xff]  ;;  %v2447_v51 = vand.u32 4294901760, %v9218_v53 }
 0x2ca   :  { %7534 = vmatpush3.bf16.msra.mxu1 %v9184_v55  ;;  %6742 = vmatprep.mubr.msk.f32.mxu1 %vm8390_vm0, %v11805_v33  ;;  %v9210_v55 = vpack.c.bf16 %v2435_v43, %v2432_v60  ;;  %v11827_v60 = vand.u32 4294901760, %v9248_v14 }
 0x2cb   :  { %7535 = vmatprep.subr.bf16.mxu1 %v11799_v38  ;;  %v614_v11 = vmax.f32 %v613_v25, 0.0  ;;  %v11823_v25 = vld [vmem:[#allocation62_spill] sm:$0xff] }
 0x2cc   :  { %7251 = vmatpush3.bf16.msra.mxu0 %v11806_v0  ;;  %11808 = vst [vmem:[#allocation66_spill] sm:$0xff] %v9210_v55  ;;  %v11811_v0 = vld [vmem:[#allocation44_spill] sm:$0xff] }
 0x2cd   :  { %7253 = vmatprep.subr.bf16.mxu0 %v11807_v8  ;;  %v2444_v8 = vand.u32 4294901760, %v9216_v26  ;;  %v9245_v10 = vand.u32 4294901760, %v614_v11 }
 0x2ce   :  { %7537 = vmatpush3.bf16.msra.mxu1 %v9197_v48  ;;  %v9225_v48 = vpack.c.bf16 %v11344_v57, %v2438_v2 }
 0x2cf   :  { %7538 = vmatprep.subr.bf16.mxu1 %v11799_v38  ;;  %v9241_v57 = vpack.c.bf16 %v2447_v51, %v2444_v8  ;;  %11816 = vst [vmem:[#allocation75_spill] sm:$0xff] %v9245_v10 }
 0x2d0   :  { %7255 = vmatpush3.bf16.msra.mxu0 %v11810_v3  ;;  %11812 = vst [vmem:[#allocation71_spill] sm:$0xff] %v9225_v48  ;;  %v11813_v3 = vld [vmem:[#allocation51_spill] sm:$0xff] }
 0x2d1   :  { %7257 = vmatprep.subr.bf16.mxu0 %v11811_v0  ;;  %v9235_v0 = vsub.f32 %v679_v35, %v2420_v37  ;;  %11815 = vst [vmem:[#allocation70_spill] sm:$0xff] %v9241_v57  ;;  %v9250_v35 = vld [vmem:[#allocation7 + $0x268] sm:$0xff]  ;;  %v9253_v37 = vsub.f32 %v681_v13, %v2426_v23  ;;  %v9275_v23 = vsub.f32 %v614_v11, %v9245_v10 }
 0x2d2   :  { %7540 = vmatpush3.bf16.msra.mxu1 %v9210_v55  ;;  %v9237_v55 = vsub.f32 %v680_v62, %v2423_v34  ;;  %v11817_v62 = vld [vmem:[#allocation58_spill] sm:$0xff]  ;;  %v9255_v34 = vsub.f32 %v682_v39, %v2429_v28  ;;  %v9270_v39 = vld [vmem:[#allocation7 + $0x270] sm:$0xff]  ;;  %v9272_v28 = vld [vmem:[#allocation7 + $0x278] sm:$0xff]  ;;  %v9290_v11 = vsub.f32 %v9188_v32, %v2435_v43  ;;  %v11828_v18 = vand.u32 4294901760, %v9250_v35 }
 0x2d3   :  { %7541 = vmatprep.subr.bf16.mxu1 %v11799_v38  ;;  %11822 = vst [vmem:[#allocation80_spill] sm:$0xff] %v9275_v23  ;;  %v11830_v43 = vld [vmem:[#allocation84_spill] sm:$0xff]  ;;  %v11831_v32 = vand.u32 4294901760, %v8505_v6  ;;  %v11837_v6 = vand.u32 4294901760, %v9270_v39 }
 0x2d4   :  { %7259 = vmatpush3.bf16.msra.mxu0 %v11813_v3  ;;  %v11820_v3 = vand.u32 4294901760, %v9232_v40  ;;  %v11826_v13 = vand.u32 4294901760, %v9237_v55 }
 0x2d5   :  { %7261 = vmatprep.subr.bf16.mxu0 %v11814_v20  ;;  %v11819_v20 = vand.u32 4294901760, %v9230_v16 }
 0x2d6   :  { %7543 = vmatpush3.bf16.msra.mxu1 %v9225_v48  ;;  %v11818_v48 = vld [vmem:[#allocation60_spill] sm:$0xff] }
 0x2d7   :  { %7544 = vmatprep.subr.bf16.mxu1 %v11799_v38  ;;  %v9265_v47 = vpack.c.bf16 %v11820_v3, %v11819_v20  ;;  %v11825_v20 = vand.u32 4294901760, %v9235_v0 }
 0x2d8   :  { %7263 = vmatpush3.bf16.msra.mxu0 %v11817_v62  ;;  %v2521_v62 = vsub.f32 %v9237_v55, %v11826_v13  ;;  %v11835_v13 = vand.u32 4294901760, %v9255_v34 }
 0x2d9   :  { %7265 = vmatprep.subr.bf16.mxu0 %v11818_v48  ;;  %11821 = vst [vmem:[#allocation74_spill] sm:$0xff] %v9265_v47  ;;  %v2514_v3 = vsub.f32 %v9235_v0, %v11825_v20  ;;  %v11832_v48 = vand.u32 4294901760, %v8507_v7  ;;  %v11838_v7 = vand.u32 4294901760, %v9272_v28 }
 0x2da   :  { %7546 = vmatpush3.bf16.msra.mxu1 %v9241_v57  ;;  %v11824_v57 = vld [vmem:[#allocation78_spill] sm:$0xff]  ;;  %v2522_v20 = vand.u32 4294901760, %v2521_v62  ;;  %v2535_v2 = vsub.f32 %v9255_v34, %v11835_v13 }
 0x2db   :  { %7547 = vmatprep.subr.bf16.mxu1 %v11799_v38 }
 0x2dc   :  { %7267 = vmatpush3.bf16.msra.mxu0 %v11823_v25  ;;  %v11834_v25 = vand.u32 4294901760, %v9253_v37 }
 0x2dd   :  { %7269 = vmatprep.subr.bf16.mxu0 %v11824_v57  ;;  %v9297_v57 = vpack.c.bf16 %v11828_v18, %v11827_v60  ;;  %v11833_v60 = vld [vmem:[#allocation91_spill] sm:$0xff]  ;;  %v2515_v18 = vand.u32 4294901760, %v2514_v3  ;;  %v11839_v3 = vand.u32 4294901760, %v9275_v23 }
 0x2de   :  { %7549 = vmatpush3.bf16.msra.mxu1 %v9265_v47  ;;  %v7276_v47 = vpack.c.bf16 %v11832_v48, %v11831_v32  ;;  %v2528_v10 = vsub.f32 %v9253_v37, %v11834_v25  ;;  %v9328_v48 = vpack.c.bf16 %v11838_v7, %v11837_v6  ;;  %v9340_v32 = vsub.f32 %v9218_v53, %v2447_v51 }
 0x2df   :  { %11829 = vst [vmem:[#allocation79_spill] sm:$0xff] %v9297_v57  ;;  %7550 = vmatprep.subr.bf16.mxu1 %v11799_v38  ;;  %v2503_v13 = vsub.f32 %v9275_v23, %v11839_v3  ;;  %v11841_v6 = vand.u32 4294901760, %v8517_v15  ;;  %v11842_v7 = vand.u32 4294901760, %v8520_v17  ;;  %v7557_v25 = vpack.c.bf16 %v2522_v20, %v2515_v18  ;;  %v11850_v18 = vld [vmem:[#allocation39_spill] sm:$0xff] }
 0x2e0   :  { %7271 = vmatpush3.bf16.msra.mxu0 %v11830_v43  ;;  %v9321_v43 = vsub.f32 %v9205_v50, %v11836_v56  ;;  %v9337_v50 = vsub.f32 %v9216_v26, %v2444_v8  ;;  %v11840_v56 = vld [vmem:[#allocation97_spill] sm:$0xff]  ;;  %v2529_v23 = vand.u32 4294901760, %v2528_v10  ;;  %v2536_v26 = vand.u32 4294901760, %v2535_v2 }
 0x2e1   :  { %7273 = vmatprep.subr.bf16.mxu0 %v11833_v60  ;;  %v7278_v62 = vpack.c.bf16 %v11842_v7, %v11841_v6  ;;  %v11844_v60 = vand.u32 4294901760, %v8534_v36  ;;  %v11845_v8 = vand.u32 4294901760, %v9277_v27  ;;  %v11846_v15 = vand.u32 4294901760, %v9290_v11 }
 0x2e2   :  { %7552 = vmatpush3.bf16.msra.mxu1 %v9297_v57  ;;  %v11843_v57 = vand.u32 4294901760, %v8530_v31  ;;  %v2562_v51 = vand.u32 4294901760, %v9321_v43  ;;  %v11847_v31 = vand.u32 4294901760, %v11798_v1  ;;  %v2504_v36 = vand.u32 4294901760, %v2503_v13 }
 0x2e3   :  { %7553 = vmatprep.subr.bf16.mxu1 %v11799_v38  ;;  %v2542_v53 = vsub.f32 %v9277_v27, %v11845_v8  ;;  %v2549_v17 = vsub.f32 %v9290_v11, %v11846_v15  ;;  %v11849_v20 = vand.u32 4294901760, %v9232_v40  ;;  %v11851_v2 = vand.u32 4294901760, %v8543_v42 }
 0x2e4   :  { %7275 = vmatpush3.bf16.msra.mxu0 %v11840_v56  ;;  %v7280_v3 = vpack.c.bf16 %v11844_v60, %v11843_v57  ;;  %v11848_v57 = vand.u32 4294901760, %v9230_v16  ;;  %v11852_v1 = vand.u32 4294901760, %v8549_v52  ;;  %v7560_v6 = vpack.c.bf16 %v2536_v26, %v2529_v23 }
 0x2e5   :  { %7277 = vmatprep.subr.bf16.mxu0 %v7276_v47  ;;  %v2555_v47 = vand.u32 4294901760, %v9304_v29  ;;  %v9371_v60 = vsub.f32 %v9232_v40, %v11849_v20  ;;  %v11853_v7 = vand.u32 4294901760, %v11719_v24  ;;  %v2569_v15 = vand.u32 4294901760, %v9337_v50 }
 0x2e6   :  { %7555 = vmatpush3.bf16.msra.mxu1 %v9328_v48  ;;  %v9366_v10 = vsub.f32 %v9230_v16, %v11848_v57  ;;  %v7282_v13 = vpack.c.bf16 %v11852_v1, %v11851_v2  ;;  %v11854_v16 = vand.u32 4294901760, %v11720_v19  ;;  %v2576_v40 = vand.u32 4294901760, %v9340_v32 }
 0x2e7   :  { %1280 = vmatmul.mubr.f32.vlgmr.msra.gmra.mrb[8].mxu0 %v11847_v31  ;;  %7556 = vmatprep.subr.bf16.mxu1 %v11799_v38  ;;  %v2550_v31 = vand.u32 4294901760, %v2549_v17  ;;  %v2556_v42 = vsub.f32 %v9304_v29, %v2555_v47  ;;  %v2563_v52 = vsub.f32 %v9321_v43, %v2562_v51  ;;  %v11855_v24 = vand.u32 4294901760, %v9248_v14 }
 0x2e8   :  { %7279 = vmatpush3.bf16.msra.mxu0 %v7278_v62  ;;  %1446 = vmatprep.mubr.f32.mxu0 %v11850_v18  ;;  %v7284_v8 = vpack.c.bf16 %v11854_v16, %v11853_v7  ;;  %v2543_v62 = vand.u32 4294901760, %v2542_v53  ;;  %v11856_v23 = vand.u32 4294901760, %v11721_v54  ;;  %v11858_v26 = vand.u32 4294901760, %v11723_v4 }
 0x2e9   :  { %6743 = vmatmul.mubr.f32.vlgmr.msra.gmra.mrb[8].mxu1 %v2504_v36  ;;  %7281 = vmatprep.subr.bf16.mxu0 %v7280_v3  ;;  %v9396_v19 = vsub.f32 %v9248_v14, %v11855_v24  ;;  %v11859_v53 = vand.u32 4294901760, %v11724_v63  ;;  %v2570_v36 = vsub.f32 %v9337_v50, %v2569_v15  ;;  %v2577_v14 = vsub.f32 %v9340_v32, %v2576_v40 }
 0x2ea   :  { %7558 = vmatpush3.bf16.msra.mxu1 %v7557_v25  ;;  %6777 = vmatprep.mubr.msk.f32.mxu1 %vm8390_vm0, %v11805_v33  ;;  %v11857_v25 = vand.u32 4294901760, %v11722_v44  ;;  %v2583_v57 = vand.u32 4294901760, %v9366_v10  ;;  %v2590_v54 = vand.u32 4294901760, %v9371_v60  ;;  %v11860_v44 = vand.u32 4294901760, %v9250_v35 }
 0x2eb   :  { %7559 = vmatprep.subr.bf16.mxu1 %v11799_v38  ;;  %v7288_v17 = vpack.c.bf16 %v11859_v53, %v11858_v26  ;;  %v7563_v63 = vpack.c.bf16 %v2550_v31, %v2543_v62  ;;  %v2557_v20 = vand.u32 4294901760, %v2556_v42  ;;  %v2564_v2 = vand.u32 4294901760, %v2563_v52 }
 0x2ec   :  { %7283 = vmatpush3.bf16.msra.mxu0 %v7282_v13  ;;  %v7286_v3 = vpack.c.bf16 %v11857_v25, %v11856_v23  ;;  %v9417_v4 = vsub.f32 %v9250_v35, %v11860_v44  ;;  %v11861_v1 = vand.u32 4294901760, %v9270_v39  ;;  %v11862_v7 = vand.u32 4294901760, %v11725_v49 }
 0x2ed   :  { %7285 = vmatprep.subr.bf16.mxu0 %v7284_v8  ;;  %v11863_v16 = vand.u32 4294901760, %v11726_v12  ;;  %v11864_v35 = vand.u32 4294901760, %v8647_v46  ;;  %v2571_v31 = vand.u32 4294901760, %v2570_v36  ;;  %v2578_v42 = vand.u32 4294901760, %v2577_v14 }
 0x2ee   :  { %7561 = vmatpush3.bf16.msra.mxu1 %v7560_v6  ;;  %v9423_v13 = vsub.f32 %v9270_v39, %v11861_v1  ;;  %v11865_v6 = vand.u32 4294901760, %v8650_v58  ;;  %v2584_v52 = vsub.f32 %v9366_v10, %v2583_v57  ;;  %v2591_v39 = vsub.f32 %v9371_v60, %v2590_v54 }
 0x2ef   :  { %7562 = vmatprep.subr.bf16.mxu1 %v11799_v38  ;;  %v7290_v8 = vpack.c.bf16 %v11863_v16, %v11862_v7  ;;  %v11866_v49 = vand.u32 4294901760, %v9272_v28  ;;  %v7566_v46 = vpack.c.bf16 %v2564_v2, %v2557_v20  ;;  %v2597_v58 = vand.u32 4294901760, %v9396_v19 }
 0x2f0   :  { %7287 = vmatpush3.bf16.msra.mxu0 %v7286_v3  ;;  %v7292_v62 = vpack.c.bf16 %v11865_v6, %v11864_v35  ;;  %v2604_v24 = vand.u32 4294901760, %v9417_v4  ;;  %v11867_v23 = vand.u32 4294901760, %v11772_v9  ;;  %v11868_v25 = vand.u32 4294901760, %v11771_v21 }
 0x2f1   :  { %7289 = vmatprep.subr.bf16.mxu0 %v7288_v17  ;;  %v9442_v12 = vsub.f32 %v9272_v28, %v11866_v49  ;;  %v7569_v26 = vpack.c.bf16 %v2578_v42, %v2571_v31  ;;  %v11869_v53 = vand.u32 4294901760, %v11775_v30  ;;  %v11870_v28 = vand.u32 4294901760, %v11774_v61  ;;  %v11878_v31 = vld [vmem:[#allocation90_spill] sm:$0xff] }
 0x2f2   :  { %7564 = vmatpush3.bf16.msra.mxu1 %v7563_v63  ;;  %v7294_v3 = vpack.c.bf16 %v11868_v25, %v11867_v23  ;;  %v2585_v36 = vand.u32 4294901760, %v2584_v52  ;;  %v2592_v14 = vand.u32 4294901760, %v2591_v39  ;;  %v2598_v44 = vsub.f32 %v9396_v19, %v2597_v58  ;;  %v11880_v52 = vld [vmem:[#allocation92_spill] sm:$0xff] }
 0x2f3   :  { %7565 = vmatprep.subr.bf16.mxu1 %v11799_v38  ;;  %v7296_v17 = vpack.c.bf16 %v11870_v28, %v11869_v53  ;;  %v2605_v9 = vsub.f32 %v9417_v4, %v2604_v24  ;;  %v2611_v21 = vand.u32 4294901760, %v9423_v13  ;;  %v2618_v63 = vand.u32 4294901760, %v9442_v12  ;;  %v11884_v53 = vld [vmem:[#allocation98_spill] sm:$0xff] }
 0x2f4   :  { %7291 = vmatpush3.bf16.msra.mxu0 %v7290_v8  ;;  %v11871_v61 = vand.u32 4294901760, %v11782_v45  ;;  %v11872_v30 = vand.u32 4294901760, %v11781_v41  ;;  %v7572_v2 = vpack.c.bf16 %v2592_v14, %v2585_v36  ;;  %v11873_v1 = vand.u32 4294901760, %v11785_v5  ;;  %v11876_v5 = vld [vmem:[#allocation86_spill] sm:$0xff]  ;;  %v11886_v36 = vld [vmem:[#allocation16_spill] sm:$0xff] }
 0x2f5   :  { %7293 = vmatprep.subr.bf16.mxu0 %v7292_v62  ;;  %v11874_v7 = vand.u32 4294901760, %v11784_v22  ;;  %v2599_v8 = vand.u32 4294901760, %v2598_v44  ;;  %v2606_v35 = vand.u32 4294901760, %v2605_v9  ;;  %v2612_v6 = vsub.f32 %v9423_v13, %v2611_v21  ;;  %v11887_v44 = vld [vmem:[#allocation34_spill] sm:$0xff]  ;;  %v11888_v9 = vld [vmem:[#allocation20_spill] sm:$0xff] }
 0x2f6   :  { %7567 = vmatpush3.bf16.msra.mxu1 %v7566_v46  ;;  %v7298_v20 = vpack.c.bf16 %v11872_v30, %v11871_v61  ;;  %v2619_v45 = vsub.f32 %v9442_v12, %v2618_v63  ;;  %v11875_v41 = vand.u32 4294901760, %v11788_v59  ;;  %v11877_v62 = vand.u32 4294901760, %v11876_v5  ;;  %v11889_v61 = vld [vmem:[#allocation75_spill] sm:$0xff]  ;;  %v11890_v30 = vld [vmem:[#allocation24_spill] sm:$0xff] }
 0x2f7   :  { %7568 = vmatprep.subr.bf16.mxu1 %v11799_v38  ;;  %v7300_v16 = vpack.c.bf16 %v11874_v7, %v11873_v1  ;;  %v11879_v42 = vand.u32 4294901760, %v11878_v31  ;;  %v11881_v39 = vand.u32 4294901760, %v11880_v52  ;;  %v7575_v46 = vpack.c.bf16 %v2606_v35, %v2599_v8  ;;  %v11892_v1 = vld [vmem:[#allocation32_spill] sm:$0xff]  ;;  %v11893_v7 = vld [vmem:[#allocation38_spill] sm:$0xff]  ;;  %v11895_v35 = vld [vmem:[#allocation51_spill] sm:$0xff] }
 0x2f8   :  { %7295 = vmatpush3.bf16.msra.mxu0 %v7294_v3  ;;  %v7302_v22 = vpack.c.bf16 %v11877_v62, %v11875_v41  ;;  %v2613_v23 = vand.u32 4294901760, %v2612_v6  ;;  %v2620_v25 = vand.u32 4294901760, %v2619_v45  ;;  %v11882_v3 = vld [vmem:[#allocation96_spill] sm:$0xff]  ;;  %v11885_v59 = vand.u32 4294901760, %v11884_v53  ;;  %v11897_v41 = vld [vmem:[#allocation58_spill] sm:$0xff]  ;;  %v11899_v62 = vld [vmem:[#allocation17_spill] sm:$0xff] }
 0x2f9   :  { %7297 = vmatprep.subr.bf16.mxu0 %v7296_v17  ;;  %v7304_v49 = vpack.c.bf16 %v11881_v39, %v11879_v42  ;;  %v7581_v14 = vpack.c.bf16 %v9237_v55, %v9235_v0  ;;  %v7590_v8 = vpack.c.bf16 %v9321_v43, %v9304_v29  ;;  %v11896_v6 = vld [vmem:[#allocation56_spill] sm:$0xff]  ;;  %v7593_v45 = vpack.c.bf16 %v9340_v32, %v9337_v50  ;;  %v11901_v42 = vld [vmem:[#allocation19_spill] sm:$0xff]  ;;  %v11996_v29 = vld [vmem:[#allocation61_spill] sm:$0xff] }
 0x2fa   :  { %7570 = vmatpush3.bf16.msra.mxu1 %v7569_v26  ;;  %v11883_v26 = vand.u32 4294901760, %v11882_v3  ;;  %v7578_v17 = vpack.c.bf16 %v2620_v25, %v2613_v23  ;;  %v11898_v5 = vld [vmem:[#allocation60_spill] sm:$0xff]  ;;  %v11902_v52 = vand.u32 4294901760, %v11901_v42  ;;  %v11905_v3 = vld [vmem:[#allocation23_spill] sm:$0xff] }
 0x2fb   :  { %7571 = vmatprep.subr.bf16.mxu1 %v11799_v38  ;;  %v11997_v32 = vld [vmem:[#allocation63_spill] sm:$0xff] }
 0x2fc   :  { %7299 = vmatpush3.bf16.msra.mxu0 %v7298_v20  ;;  %v7306_v28 = vpack.c.bf16 %v11885_v59, %v11883_v26  ;;  %v7584_v20 = vpack.c.bf16 %v9255_v34, %v9253_v37  ;;  %v1792_v39 = vsub.f32 %v11901_v42, %v11902_v52  ;;  %v11906_v26 = vand.u32 4294901760, %v11905_v3  ;;  %v11907_v59 = vld [vmem:[#allocation62_spill] sm:$0xff]  ;;  %v11920_v52 = vld [vmem:[#allocation37_spill] sm:$0xff] }
 0x2fd   :  { %7301 = vmatprep.subr.bf16.mxu0 %v7300_v16  ;;  %v11894_v16 = vld [vmem:[#allocation44_spill] sm:$0xff] }
 0x2fe   :  { %7573 = vmatpush3.bf16.msra.mxu1 %v7572_v2  ;;  %v11891_v2 = vld [vmem:[#allocation28_spill] sm:$0xff]  ;;  %v1680_v53 = vsub.f32 %v11905_v3, %v11906_v26  ;;  %v7602_v26 = vpack.c.bf16 %v9442_v12, %v9423_v13 }
 0x2ff   :  { %7574 = vmatprep.subr.bf16.mxu1 %v11799_v38 }
 0x300   :  { %7303 = vmatpush3.bf16.msra.mxu0 %v7302_v22  ;;  %v11900_v22 = vand.u32 4294901760, %v11899_v62 }
 0x301   :  { %7305 = vmatprep.subr.bf16.mxu0 %v7304_v49  ;;  %v7596_v49 = vpack.c.bf16 %v9371_v60, %v9366_v10  ;;  %v7647_v10 = vpack.c.bf16 %v2604_v24, %v2597_v58  ;;  %v11999_v60 = vld [vmem:[#allocation87_spill] sm:$0xff] }
 0x302   :  { %7576 = vmatpush3.bf16.msra.mxu1 %v7575_v46  ;;  %v1785_v31 = vsub.f32 %v11899_v62, %v11900_v22  ;;  %v11903_v46 = vld [vmem:[#allocation22_spill] sm:$0xff]  ;;  %v11918_v22 = vld [vmem:[#allocation36_spill] sm:$0xff] }
 0x303   :  { %7577 = vmatprep.subr.bf16.mxu1 %v11799_v38  ;;  %v11904_v23 = vand.u32 4294901760, %v11903_v46 }
 0x304   :  { %7307 = vmatpush3.bf16.msra.mxu0 %v7306_v28  ;;  %v11908_v28 = vld [vmem:[#allocation78_spill] sm:$0xff] }
 0x305   :  { %7309 = vmatprep.subr.bf16.mxu0 %v11886_v36  ;;  %v1673_v25 = vsub.f32 %v11903_v46, %v11904_v23  ;;  %v1793_v36 = vand.u32 4294901760, %v1792_v39  ;;  %v11921_v39 = vand.u32 4294901760, %v11920_v52  ;;  %v11922_v46 = vld [vmem:[#allocation91_spill] sm:$0xff] }
 0x306   :  { %7579 = vmatpush3.bf16.msra.mxu1 %v7578_v17  ;;  %v1786_v17 = vand.u32 4294901760, %v1785_v31  ;;  %v11919_v31 = vand.u32 4294901760, %v11918_v22 }
 0x307   :  { %1448 = vmatmul.mubr.f32.vlgmr.msra.gmra.mrb[10].mxu0 %v11887_v44  ;;  %7580 = vmatprep.subr.bf16.mxu1 %v11799_v38 }
 0x308   :  { %7311 = vmatpush3.bf16.msra.mxu0 %v11888_v9  ;;  %1550 = vmatprep.mubr.f32.mxu0 %v11850_v18  ;;  %v7587_v18 = vpack.c.bf16 %v9290_v11, %v9277_v27  ;;  %v1813_v42 = vsub.f32 %v11918_v22, %v11919_v31  ;;  %v7372_v23 = vpack.c.bf16 %v1793_v36, %v1786_v17  ;;  %v11933_v31 = vld [vmem:[#allocation55_spill] sm:$0xff] }
 0x309   :  { %6778 = vmatmul.mubr.f32.vlgmr.msra.gmra.mrb[8].mxu1 %v11889_v61  ;;  %7313 = vmatprep.subr.bf16.mxu0 %v11890_v30 }
 0x30a   :  { %7582 = vmatpush3.bf16.msra.mxu1 %v7581_v14  ;;  %6812 = vmatprep.mubr.msk.f32.mxu1 %vm8390_vm0, %v11805_v33  ;;  %v11909_v14 = vld [vmem:[#allocation26_spill] sm:$0xff] }
 0x30b   :  { %7583 = vmatprep.subr.bf16.mxu1 %v11799_v38  ;;  %v11910_v9 = vand.u32 4294901760, %v11909_v14 }
 0x30c   :  { %7315 = vmatpush3.bf16.msra.mxu0 %v11891_v2 }
 0x30d   :  { %7317 = vmatprep.subr.bf16.mxu0 %v11892_v1  ;;  %v1799_v30 = vsub.f32 %v11909_v14, %v11910_v9  ;;  %v11925_v9 = vld [vmem:[#allocation43_spill] sm:$0xff] }
 0x30e   :  { %7585 = vmatpush3.bf16.msra.mxu1 %v7584_v20  ;;  %v11911_v20 = vld [vmem:[#allocation27_spill] sm:$0xff] }
 0x30f   :  { %7586 = vmatprep.subr.bf16.mxu1 %v11799_v38  ;;  %v11912_v2 = vand.u32 4294901760, %v11911_v20 }
 0x310   :  { %7319 = vmatpush3.bf16.msra.mxu0 %v11893_v7  ;;  %v1674_v7 = vand.u32 4294901760, %v1673_v25  ;;  %v1800_v25 = vand.u32 4294901760, %v1799_v30  ;;  %v1814_v30 = vand.u32 4294901760, %v1813_v42  ;;  %v11934_v42 = vand.u32 4294901760, %v11933_v31 }
 0x311   :  { %7321 = vmatprep.subr.bf16.mxu0 %v11894_v16  ;;  %v1806_v1 = vsub.f32 %v11911_v20, %v11912_v2  ;;  %v1681_v16 = vand.u32 4294901760, %v1680_v53  ;;  %v11926_v20 = vand.u32 4294901760, %v11925_v9 }
 0x312   :  { %7588 = vmatpush3.bf16.msra.mxu1 %v7587_v18  ;;  %v7599_v18 = vpack.c.bf16 %v9417_v4, %v9396_v19  ;;  %v12002_v19 = vld [vmem:[#allocation50_spill] sm:$0xff] }
 0x313   :  { %7589 = vmatprep.subr.bf16.mxu1 %v11799_v38  ;;  %v1807_v3 = vand.u32 4294901760, %v1806_v1  ;;  %v7374_v53 = vpack.c.bf16 %v1681_v16, %v1674_v7  ;;  %v1708_v2 = vsub.f32 %v11925_v9, %v11926_v20  ;;  %v11929_v16 = vld [vmem:[#allocation49_spill] sm:$0xff]  ;;  %v11941_v20 = vld [vmem:[#allocation15_spill] sm:$0xff]  ;;  %v12003_v4 = vand.u32 4294901760, %v12002_v19 }
 0x314   :  { %7323 = vmatpush3.bf16.msra.mxu0 %v11895_v35  ;;  %v11914_v35 = vld [vmem:[#allocation29_spill] sm:$0xff] }
 0x315   :  { %7325 = vmatprep.subr.bf16.mxu0 %v11896_v6  ;;  %v11915_v6 = vand.u32 4294901760, %v11914_v35 }
 0x316   :  { %7591 = vmatpush3.bf16.msra.mxu1 %v7590_v8  ;;  %v11913_v8 = vld [vmem:[#allocation84_spill] sm:$0xff] }
 0x317   :  { %7592 = vmatprep.subr.bf16.mxu1 %v11799_v38 }
 0x318   :  { %7327 = vmatpush3.bf16.msra.mxu0 %v11897_v41  ;;  %v11916_v41 = vld [vmem:[#allocation31_spill] sm:$0xff] }
 0x319   :  { %7329 = vmatprep.subr.bf16.mxu0 %v11898_v5  ;;  %v11917_v5 = vand.u32 4294901760, %v11916_v41 }
 0x31a   :  { %7594 = vmatpush3.bf16.msra.mxu1 %v7593_v45  ;;  %v1687_v45 = vsub.f32 %v11914_v35, %v11915_v6  ;;  %v11930_v6 = vand.u32 4294901760, %v11929_v16 }
 0x31b   :  { %7595 = vmatprep.subr.bf16.mxu1 %v11799_v38  ;;  %v1694_v62 = vsub.f32 %v11916_v41, %v11917_v5  ;;  %v11931_v5 = vld [vmem:[#allocation54_spill] sm:$0xff] }
 0x31c   :  { %7331 = vmatpush3.bf16.msra.mxu0 %v11907_v59  ;;  %v11923_v59 = vld [vmem:[#allocation42_spill] sm:$0xff]  ;;  %v1688_v17 = vand.u32 4294901760, %v1687_v45  ;;  %v1834_v41 = vsub.f32 %v11929_v16, %v11930_v6  ;;  %v1709_v45 = vand.u32 4294901760, %v1708_v2 }
 0x31d   :  { %7333 = vmatprep.subr.bf16.mxu0 %v11908_v28  ;;  %v11924_v28 = vand.u32 4294901760, %v11923_v59  ;;  %v1695_v36 = vand.u32 4294901760, %v1694_v62  ;;  %v11932_v62 = vand.u32 4294901760, %v11931_v5 }
 0x31e   :  { %7597 = vmatpush3.bf16.msra.mxu1 %v7596_v49  ;;  %v1820_v49 = vsub.f32 %v11920_v52, %v11921_v39  ;;  %v1722_v52 = vsub.f32 %v11933_v31, %v11934_v42  ;;  %v11935_v39 = vld [vmem:[#allocation46_spill] sm:$0xff]  ;;  %v11950_v31 = vld [vmem:[#allocation67_spill] sm:$0xff] }
 0x31f   :  { %7598 = vmatprep.subr.bf16.mxu1 %v11799_v38  ;;  %v1701_v14 = vsub.f32 %v11923_v59, %v11924_v28  ;;  %v1715_v22 = vsub.f32 %v11931_v5, %v11932_v62  ;;  %v11939_v28 = vld [vmem:[#allocation65_spill] sm:$0xff] }
 0x320   :  { %7335 = vmatpush3.bf16.msra.mxu0 %v11913_v8  ;;  %v1821_v1 = vand.u32 4294901760, %v1820_v49  ;;  %v11927_v8 = vld [vmem:[#allocation48_spill] sm:$0xff]  ;;  %v7378_v49 = vpack.c.bf16 %v1695_v36, %v1688_v17  ;;  %v1723_v17 = vand.u32 4294901760, %v1722_v52 }
 0x321   :  { %7337 = vmatprep.subr.bf16.mxu0 %v11922_v46  ;;  %v11928_v35 = vand.u32 4294901760, %v11927_v8  ;;  %v1716_v2 = vand.u32 4294901760, %v1715_v22  ;;  %v11942_v36 = vld [vmem:[#allocation68_spill] sm:$0xff] }
 0x322   :  { %7600 = vmatpush3.bf16.msra.mxu1 %v7599_v18  ;;  %v7376_v18 = vpack.c.bf16 %v1807_v3, %v1800_v25  ;;  %v7380_v46 = vpack.c.bf16 %v1821_v1, %v1814_v30  ;;  %v1835_v25 = vand.u32 4294901760, %v1834_v41  ;;  %v11937_v3 = vld [vmem:[#allocation64_spill] sm:$0xff]  ;;  %v11943_v30 = vand.u32 4294901760, %v11942_v36  ;;  %v11948_v41 = vld [vmem:[#allocation73_spill] sm:$0xff] }
 0x323   :  { %7601 = vmatprep.subr.bf16.mxu1 %v11799_v38  ;;  %v1827_v7 = vsub.f32 %v11927_v8, %v11928_v35  ;;  %v11949_v5 = vand.u32 4294901760, %v11948_v41  ;;  %v7386_v42 = vpack.c.bf16 %v1723_v17, %v1716_v2  ;;  %v11951_v52 = vld [vmem:[#allocation76_spill] sm:$0xff]  ;;  %v11957_v2 = vld [vmem:[#allocation83_spill] sm:$0xff] }
 0x324   :  { %7339 = vmatpush3.bf16.msra.mxu0 %v11840_v56  ;;  %v1702_v56 = vand.u32 4294901760, %v1701_v14  ;;  %v11940_v14 = vand.u32 4294901760, %v11939_v28  ;;  %v1729_v1 = vsub.f32 %v11942_v36, %v11943_v30  ;;  %v11958_v17 = vand.u32 4294901760, %v11957_v2 }
 0x325   :  { %7373 = vmatprep.subr.bf16.mxu0 %v7372_v23  ;;  %v11936_v23 = vld [vmem:[#allocation80_spill] sm:$0xff]  ;;  %v1862_v62 = vsub.f32 %v11948_v41, %v11949_v5 }
 0x326   :  { %7603 = vmatpush3.bf16.msra.mxu1 %v7602_v26  ;;  %v11938_v26 = vand.u32 4294901760, %v11937_v3  ;;  %v1848_v9 = vsub.f32 %v11939_v28, %v11940_v14  ;;  %v1730_v36 = vand.u32 4294901760, %v1729_v1 }
 0x327   :  { %1552 = vmatmul.mubr.f32.vlgmr.msra.gmra.mrb[12].mxu0 %v11887_v44  ;;  %7604 = vmatprep.subr.bf16.mxu1 %v11799_v38  ;;  %v1828_v44 = vand.u32 4294901760, %v1827_v7  ;;  %v11946_v7 = vld [vmem:[#allocation72_spill] sm:$0xff] }
 0x328   :  { %7375 = vmatpush3.bf16.msra.mxu0 %v7374_v53  ;;  %1894 = vmatprep.mubr.f32.mxu0 %v11935_v39  ;;  %v1841_v59 = vsub.f32 %v11937_v3, %v11938_v26  ;;  %v7382_v53 = vpack.c.bf16 %v1709_v45, %v1702_v56  ;;  %v11947_v16 = vand.u32 4294901760, %v11946_v7  ;;  %v1849_v22 = vand.u32 4294901760, %v1848_v9  ;;  %v11953_v26 = vld [vmem:[#allocation77_spill] sm:$0xff] }
 0x329   :  { %6813 = vmatmul.mubr.f32.vlgmr.msra.gmra.mrb[8].mxu1 %v11936_v23  ;;  %7377 = vmatprep.subr.bf16.mxu0 %v7376_v18  ;;  %v11944_v18 = vld [vmem:[#allocation69_spill] sm:$0xff]  ;;  %v7384_v56 = vpack.c.bf16 %v1835_v25, %v1828_v44  ;;  %v11954_v28 = vand.u32 4294901760, %v11953_v26  ;;  %v1863_v44 = vand.u32 4294901760, %v1862_v62 }
 0x32a   :  { %7606 = vmatpush3.bf16.msra.mxu1 %v11941_v20  ;;  %6847 = vmatprep.mubr.msk.f32.mxu1 %vm8390_vm0, %v11805_v33  ;;  %v11945_v8 = vand.u32 4294901760, %v11944_v18  ;;  %v1855_v6 = vsub.f32 %v11946_v7, %v11947_v16  ;;  %v1842_v45 = vand.u32 4294901760, %v1841_v59  ;;  %v11955_v59 = vld [vmem:[#allocation82_spill] sm:$0xff]  ;;  %v11962_v62 = vld [vmem:[#allocation89_spill] sm:$0xff] }
 0x32b   :  { %7607 = vmatprep.subr.bf16.mxu1 %v11799_v38  ;;  %v1750_v14 = vsub.f32 %v11953_v26, %v11954_v28  ;;  %v11956_v9 = vand.u32 4294901760, %v11955_v59  ;;  %v11959_v7 = vld [vmem:[#allocation66_spill] sm:$0xff] }
 0x32c   :  { %7379 = vmatpush3.bf16.msra.mxu0 %v7378_v49  ;;  %v1736_v35 = vsub.f32 %v11944_v18, %v11945_v8  ;;  %v11952_v49 = vand.u32 4294901760, %v11951_v52  ;;  %v7388_v25 = vpack.c.bf16 %v1849_v22, %v1842_v45  ;;  %v1876_v8 = vsub.f32 %v11957_v2, %v11958_v17 }
 0x32d   :  { %7381 = vmatprep.subr.bf16.mxu0 %v7380_v46  ;;  %v1856_v46 = vand.u32 4294901760, %v1855_v6  ;;  %v1869_v18 = vsub.f32 %v11955_v59, %v11956_v9  ;;  %v11960_v6 = vld [vmem:[#allocation88_spill] sm:$0xff]  ;;  %v11969_v59 = vld [vmem:[#allocation99_spill] sm:$0xff] }
 0x32e   :  { %7609 = vmatpush3.bf16.msra.mxu1 %v11950_v31  ;;  %v1743_v3 = vsub.f32 %v11951_v52, %v11952_v49  ;;  %v1737_v30 = vand.u32 4294901760, %v1736_v35  ;;  %v11961_v41 = vand.u32 4294901760, %v11960_v6  ;;  %v1877_v52 = vand.u32 4294901760, %v1876_v8  ;;  %v11964_v49 = vld [vmem:[#allocation94_spill] sm:$0xff] }
 0x32f   :  { %7610 = vmatprep.subr.bf16.mxu1 %v11799_v38  ;;  %v7392_v35 = vpack.c.bf16 %v1863_v44, %v1856_v46  ;;  %v1870_v22 = vand.u32 4294901760, %v1869_v18  ;;  %v11965_v26 = vand.u32 4294901760, %v11964_v49  ;;  %v11971_v18 = vld [vmem:[#allocation101_spill] sm:$0xff] }
 0x330   :  { %7383 = vmatpush3.bf16.msra.mxu0 %v7382_v53  ;;  %v1744_v16 = vand.u32 4294901760, %v1743_v3  ;;  %v1751_v53 = vand.u32 4294901760, %v1750_v14  ;;  %v7390_v1 = vpack.c.bf16 %v1737_v30, %v1730_v36  ;;  %v1757_v5 = vsub.f32 %v11960_v6, %v11961_v41  ;;  %v11966_v3 = vld [vmem:[#allocation95_spill] sm:$0xff] }
 0x331   :  { %7385 = vmatprep.subr.bf16.mxu0 %v7384_v56  ;;  %v11963_v56 = vand.u32 4294901760, %v11962_v62  ;;  %v1883_v28 = vsub.f32 %v11964_v49, %v11965_v26  ;;  %v11967_v14 = vand.u32 4294901760, %v11966_v3  ;;  %v11968_v36 = vld [vmem:[#allocation71_spill] sm:$0xff]  ;;  %v11972_v2 = vand.u32 4294901760, %v11971_v18 }
 0x332   :  { %7612 = vmatpush3.bf16.msra.mxu1 %v11959_v7  ;;  %v7394_v30 = vpack.c.bf16 %v1751_v53, %v1744_v16  ;;  %v1758_v46 = vand.u32 4294901760, %v1757_v5  ;;  %v7396_v8 = vpack.c.bf16 %v1877_v52, %v1870_v22  ;;  %v11976_v22 = vld [vmem:[#allocation18_spill] sm:$0xff]  ;;  %v11977_v52 = vand.u32 4294901760, %v9235_v0 }
 0x333   :  { %7613 = vmatprep.subr.bf16.mxu1 %v11799_v38  ;;  %v1764_v45 = vsub.f32 %v11962_v62, %v11963_v56  ;;  %v1778_v17 = vsub.f32 %v11971_v18, %v11972_v2  ;;  %v1884_v6 = vand.u32 4294901760, %v1883_v28  ;;  %v11973_v62 = vld [vmem:[#allocation70_spill] sm:$0xff]  ;;  %v11978_v49 = vand.u32 4294901760, %v9237_v55  ;;  %v11979_v28 = vld [vmem:[#allocation40_spill] sm:$0xff] }
 0x334   :  { %7387 = vmatpush3.bf16.msra.mxu0 %v7386_v42  ;;  %v1890_v42 = vsub.f32 %v11966_v3, %v11967_v14  ;;  %v11974_v56 = vld [vmem:[#allocation74_spill] sm:$0xff]  ;;  %v11980_v3 = vld [vmem:[#allocation21_spill] sm:$0xff]  ;;  %v11981_v14 = vld [vmem:[#allocation52_spill] sm:$0xff]  ;;  %v11985_v0 = vand.u32 4294901760, %v9253_v37  ;;  %v11986_v55 = vand.u32 4294901760, %v9255_v34  ;;  %v7638_v2 = vpack.c.bf16 %v2562_v51, %v2555_v47 }
 0x335   :  { %7389 = vmatprep.subr.bf16.mxu0 %v7388_v25  ;;  %v1765_v44 = vand.u32 4294901760, %v1764_v45  ;;  %v11970_v25 = vand.u32 4294901760, %v11969_v59  ;;  %v7629_v26 = vpack.c.bf16 %v11978_v49, %v11977_v52  ;;  %v11991_v37 = vld [vmem:[#allocation41_spill] sm:$0xff]  ;;  %v11992_v34 = vld [vmem:[#allocation47_spill] sm:$0xff]  ;;  %v7644_v47 = vpack.c.bf16 %v2590_v54, %v2583_v57 }
 0x336   :  { %7615 = vmatpush3.bf16.msra.mxu1 %v11968_v36  ;;  %v1891_v41 = vand.u32 4294901760, %v1890_v42  ;;  %v11982_v42 = vand.u32 4294901760, %v11981_v14  ;;  %v12000_v57 = vld [vmem:[#allocation93_spill] sm:$0xff]  ;;  %v7650_v54 = vpack.c.bf16 %v2618_v63, %v2611_v21 }
 0x337   :  { %7616 = vmatprep.subr.bf16.mxu1 %v11799_v38  ;;  %v1771_v9 = vsub.f32 %v11969_v59, %v11970_v25  ;;  %v7398_v16 = vpack.c.bf16 %v1765_v44, %v1758_v46  ;;  %v11984_v46 = vld [vmem:[#allocation25_spill] sm:$0xff]  ;;  %v7632_v44 = vpack.c.bf16 %v11986_v55, %v11985_v0  ;;  %v11987_v59 = vld [vmem:[#allocation30_spill] sm:$0xff]  ;;  %v11988_v25 = vld [vmem:[#allocation35_spill] sm:$0xff] }
 0x338   :  { %7391 = vmatpush3.bf16.msra.mxu0 %v7390_v1  ;;  %v1779_v1 = vand.u32 4294901760, %v1778_v17  ;;  %v7400_v5 = vpack.c.bf16 %v1891_v41, %v1884_v6  ;;  %v11993_v17 = vld [vmem:[#allocation53_spill] sm:$0xff] }
 0x339   :  { %7393 = vmatprep.subr.bf16.mxu0 %v7392_v35  ;;  %v1772_v53 = vand.u32 4294901760, %v1771_v9  ;;  %v11975_v35 = vld [vmem:[#allocation79_spill] sm:$0xff]  ;;  %v11990_v9 = vand.u32 4294901760, %v9290_v11  ;;  %v7641_v11 = vpack.c.bf16 %v2576_v40, %v2569_v15  ;;  %v11998_v40 = vld [vmem:[#allocation81_spill] sm:$0xff] }
 0x33a   :  { %7618 = vmatpush3.bf16.msra.mxu1 %v11973_v62 }
 0x33b   :  { %7619 = vmatprep.subr.bf16.mxu1 %v11799_v38  ;;  %v7402_v45 = vpack.c.bf16 %v1779_v1, %v1772_v53 }
 0x33c   :  { %7395 = vmatpush3.bf16.msra.mxu0 %v7394_v30  ;;  %v11983_v30 = vand.u32 4294901760, %v11936_v23  ;;  %v11989_v23 = vand.u32 4294901760, %v9277_v27  ;;  %v11994_v27 = vld [vmem:[#allocation57_spill] sm:$0xff] }
 0x33d   :  { %7397 = vmatprep.subr.bf16.mxu0 %v7396_v8  ;;  %v11995_v8 = vld [vmem:[#allocation59_spill] sm:$0xff] }
 0x33e   :  { %7621 = vmatpush3.bf16.msra.mxu1 %v11974_v56  ;;  %v7635_v18 = vpack.c.bf16 %v11990_v9, %v11989_v23 }
 0x33f   :  { %7622 = vmatprep.subr.bf16.mxu1 %v11799_v38 }
 0x340   :  { %7399 = vmatpush3.bf16.msra.mxu0 %v7398_v16  ;;  %v12001_v16 = vld [vmem:[#allocation100_spill] sm:$0xff] }
 0x341   :  { %7401 = vmatprep.subr.bf16.mxu0 %v7400_v5 }
 0x342   :  { %7624 = vmatpush3.bf16.msra.mxu1 %v11975_v35 }
 0x343   :  { %7625 = vmatprep.subr.bf16.mxu1 %v11799_v38 }
 0x344   :  { %7403 = vmatpush3.bf16.msra.mxu0 %v7402_v45 }
 0x345   :  { %7437 = vmatprep.subr.bf16.mxu0 %v11976_v22 }
 0x346   :  { %7627 = vmatpush3.bf16.msra.mxu1 %v9328_v48 }
 0x347   :  { %1896 = vmatmul.mubr.f32.vlgmr.msra.gmra.mrb[14].mxu0 %v11979_v28  ;;  %7628 = vmatprep.subr.bf16.mxu1 %v11799_v38 }
 0x348   :  { %7439 = vmatpush3.bf16.msra.mxu0 %v11980_v3  ;;  %2138 = vmatprep.mubr.f32.mxu0 %v11982_v42 }
 0x349   :  { %6848 = vmatmul.mubr.f32.vlgmr.msra.gmra.mrb[8].mxu1 %v11983_v30  ;;  %7441 = vmatprep.subr.bf16.mxu0 %v11984_v46 }
 0x34a   :  { %7630 = vmatpush3.bf16.msra.mxu1 %v7629_v26  ;;  %6882 = vmatprep.mubr.msk.f32.mxu1 %vm8390_vm0, %v11805_v33 }
 0x34b   :  { %7631 = vmatprep.subr.bf16.mxu1 %v11799_v38 }
 0x34c   :  { %7443 = vmatpush3.bf16.msra.mxu0 %v11987_v59 }
 0x34d   :  { %7445 = vmatprep.subr.bf16.mxu0 %v11988_v25 }
 0x34e   :  { %7633 = vmatpush3.bf16.msra.mxu1 %v7632_v44 }
 0x34f   :  { %7634 = vmatprep.subr.bf16.mxu1 %v11799_v38 }
 0x350   :  { %7447 = vmatpush3.bf16.msra.mxu0 %v11991_v37 }
 0x351   :  { %7449 = vmatprep.subr.bf16.mxu0 %v11992_v34 }
 0x352   :  { %7636 = vmatpush3.bf16.msra.mxu1 %v7635_v18 }
 0x353   :  { %7637 = vmatprep.subr.bf16.mxu1 %v11799_v38 }
 0x354   :  { %7451 = vmatpush3.bf16.msra.mxu0 %v11993_v17 }
 0x355   :  { %7453 = vmatprep.subr.bf16.mxu0 %v11994_v27 }
 0x356   :  { %7639 = vmatpush3.bf16.msra.mxu1 %v7638_v2 }
 0x357   :  { %7640 = vmatprep.subr.bf16.mxu1 %v11799_v38 }
 0x358   :  { %7455 = vmatpush3.bf16.msra.mxu0 %v11995_v8 }
 0x359   :  { %7457 = vmatprep.subr.bf16.mxu0 %v11996_v29  ;;  %v5656_v43 = vpop.f32.mrb[2].mxu0 }
 0x35a   :  { %7642 = vmatpush3.bf16.msra.mxu1 %v7641_v11  ;;  %v5657_v51 = vpop.f32.mrb[3].mxu0 }
 0x35b   :  { %7643 = vmatprep.subr.bf16.mxu1 %v11799_v38  ;;  %v5866_v50 = vpop.f32.mrb[2].mxu1  ;;  %v5658_v6 = vadd.f32 %v5657_v51, %v5656_v43 }
 0x35c   :  { %7459 = vmatpush3.bf16.msra.mxu0 %v11997_v32  ;;  %v5867_v15 = vpop.f32.mrb[3].mxu1 }
 0x35d   :  { %7461 = vmatprep.subr.bf16.mxu0 %v11998_v40  ;;  %v9705_v41 = vadd.f32 %v5867_v15, %v5866_v50 }
 0x35e   :  { %7645 = vmatpush3.bf16.msra.mxu1 %v7644_v47 }
 0x35f   :  { %7646 = vmatprep.subr.bf16.mxu1 %v11799_v38 }
 0x360   :  { %7463 = vmatpush3.bf16.msra.mxu0 %v11999_v60 }
 0x361   :  { %7465 = vmatprep.subr.bf16.mxu0 %v12000_v57 }
 0x362   :  { %7648 = vmatpush3.bf16.msra.mxu1 %v7647_v10 }
 0x363   :  { %7649 = vmatprep.subr.bf16.mxu1 %v11799_v38 }
 0x364   :  { %7467 = vmatpush3.bf16.msra.mxu0 %v12001_v16 }
 0x365   :  { %7501 = vmatprep.subr.bf16.mxu0 %v11976_v22 }
 0x366   :  { %7651 = vmatpush3.bf16.msra.mxu1 %v7650_v54 }
 0x367   :  { %2142 = vmatmul.mubr.f32.vlgmr.msra.gmra.mrb[16].mxu0 %v12003_v4  ;;  %7652 = vmatprep.subr.bf16.mxu1 %v11799_v38 }
 0x368   :  { %7503 = vmatpush3.bf16.msra.mxu0 %v11980_v3  ;;  %2412 = vmatprep.mubr.f32.mxu0 %v11935_v39 }
 0x369   :  { %6883 = vmatmul.mubr.f32.vlgmr.msra.gmra.mrb[8].mxu1 %v11889_v61  ;;  %7505 = vmatprep.subr.bf16.mxu0 %v11984_v46 }
 0x36a   :  { %7654 = vmatpush3.bf16.msra.mxu1 %v11941_v20  ;;  %6917 = vmatprep.mubr.msk.f32.mxu1 %vm8390_vm0, %v11805_v33 }
 0x36b   :  { %7655 = vmatprep.subr.bf16.mxu1 %v11799_v38 }
 0x36c   :  { %7507 = vmatpush3.bf16.msra.mxu0 %v11987_v59 }
 0x36d   :  { %7509 = vmatprep.subr.bf16.mxu0 %v11988_v25 }
 0x36e   :  { %7657 = vmatpush3.bf16.msra.mxu1 %v11950_v31 }
 0x36f   :  { %7658 = vmatprep.subr.bf16.mxu1 %v11799_v38 }
 0x370   :  { %7511 = vmatpush3.bf16.msra.mxu0 %v11991_v37 }
 0x371   :  { %7513 = vmatprep.subr.bf16.mxu0 %v11992_v34 }
 0x372   :  { %7660 = vmatpush3.bf16.msra.mxu1 %v11959_v7 }
 0x373   :  { %7661 = vmatprep.subr.bf16.mxu1 %v11799_v38 }
 0x374   :  { %7515 = vmatpush3.bf16.msra.mxu0 %v11993_v17 }
 0x375   :  { %7517 = vmatprep.subr.bf16.mxu0 %v11994_v27 }
 0x376   :  { %7663 = vmatpush3.bf16.msra.mxu1 %v11968_v36 }
 0x377   :  { %7664 = vmatprep.subr.bf16.mxu1 %v11799_v38 }
 0x378   :  { %7519 = vmatpush3.bf16.msra.mxu0 %v11995_v8 }
 0x379   :  { %7521 = vmatprep.subr.bf16.mxu0 %v11996_v29  ;;  %v5691_v13 = vpop.f32.mrb[4].mxu0 }
 0x37a   :  { %7666 = vmatpush3.bf16.msra.mxu1 %v11973_v62  ;;  %v5692_v12 = vpop.f32.mrb[5].mxu0 }
 0x37b   :  { %7667 = vmatprep.subr.bf16.mxu1 %v11799_v38  ;;  %v5936_v58 = vpop.f32.mrb[4].mxu1  ;;  %v5693_v24 = vadd.f32 %v5692_v12, %v5691_v13 }
 0x37c   :  { %7523 = vmatpush3.bf16.msra.mxu0 %v11997_v32  ;;  %v5937_v21 = vpop.f32.mrb[5].mxu1 }
 0x37d   :  { %7525 = vmatprep.subr.bf16.mxu0 %v11998_v40  ;;  %v1036_v63 = vadd.f32 %v5693_v24, %v5658_v6  ;;  %v5938_v39 = vadd.f32 %v5937_v21, %v5936_v58  ;;  %v3151_v21 = vld [vmem:[#allocation8 + $0x80] sm:$0xff] }
 0x37e   :  { %7669 = vmatpush3.bf16.msra.mxu1 %v11974_v56 }
 0x37f   :  { %7670 = vmatprep.subr.bf16.mxu1 %v11799_v38 }
 0x380   :  { %7527 = vmatpush3.bf16.msra.mxu0 %v11999_v60 }
 0x381   :  { %7529 = vmatprep.subr.bf16.mxu0 %v12000_v57 }
 0x382   :  { %7672 = vmatpush3.bf16.msra.mxu1 %v11975_v35 }
 0x383   :  { %7673 = vmatprep.subr.bf16.mxu1 %v11799_v38  ;;  %v3177_v38 = vld [vmem:[#allocation8 + $0x150] sm:$0xff] }
 0x384   :  { %7531 = vmatpush3.bf16.msra.mxu0 %v12001_v16 }
 0x386   :  { %7675 = vmatpush3.bf16.msra.mxu1 %v9328_v48 }
 0x387   :  { %2414 = vmatmul.mubr.f32.vlgmr.msra.gmra.mrb[18].mxu0 %v11979_v28 }
 0x389   :  { %6918 = vmatmul.mubr.f32.vlgmr.msra.gmra.mrb[8].mxu1 %v11889_v61 }
 0x39a   :  { %v5726_v20 = vpop.f32.mrb[6].mxu0 }
 0x39b   :  { %v5727_v31 = vpop.f32.mrb[7].mxu0 }
 0x39c   :  { %v6006_v7 = vpop.f32.mrb[6].mxu1  ;;  %v5728_v36 = vadd.f32 %v5727_v31, %v5726_v20  ;;  %v3271_v20 = vand.u32 4294901760, %v3151_v21 }
 0x39d   :  { %v6007_v62 = vpop.f32.mrb[7].mxu1 }
 0x39e   :  { %v1174_v53 = vadd.f32 %v5728_v36, %v1036_v63  ;;  %v6008_v1 = vadd.f32 %v6007_v62, %v6006_v7  ;;  %v3152_v63 = vld [vmem:[#allocation8 + $0x88] sm:$0xff]  ;;  %v3135_v62 = vld [vmem:[#allocation8] sm:$0xff] }
 0x39f   :  { %v3274_v31 = vand.u32 4294901760, %v3152_v63  ;;  %v3184_v7 = vld [vmem:[#allocation8 + $0x188] sm:$0xff] }
 0x3ba   :  { %v5761_v5 = vpop.f32.mrb[8].mxu0 }
 0x3bb   :  { %v5762_v56 = vpop.f32.mrb[9].mxu0 }
 0x3bc   :  { %v5763_v45 = vadd.f32 %v5762_v56, %v5761_v5  ;;  %v3223_v5 = vand.u32 4294901760, %v3135_v62 }
 0x3be   :  { %v1282_v35 = vadd.f32 %v5763_v45, %v1174_v53  ;;  %v3136_v53 = vld [vmem:[#allocation8 + $0x8] sm:$0xff]  ;;  %v3167_v45 = vld [vmem:[#allocation8 + $0x100] sm:$0xff] }
 0x3bf   :  { %v3226_v56 = vand.u32 4294901760, %v3136_v53 }
 0x3da   :  { %v5796_v22 = vpop.f32.mrb[10].mxu0 }
 0x3db   :  { %v5797_v52 = vpop.f32.mrb[11].mxu0 }
 0x3dc   :  { %v5798_v49 = vadd.f32 %v5797_v52, %v5796_v22  ;;  %v3153_v22 = vld [vmem:[#allocation8 + $0x90] sm:$0xff]  ;;  %v9766_v52 = vpack.c.bf16 %v3274_v31, %v3271_v20 }
 0x3de   :  { %v1450_v26 = vadd.f32 %v5798_v49, %v1282_v35  ;;  %v3168_v35 = vld [vmem:[#allocation8 + $0x108] sm:$0xff]  ;;  %12005 = vst [vmem:[#allocation45_spill] sm:$0xff] %v9766_v52  ;;  %v9768_v49 = vsub.f32 %v3151_v21, %v3271_v20  ;;  %7677 = vmatprep.subr.bf16.mxu0 %v9766_v52  ;;  %v3171_v20 = vld [vmem:[#allocation8 + $0x120] sm:$0xff] }
 0x3fa   :  { %v5831_v48 = vpop.f32.mrb[12].mxu0 }
 0x3fb   :  { %v5832_v3 = vpop.f32.mrb[13].mxu0 }
 0x3fc   :  { %v5833_v28 = vadd.f32 %v5832_v3, %v5831_v48  ;;  %v3154_v3 = vld [vmem:[#allocation8 + $0x98] sm:$0xff] }
 0x3fe   :  { %v1554_v14 = vadd.f32 %v5833_v28, %v1450_v26  ;;  %v9770_v26 = vsub.f32 %v3152_v63, %v3274_v31  ;;  %v3185_v28 = vld [vmem:[#allocation8 + $0x190] sm:$0xff]  ;;  %v3172_v31 = vld [vmem:[#allocation8 + $0x128] sm:$0xff] }
 0x400   :  { %v1666_v61 = vadd.f32 %v9705_v41, %v1554_v14  ;;  %v3186_v14 = vld [vmem:[#allocation8 + $0x198] sm:$0xff] }
 0x41a   :  { %v5901_v42 = vpop.f32.mrb[14].mxu0 }
 0x41b   :  { %v5902_v30 = vpop.f32.mrb[15].mxu0 }
 0x41c   :  { %v5903_v46 = vadd.f32 %v5902_v30, %v5901_v42  ;;  %v9778_v30 = vpack.c.bf16 %v3226_v56, %v3223_v5 }
 0x41e   :  { %v1898_v0 = vadd.f32 %v5903_v46, %v1666_v61  ;;  %12009 = vst [vmem:[#allocation86_spill] sm:$0xff] %v9778_v30  ;;  %v9780_v46 = vsub.f32 %v3135_v62, %v3223_v5  ;;  %7679 = vmatpush3.bf16.msra.mxu0 %v9778_v30  ;;  %v3158_v5 = vld [vmem:[#allocation8 + $0xb8] sm:$0xff] }
 0x420   :  { %v2036_v55 = vadd.f32 %v5938_v39, %v1898_v0  ;;  %v3183_v39 = vld [vmem:[#allocation8 + $0x180] sm:$0xff]  ;;  %v3137_v0 = vld [vmem:[#allocation8 + $0x10] sm:$0xff] }
 0x421   :  { %v4133_v36 = vand.u32 4294901760, %v3183_v39 }
 0x423   :  { %v9772_v48 = vsub.f32 %v3183_v39, %v4133_v36 }
 0x425   :  { %12006 = vst [vmem:[#allocation33_spill] sm:$0xff] %v9772_v48 }
 0x43a   :  { %v5971_v44 = vpop.f32.mrb[16].mxu0 }
 0x43b   :  { %v5972_v59 = vpop.f32.mrb[17].mxu0 }
 0x43c   :  { %v5973_v25 = vadd.f32 %v5972_v59, %v5971_v44  ;;  %v4085_v44 = vand.u32 4294901760, %v3167_v45  ;;  %v4088_v59 = vand.u32 4294901760, %v3168_v35 }
 0x43e   :  { %v2144_v23 = vadd.f32 %v5973_v25, %v2036_v55  ;;  %v9783_v55 = vsub.f32 %v3136_v53, %v3226_v56  ;;  %v3277_v25 = vand.u32 4294901760, %v3153_v22  ;;  %v3189_v56 = vld [vmem:[#allocation8 + $0x1b0] sm:$0xff] }
 0x440   :  { %v2312_v9 = vadd.f32 %v6008_v1, %v2144_v23  ;;  %v4136_v1 = vand.u32 4294901760, %v3184_v7  ;;  %v3138_v23 = vld [vmem:[#allocation8 + $0x18] sm:$0xff] }
 0x442   :  { %v9774_v61 = vpack.c.bf16 %v4136_v1, %v4133_v36  ;;  %v9776_v42 = vsub.f32 %v3184_v7, %v4136_v1  ;;  %v3157_v7 = vld [vmem:[#allocation8 + $0xb0] sm:$0xff] }
 0x444   :  { %12007 = vst [vmem:[#allocation97_spill] sm:$0xff] %v9774_v61  ;;  %12008 = vst [vmem:[#allocation39_spill] sm:$0xff] %v9776_v42  ;;  %7869 = vmatprep.subr.bf16.mxu1 %v9774_v61 }
 0x45a   :  { %v6041_v18 = vpop.f32.mrb[18].mxu0 }
 0x45b   :  { %v6042_v37 = vpop.f32.mrb[19].mxu0 }
 0x45c   :  { %v3056_v34 = vpop.f32.mrb[8].mxu1  ;;  %v6043_v2 = vadd.f32 %v6042_v37, %v6041_v18  ;;  %v4139_v18 = vand.u32 4294901760, %v3185_v28  ;;  %v4142_v37 = vand.u32 4294901760, %v3186_v14 }
 0x45d   :  { %v6919_v17 = vpop.f32.mrb[9].mxu1 }
 0x45e   :  { %v2416_v27 = vadd.f32 %v6043_v2, %v2312_v9  ;;  %v3280_v9 = vand.u32 4294901760, %v3154_v3  ;;  %v3169_v2 = vld [vmem:[#allocation8 + $0x110] sm:$0xff]  ;;  %v3170_v17 = vld [vmem:[#allocation8 + $0x118] sm:$0xff] }
 0x460   :  { %v8205_v11 = vadd.f32 %v3056_v34, %v2416_v27  ;;  %v3229_v34 = vand.u32 4294901760, %v3137_v0  ;;  %v9787_v27 = vpack.c.bf16 %v4088_v59, %v4085_v44 }
 0x462   :  { %v3060_v8 = vrot.slane %v8205_v11, 4  ;;  %v3066_v29 = vmul.f32 %v8205_v11, %v8205_v11  ;;  %12010 = vst [vmem:[#allocation90_spill] sm:$0xff] %v9787_v27  ;;  %7871 = vmatpush3.bf16.msra.mxu1 %v9787_v27 }
 0x464   :  { %v3067_v43 = vrot.slane %v3066_v29, 4  ;;  %v3061_v47 = vadd.f32 %v8205_v11, %v3060_v8  ;;  %v9791_v8 = vsub.f32 %v3168_v35, %v4088_v59  ;;  %v4100_v59 = vand.u32 4294901760, %v3172_v31 }
 0x466   :  { %v3068_v51 = vadd.f32 %v3067_v43, %v3066_v29  ;;  %v3062_v50 = vrot.slane %v3061_v47, 2  ;;  %12012 = vst [vmem:[#allocation96_spill] sm:$0xff] %v9791_v8  ;;  %v9793_v29 = vsub.f32 %v3153_v22, %v3277_v25  ;;  %v3155_v43 = vld [vmem:[#allocation8 + $0xa0] sm:$0xff] }
 0x468   :  { %v3069_v6 = vrot.slane %v3068_v51, 2  ;;  %v3063_v32 = vadd.f32 %v3062_v50, %v3061_v47  ;;  %v3156_v47 = vld [vmem:[#allocation8 + $0xa8] sm:$0xff]  ;;  %v9795_v50 = vpack.c.bf16 %v3280_v9, %v3277_v25  ;;  %v3289_v25 = vand.u32 4294901760, %v3157_v7 }
 0x46a   :  { %v3064_v15 = vrot.slane %v3063_v32, 1  ;;  %v3070_v40 = vadd.f32 %v3069_v6, %v3068_v51  ;;  %v3187_v51 = vld [vmem:[#allocation8 + $0x1a0] sm:$0xff]  ;;  %12013 = vst [vmem:[#allocation98_spill] sm:$0xff] %v9795_v50  ;;  %v9797_v6 = vsub.f32 %v3154_v3, %v3280_v9  ;;  %7681 = vmatprep.subr.bf16.mxu0 %v9795_v50  ;;  %v4151_v9 = vand.u32 4294901760, %v3189_v56 }
 0x46c   :  { %v3065_v41 = vadd.f32 %v3064_v15, %v3063_v32  ;;  %v3071_v10 = vrot.slane %v3070_v40, 1  ;;  %v9799_v32 = vpack.c.bf16 %v4142_v37, %v4139_v18  ;;  %v9801_v15 = vsub.f32 %v3185_v28, %v4139_v18 }
 0x46e   :  { %v3072_v60 = vadd.f32 %v3071_v10, %v3070_v40  ;;  %v3073_v57 = vmul.f32 0.125, %v3065_v41  ;;  %12014 = vst [vmem:[#allocation16_spill] sm:$0xff] %v9799_v32  ;;  %12015 = vst [vmem:[#allocation34_spill] sm:$0xff] %v9801_v15  ;;  %v3188_v40 = vld [vmem:[#allocation8 + $0x1a8] sm:$0xff]  ;;  %v9804_v41 = vsub.f32 %v3186_v14, %v4142_v37  ;;  %v3232_v10 = vand.u32 4294901760, %v3138_v23  ;;  %7873 = vmatprep.subr.bf16.mxu1 %v9799_v32  ;;  %v3141_v37 = vld [vmem:[#allocation8 + $0x30] sm:$0xff] }
 0x46f   :  { %v4148_v39 = vand.u32 4294901760, %v3188_v40  ;;  %v9897_v32 = vld [vmem:[#allocation8 + $0x148] sm:$0xff] }
 0x470   :  { %v3074_v54 = vmul.f32 0.125, %v3072_v60  ;;  %v3075_v16 = vmul.f32 %v3073_v57, %v3073_v57  ;;  %v3077_v13 = vsub.f32 %v8205_v11, %v3073_v57  ;;  %v9789_v11 = vsub.f32 %v3167_v45, %v4085_v44  ;;  %12016 = vst [vmem:[#allocation20_spill] sm:$0xff] %v9804_v41  ;;  %v3190_v45 = vld [vmem:[#allocation8 + $0x1b8] sm:$0xff]  ;;  %v3180_v41 = vld [vmem:[#allocation8 + $0x168] sm:$0xff] }
 0x471   :  { %v9806_v60 = vsub.f32 %v3137_v0, %v3229_v34  ;;  %v4091_v57 = vand.u32 4294901760, %v3169_v2  ;;  %v9812_v21 = vsub.f32 %v3138_v23, %v3232_v10  ;;  %v9831_v28 = vsub.f32 %v3188_v40, %v4148_v39  ;;  %v3174_v40 = vld [vmem:[#allocation8 + $0x138] sm:$0xff] }
 0x472   :  { %v3076_v19 = vsub.f32 %v3074_v54, %v3075_v16  ;;  %12011 = vst [vmem:[#allocation92_spill] sm:$0xff] %v9789_v11  ;;  %v4094_v54 = vand.u32 4294901760, %v3170_v17  ;;  %v3283_v16 = vand.u32 4294901760, %v3155_v43  ;;  %v4097_v44 = vand.u32 4294901760, %v3171_v20 }
 0x473   :  { %v9814_v63 = vsub.f32 %v3169_v2, %v4091_v57  ;;  %12024 = vst [vmem:[#allocation56_spill] sm:$0xff] %v9831_v28  ;;  %v3292_v23 = vand.u32 4294901760, %v3158_v5  ;;  %v4154_v18 = vand.u32 4294901760, %v3190_v45 }
 0x474   :  { %v3078_v4 = vadd.f32 1e-05, %v3076_v19  ;;  %v3286_v19 = vand.u32 4294901760, %v3156_v47  ;;  %v9816_v36 = vpack.c.bf16 %v4094_v54, %v4091_v57  ;;  %v9818_v62 = vsub.f32 %v3170_v17, %v4094_v54 }
 0x475   :  { %12018 = vst [vmem:[#allocation24_spill] sm:$0xff] %v9814_v63  ;;  %v9822_v1 = vsub.f32 %v3155_v43, %v3283_v16  ;;  %v9842_v43 = vpack.c.bf16 %v4100_v59, %v4097_v44  ;;  %v9846_v57 = vsub.f32 %v3172_v31, %v4100_v59  ;;  %v9848_v54 = vpack.c.bf16 %v3292_v23, %v3289_v25  ;;  %v3179_v63 = vld [vmem:[#allocation8 + $0x160] sm:$0xff] }
 0x476   :  { %8261 = vrsqrt.f32 %v3078_v4  ;;  %v4145_v4 = vand.u32 4294901760, %v3187_v51  ;;  %12019 = vst [vmem:[#allocation28_spill] sm:$0xff] %v9816_v36  ;;  %12020 = vst [vmem:[#allocation32_spill] sm:$0xff] %v9818_v62  ;;  %v9820_v53 = vpack.c.bf16 %v3286_v19, %v3283_v16  ;;  %v9825_v35 = vsub.f32 %v3156_v47, %v3286_v19  ;;  %7875 = vmatpush3.bf16.msra.mxu1 %v9816_v36  ;;  %v3142_v47 = vld [vmem:[#allocation8 + $0x38] sm:$0xff]  ;;  %v9895_v36 = vld [vmem:[#allocation8 + $0x140] sm:$0xff] }
 0x477   :  { %12027 = vst [vmem:[#allocation17_spill] sm:$0xff] %v9842_v43  ;;  %12029 = vst [vmem:[#allocation22_spill] sm:$0xff] %v9846_v57  ;;  %v9850_v16 = vsub.f32 %v3157_v7, %v3289_v25  ;;  %v9854_v19 = vsub.f32 %v3158_v5, %v3292_v23  ;;  %v11396_v61 = vand.u32 4294901760, %v9895_v36  ;;  %v3147_v57 = vld [vmem:[#allocation8 + $0x60] sm:$0xff]  ;;  %v4121_v11 = vand.u32 4294901760, %v3179_v63 }
 0x478   :  { %12021 = vst [vmem:[#allocation38_spill] sm:$0xff] %v9820_v53  ;;  %v9827_v22 = vpack.c.bf16 %v4148_v39, %v4145_v4  ;;  %v9829_v3 = vsub.f32 %v3187_v51, %v4145_v4  ;;  %v3173_v51 = vld [vmem:[#allocation8 + $0x130] sm:$0xff]  ;;  %12030 = vst [vmem:[#allocation23_spill] sm:$0xff] %v9848_v54  ;;  %v9856_v4 = vpack.c.bf16 %v4154_v18, %v4151_v9 }
 0x479   :  { %12031 = vst [vmem:[#allocation62_spill] sm:$0xff] %v9850_v16  ;;  %12032 = vst [vmem:[#allocation78_spill] sm:$0xff] %v9854_v19  ;;  %v9861_v39 = vsub.f32 %v3190_v45, %v4154_v18  ;;  %v4103_v31 = vand.u32 4294901760, %v3173_v51 }
 0x47a   :  { %12022 = vst [vmem:[#allocation44_spill] sm:$0xff] %v9827_v22  ;;  %12023 = vst [vmem:[#allocation51_spill] sm:$0xff] %v9829_v3  ;;  %7877 = vmatprep.subr.bf16.mxu1 %v9827_v22  ;;  %v3161_v22 = vld [vmem:[#allocation8 + $0xd0] sm:$0xff]  ;;  %v3259_v3 = vand.u32 4294901760, %v3147_v57 }
 0x47b   :  { %7879 = vmatpush3.bf16.msra.mxu1 %v9842_v43  ;;  %12033 = vst [vmem:[#allocation26_spill] sm:$0xff] %v9856_v4  ;;  %12035 = vst [vmem:[#allocation84_spill] sm:$0xff] %v9861_v39  ;;  %v9878_v43 = vld [vmem:[#allocation8 + $0xc0] sm:$0xff] }
 0x47c   :  { %7881 = vmatprep.subr.bf16.mxu1 %v9856_v4 }
 0x480   :  { %v8262_v12 = vpop.eup %8261 }
 0x481   :  { %v9761_v58 = vmul.f32 %v8262_v12, %v3077_v13  ;;  %v3139_v13 = vld [vmem:[#allocation8 + $0x20] sm:$0xff]  ;;  %v3140_v12 = vld [vmem:[#allocation8 + $0x28] sm:$0xff] }
 0x482   :  { %v3235_v14 = vand.u32 4294901760, %v3139_v13  ;;  %v3238_v0 = vand.u32 4294901760, %v3140_v12 }
 0x483   :  { %12004 = vst [vmem:[#allocation85_spill] sm:$0xff] %v9761_v58  ;;  %3081 = vadd.xlane.f32.xlu1 %v9761_v58  ;;  %v3090_v24 = vmul.f32 %v9761_v58, %v9761_v58  ;;  %v4124_v58 = vand.u32 4294901760, %v3180_v41 }
 0x484   :  { %v9838_v2 = vsub.f32 %v3139_v13, %v3235_v14  ;;  %v9840_v17 = vsub.f32 %v3140_v12, %v3238_v0  ;;  %v9858_v13 = vsub.f32 %v3189_v56, %v4151_v9  ;;  %v3241_v12 = vand.u32 4294901760, %v3141_v37 }
 0x485   :  { %v9872_v56 = vsub.f32 %v3173_v51, %v4103_v31  ;;  %v9880_v51 = vld [vmem:[#allocation8 + $0xc8] sm:$0xff] }
 0x486   :  { %12026 = vst [vmem:[#allocation60_spill] sm:$0xff] %v9840_v17  ;;  %12034 = vst [vmem:[#allocation27_spill] sm:$0xff] %v9858_v13  ;;  %v9864_v7 = vsub.f32 %v3141_v37, %v3241_v12 }
 0x487   :  { %3091 = vadd.xlane.f32.xlu1 %v3090_v24  ;;  %v9810_v24 = vpack.c.bf16 %v3232_v10, %v3229_v34  ;;  %v9836_v34 = vpack.c.bf16 %v3238_v0, %v3235_v14  ;;  %v9844_v10 = vsub.f32 %v3171_v20, %v4097_v44  ;;  %v3244_v20 = vand.u32 4294901760, %v3142_v47  ;;  %12040 = vst [vmem:[#allocation91_spill] sm:$0xff] %v9872_v56 }
 0x488   :  { %v4106_v14 = vand.u32 4294901760, %v3174_v40  ;;  %12036 = vst [vmem:[#allocation29_spill] sm:$0xff] %v9864_v7  ;;  %v12056_v7 = vand.u32 4294901760, %v9880_v51 }
 0x489   :  { %12017 = vst [vmem:[#allocation75_spill] sm:$0xff] %v9810_v24  ;;  %7683 = vmatpush3.bf16.msra.mxu0 %v9810_v24  ;;  %12025 = vst [vmem:[#allocation58_spill] sm:$0xff] %v9836_v34  ;;  %v9866_v0 = vpack.c.bf16 %v3244_v20, %v3241_v12  ;;  %v9868_v5 = vsub.f32 %v3142_v47, %v3244_v20  ;;  %v3146_v24 = vld [vmem:[#allocation8 + $0x58] sm:$0xff] }
 0x48a   :  { %7685 = vmatprep.subr.bf16.mxu0 %v9820_v53  ;;  %12028 = vst [vmem:[#allocation19_spill] sm:$0xff] %v9844_v10  ;;  %v9870_v44 = vpack.c.bf16 %v4106_v14, %v4103_v31  ;;  %v9874_v59 = vsub.f32 %v3174_v40, %v4106_v14  ;;  %v9882_v40 = vld [vmem:[#allocation8 + $0x1c0] sm:$0xff]  ;;  %v11378_v31 = vand.u32 4294901760, %v9878_v43  ;;  %v11377_v14 = vand.u32 4294901760, %v9880_v51  ;;  %v3145_v53 = vld [vmem:[#allocation8 + $0x50] sm:$0xff]  ;;  %v3148_v10 = vld [vmem:[#allocation8 + $0x68] sm:$0xff] }
 0x48b   :  { %12037 = vst [vmem:[#allocation31_spill] sm:$0xff] %v9866_v0  ;;  %12038 = vst [vmem:[#allocation36_spill] sm:$0xff] %v9868_v5  ;;  %v3253_v30 = vand.u32 4294901760, %v3145_v53  ;;  %v3262_v62 = vand.u32 4294901760, %v3148_v10  ;;  %v9956_v19 = vsub.f32 %v9880_v51, %v12056_v7 }
 0x48c   :  { %12039 = vst [vmem:[#allocation37_spill] sm:$0xff] %v9870_v44  ;;  %12041 = vst [vmem:[#allocation42_spill] sm:$0xff] %v9874_v59  ;;  %7883 = vmatpush3.bf16.msra.mxu1 %v9870_v44  ;;  %v9886_v44 = vld [vmem:[#allocation8 + $0x1c8] sm:$0xff]  ;;  %v9903_v27 = vpack.c.bf16 %v11377_v14, %v11378_v31 }
 0x48d   :  { %7687 = vmatpush3.bf16.msra.mxu0 %v9836_v34  ;;  %v3301_v34 = vand.u32 4294901760, %v3161_v22  ;;  %v9946_v8 = vpack.c.bf16 %v3262_v62, %v3259_v3  ;;  %v12059_v16 = vand.u32 4294901760, %v9886_v44 }
 0x48e   :  { %7689 = vmatprep.subr.bf16.mxu0 %v9848_v54  ;;  %12042 = vst [vmem:[#allocation43_spill] sm:$0xff] %v9903_v27  ;;  %v3193_v54 = vld [vmem:[#allocation8 + $0x1d0] sm:$0xff] }
 0x48f   :  { %12054 = vst [vmem:[#allocation68_spill] sm:$0xff] %v9946_v8  ;;  %v9966_v17 = vsub.f32 %v9886_v44, %v12059_v16  ;;  %v12067_v16 = vand.u32 4294901760, %v9897_v32 }
 0x491   :  { %7691 = vmatpush3.bf16.msra.mxu0 %v9866_v0  ;;  %v3162_v0 = vld [vmem:[#allocation8 + $0xd8] sm:$0xff]  ;;  %12060 = vst [vmem:[#allocation72_spill] sm:$0xff] %v9966_v17 }
 0x492   :  { %7693 = vmatprep.subr.bf16.mxu0 %v9903_v27  ;;  %v4163_v27 = vand.u32 4294901760, %v3193_v54 }
 0x510   :  { %v3082_v45 = vpop.xlane.xlu1 %3081 }
 0x511   :  { %v3083_v25 = vrot.slane %v3082_v45, 4 }
 0x513   :  { %v3084_v23 = vadd.f32 %v3083_v25, %v3082_v45  ;;  %v9889_v25 = vld [vmem:[#allocation8 + $0x40] sm:$0xff] }
 0x514   :  { %v3092_v9 = vpop.xlane.xlu1 %3091  ;;  %v12045_v14 = vand.u32 4294901760, %v9889_v25 }
 0x515   :  { %v3085_v18 = vrot.slane %v3084_v23, 2  ;;  %v3093_v37 = vrot.slane %v3092_v9, 4 }
 0x517   :  { %v3094_v12 = vadd.f32 %v3093_v37, %v3092_v9  ;;  %v3086_v4 = vadd.f32 %v3085_v18, %v3084_v23  ;;  %v9891_v9 = vld [vmem:[#allocation8 + $0x48] sm:$0xff]  ;;  %v11381_v37 = vand.u32 4294901760, %v9886_v44  ;;  %v9987_v44 = vsub.f32 %v9897_v32, %v12067_v16  ;;  %v3166_v16 = vld [vmem:[#allocation8 + $0xf8] sm:$0xff] }
 0x518   :  { %v11394_v45 = vand.u32 4294901760, %v9891_v9  ;;  %v12063_v7 = vand.u32 4294901760, %v9891_v9 }
 0x519   :  { %v3095_v47 = vrot.slane %v3094_v12, 2  ;;  %v3087_v20 = vrot.slane %v3086_v4, 1  ;;  %12068 = vst [vmem:[#allocation77_spill] sm:$0xff] %v9987_v44 }
 0x51a   :  { %v9919_v31 = vpack.c.bf16 %v11394_v45, %v12045_v14  ;;  %v3178_v14 = vld [vmem:[#allocation8 + $0x158] sm:$0xff]  ;;  %v9977_v51 = vsub.f32 %v9891_v9, %v12063_v7  ;;  %v3165_v7 = vld [vmem:[#allocation8 + $0xf0] sm:$0xff] }
 0x51b   :  { %v3096_v23 = vadd.f32 %v3095_v47, %v3094_v12  ;;  %v3088_v18 = vadd.f32 %v3087_v20, %v3086_v4  ;;  %v11395_v4 = vand.u32 4294901760, %v9897_v32  ;;  %v12043_v47 = vand.u32 4294901760, %v9882_v40 }
 0x51c   :  { %12046 = vst [vmem:[#allocation49_spill] sm:$0xff] %v9919_v31  ;;  %7695 = vmatpush3.bf16.msra.mxu0 %v9919_v31  ;;  %v4118_v52 = vand.u32 4294901760, %v3178_v14  ;;  %12064 = vst [vmem:[#allocation67_spill] sm:$0xff] %v9977_v51 }
 0x51d   :  { %8241 = vpush %v3088_v18  ;;  %v3097_v12 = vrot.slane %v3096_v23, 1  ;;  %v9912_v20 = vpack.c.bf16 %v11381_v37, %v12043_v47  ;;  %v9925_v18 = vpack.c.bf16 %v11395_v4, %v11396_v61  ;;  %v3304_v47 = vand.u32 4294901760, %v3162_v0  ;;  %v3194_v37 = vld [vmem:[#allocation8 + $0x1d8] sm:$0xff] }
 0x51e   :  { %v4166_v50 = vand.u32 4294901760, %v3194_v37  ;;  %v3256_v4 = vand.u32 4294901760, %v3146_v24  ;;  %v4115_v61 = vand.u32 4294901760, %v3177_v38  ;;  %v10005_v32 = vsub.f32 %v3178_v14, %v4118_v52  ;;  %v3182_v14 = vld [vmem:[#allocation8 + $0x178] sm:$0xff] }
 0x51f   :  { %12044 = vst [vmem:[#allocation48_spill] sm:$0xff] %v9912_v20  ;;  %12047 = vst [vmem:[#allocation54_spill] sm:$0xff] %v9925_v18  ;;  %v3098_v33 = vadd.f32 %v3097_v12, %v3096_v23  ;;  %7885 = vmatprep.subr.bf16.mxu1 %v9912_v20  ;;  %v9930_v45 = vpack.c.bf16 %v3304_v47, %v3301_v34  ;;  %v3163_v23 = vld [vmem:[#allocation8 + $0xe0] sm:$0xff]  ;;  %v3164_v12 = vld [vmem:[#allocation8 + $0xe8] sm:$0xff] }
 0x520   :  { %7887 = vmatpush3.bf16.msra.mxu1 %v9925_v18  ;;  %v9932_v59 = vpack.c.bf16 %v4166_v50, %v4163_v27  ;;  %v3195_v20 = vld [vmem:[#allocation8 + $0x1e0] sm:$0xff]  ;;  %v9935_v56 = vpack.c.bf16 %v3256_v4, %v3253_v30  ;;  %v9937_v39 = vpack.c.bf16 %v4118_v52, %v4115_v61  ;;  %v3307_v31 = vand.u32 4294901760, %v3163_v23  ;;  %v3196_v18 = vld [vmem:[#allocation8 + $0x1e8] sm:$0xff]  ;;  %12076 = vst [vmem:[#allocation71_spill] sm:$0xff] %v10005_v32 }
 0x521   :  { %12048 = vst [vmem:[#allocation55_spill] sm:$0xff] %v9930_v45  ;;  %8243 = vpush %v3098_v33  ;;  %7697 = vmatprep.subr.bf16.mxu0 %v9930_v45  ;;  %v3310_v13 = vand.u32 4294901760, %v3164_v12  ;;  %v4169_v28 = vand.u32 4294901760, %v3195_v20  ;;  %v4172_v33 = vand.u32 4294901760, %v3196_v18  ;;  %v9996_v9 = vsub.f32 %v3194_v37, %v4166_v50  ;;  %v3149_v37 = vld [vmem:[#allocation8 + $0x70] sm:$0xff] }
 0x522   :  { %12049 = vst [vmem:[#allocation46_spill] sm:$0xff] %v9932_v59  ;;  %12050 = vst [vmem:[#allocation80_spill] sm:$0xff] %v9935_v56  ;;  %7889 = vmatprep.subr.bf16.mxu1 %v9932_v59  ;;  %7699 = vmatpush3.bf16.msra.mxu0 %v9935_v56  ;;  %v12055_v59 = vand.u32 4294901760, %v9878_v43  ;;  %v10019_v52 = vpack.c.bf16 %v4124_v58, %v4121_v11 }
 0x523   :  { %12051 = vst [vmem:[#allocation64_spill] sm:$0xff] %v9937_v39  ;;  %v9942_v45 = vpack.c.bf16 %v3310_v13, %v3307_v31  ;;  %v9944_v15 = vpack.c.bf16 %v4172_v33, %v4169_v28  ;;  %12072 = vst [vmem:[#allocation88_spill] sm:$0xff] %v9996_v9  ;;  %v10011_v50 = vsub.f32 %v3195_v20, %v4169_v28  ;;  %v3265_v20 = vand.u32 4294901760, %v3149_v37 }
 0x524   :  { %7891 = vmatpush3.bf16.msra.mxu1 %v9937_v39  ;;  %v9951_v5 = vsub.f32 %v9878_v43, %v12055_v59  ;;  %v12057_v39 = vand.u32 4294901760, %v9882_v40  ;;  %v12061_v43 = vand.u32 4294901760, %v9889_v25  ;;  %12083 = vst [vmem:[#allocation40_spill] sm:$0xff] %v10019_v52 }
 0x525   :  { %12052 = vst [vmem:[#allocation65_spill] sm:$0xff] %v9942_v45  ;;  %12053 = vst [vmem:[#allocation15_spill] sm:$0xff] %v9944_v15  ;;  %7701 = vmatprep.subr.bf16.mxu0 %v9942_v45  ;;  %7893 = vmatprep.subr.bf16.mxu1 %v9944_v15  ;;  %v9990_v45 = vsub.f32 %v3161_v22, %v3301_v34  ;;  %v3197_v22 = vld [vmem:[#allocation8 + $0x1f0] sm:$0xff]  ;;  %v3198_v34 = vld [vmem:[#allocation8 + $0x1f8] sm:$0xff] }
 0x526   :  { %v9961_v56 = vsub.f32 %v9882_v40, %v12057_v39  ;;  %v9972_v59 = vsub.f32 %v9889_v25, %v12061_v43  ;;  %v12065_v39 = vand.u32 4294901760, %v9895_v36  ;;  %v9992_v25 = vsub.f32 %v3162_v0, %v3304_v47  ;;  %7703 = vmatpush3.bf16.msra.mxu0 %v9946_v8  ;;  %12079 = vst [vmem:[#allocation70_spill] sm:$0xff] %v10011_v50 }
 0x527   :  { %12069 = vst [vmem:[#allocation82_spill] sm:$0xff] %v9990_v45  ;;  %v9994_v43 = vsub.f32 %v3193_v54, %v4163_v27  ;;  %v10007_v0 = vsub.f32 %v3163_v23, %v3307_v31  ;;  %v10009_v27 = vsub.f32 %v3164_v12, %v3310_v13  ;;  %v10013_v54 = vsub.f32 %v3196_v18, %v4172_v33 }
 0x528   :  { %12058 = vst [vmem:[#allocation69_spill] sm:$0xff] %v9961_v56  ;;  %12062 = vst [vmem:[#allocation73_spill] sm:$0xff] %v9972_v59  ;;  %v9982_v40 = vsub.f32 %v9895_v36, %v12065_v39  ;;  %v9999_v36 = vsub.f32 %v3145_v53, %v3253_v30  ;;  %v10001_v39 = vsub.f32 %v3146_v24, %v3256_v4  ;;  %v3150_v30 = vld [vmem:[#allocation8 + $0x78] sm:$0xff]  ;;  %v3181_v53 = vld [vmem:[#allocation8 + $0x170] sm:$0xff]  ;;  %v3313_v31 = vand.u32 4294901760, %v3165_v7 }
 0x529   :  { %12070 = vst [vmem:[#allocation83_spill] sm:$0xff] %v9992_v25  ;;  %12071 = vst [vmem:[#allocation66_spill] sm:$0xff] %v9994_v43  ;;  %v10015_v24 = vsub.f32 %v3147_v57, %v3259_v3  ;;  %v10023_v4 = vsub.f32 %v3180_v41, %v4124_v58  ;;  %v3316_v13 = vand.u32 4294901760, %v3166_v16  ;;  %v4175_v47 = vand.u32 4294901760, %v3197_v22  ;;  %7895 = vmatpush3.bf16.msra.mxu1 %v10019_v52 }
 0x52a   :  { %12066 = vst [vmem:[#allocation76_spill] sm:$0xff] %v9982_v40  ;;  %12073 = vst [vmem:[#allocation89_spill] sm:$0xff] %v9999_v36  ;;  %v10003_v40 = vsub.f32 %v3177_v38, %v4115_v61  ;;  %v10017_v38 = vsub.f32 %v3148_v10, %v3262_v62  ;;  %v10021_v61 = vsub.f32 %v3179_v63, %v4121_v11  ;;  %v4178_v28 = vand.u32 4294901760, %v3198_v34 }
 0x52b   :  { %12074 = vst [vmem:[#allocation94_spill] sm:$0xff] %v10001_v39  ;;  %12077 = vst [vmem:[#allocation99_spill] sm:$0xff] %v10007_v0  ;;  %v3268_v18 = vand.u32 4294901760, %v3150_v30  ;;  %v4127_v23 = vand.u32 4294901760, %v3181_v53  ;;  %v10026_v3 = vpack.c.bf16 %v3316_v13, %v3313_v31  ;;  %v10028_v62 = vsub.f32 %v3165_v7, %v3313_v31 }
 0x52c   :  { %12075 = vst [vmem:[#allocation95_spill] sm:$0xff] %v10003_v40  ;;  %12078 = vst [vmem:[#allocation101_spill] sm:$0xff] %v10009_v27  ;;  %v10030_v10 = vsub.f32 %v3166_v16, %v3316_v13  ;;  %v10032_v11 = vsub.f32 %v3197_v22, %v4175_v47  ;;  %v10034_v58 = vpack.c.bf16 %v4178_v28, %v4175_v47  ;;  %v4130_v33 = vand.u32 4294901760, %v3182_v14 }
 0x52d   :  { %12080 = vst [vmem:[#allocation74_spill] sm:$0xff] %v10013_v54  ;;  %12081 = vst [vmem:[#allocation79_spill] sm:$0xff] %v10015_v24  ;;  %v10036_v41 = vsub.f32 %v3198_v34, %v4178_v28  ;;  %v10038_v63 = vpack.c.bf16 %v3268_v18, %v3265_v20  ;;  %v10040_v57 = vsub.f32 %v3149_v37, %v3265_v20  ;;  %7705 = vmatprep.subr.bf16.mxu0 %v10026_v3 }
 0x52e   :  { %12082 = vst [vmem:[#allocation18_spill] sm:$0xff] %v10017_v38  ;;  %12084 = vst [vmem:[#allocation21_spill] sm:$0xff] %v10021_v61  ;;  %v10043_v12 = vsub.f32 %v3150_v30, %v3268_v18  ;;  %v10045_v52 = vsub.f32 %v3181_v53, %v4127_v23  ;;  %v11439_v7 = vand.u32 4294901760, %v9768_v49  ;;  %7897 = vmatprep.subr.bf16.mxu1 %v10034_v58  ;;  %v11438_v16 = vand.u32 4294901760, %v9770_v26 }
 0x52f   :  { %12085 = vst [vmem:[#allocation52_spill] sm:$0xff] %v10023_v4  ;;  %12086 = vst [vmem:[#allocation25_spill] sm:$0xff] %v10026_v3  ;;  %7707 = vmatpush3.bf16.msra.mxu0 %v10038_v63  ;;  %v7932_v22 = vpack.c.bf16 %v9776_v42, %v9772_v48  ;;  %v11440_v34 = vand.u32 4294901760, %v9780_v46  ;;  %v11441_v37 = vand.u32 4294901760, %v9783_v55  ;;  %v10055_v30 = vpack.c.bf16 %v4130_v33, %v4127_v23  ;;  %v12102_v42 = vld [vmem:[#allocation36_spill] sm:$0xff] }
 0x530   :  { %12087 = vst [vmem:[#allocation30_spill] sm:$0xff] %v10028_v62  ;;  %12088 = vst [vmem:[#allocation35_spill] sm:$0xff] %v10030_v10  ;;  %v10057_v31 = vsub.f32 %v3182_v14, %v4130_v33  ;;  %v3450_v53 = vsub.f32 %v9768_v49, %v11439_v7  ;;  %v3457_v13 = vsub.f32 %v9770_v26, %v11438_v16  ;;  %v11448_v20 = vand.u32 4294901760, %v9793_v29 }
 0x531   :  { %12089 = vst [vmem:[#allocation41_spill] sm:$0xff] %v10032_v11  ;;  %12090 = vst [vmem:[#allocation47_spill] sm:$0xff] %v10034_v58  ;;  %v3338_v47 = vsub.f32 %v9780_v46, %v11440_v34  ;;  %v3345_v28 = vsub.f32 %v9783_v55, %v11441_v37  ;;  %7899 = vmatpush3.bf16.msra.mxu1 %v10055_v30  ;;  %v11449_v14 = vand.u32 4294901760, %v9797_v6  ;;  %v11450_v23 = vand.u32 4294901760, %v9806_v60 }
 0x532   :  { %12091 = vst [vmem:[#allocation53_spill] sm:$0xff] %v10036_v41  ;;  %12092 = vst [vmem:[#allocation57_spill] sm:$0xff] %v10038_v63  ;;  %v3451_v18 = vand.u32 4294901760, %v3450_v53  ;;  %v3458_v33 = vand.u32 4294901760, %v3457_v13  ;;  %7933 = vmatprep.subr.bf16.mxu1 %v7932_v22  ;;  %v3464_v34 = vsub.f32 %v9793_v29, %v11448_v20  ;;  %v11451_v13 = vand.u32 4294901760, %v9822_v1 }
 0x533   :  { %12093 = vst [vmem:[#allocation59_spill] sm:$0xff] %v10040_v57  ;;  %12094 = vst [vmem:[#allocation61_spill] sm:$0xff] %v10043_v12  ;;  %v3339_v16 = vand.u32 4294901760, %v3338_v47  ;;  %v3346_v7 = vand.u32 4294901760, %v3345_v28  ;;  %v3471_v37 = vsub.f32 %v9797_v6, %v11449_v14  ;;  %v3352_v53 = vsub.f32 %v9806_v60, %v11450_v23 }
 0x534   :  { %12095 = vst [vmem:[#allocation63_spill] sm:$0xff] %v10045_v52  ;;  %12096 = vst [vmem:[#allocation81_spill] sm:$0xff] %v10055_v30  ;;  %v11452_v30 = vand.u32 4294901760, %v9812_v21  ;;  %v7708_v58 = vpack.c.bf16 %v3458_v33, %v3451_v18  ;;  %v3465_v22 = vand.u32 4294901760, %v3464_v34  ;;  %v11460_v14 = vand.u32 4294901760, %v9825_v35 }
 0x535   :  { %12097 = vst [vmem:[#allocation87_spill] sm:$0xff] %v10057_v31  ;;  %v10085_v15 = vpack.c.bf16 %v3346_v7, %v3339_v16  ;;  %v3472_v47 = vand.u32 4294901760, %v3471_v37  ;;  %v3353_v28 = vand.u32 4294901760, %v3352_v53  ;;  %v3478_v23 = vsub.f32 %v9822_v1, %v11451_v13  ;;  %v12098_v7 = vld [vmem:[#allocation60_spill] sm:$0xff] }
 0x536   :  { %v3359_v20 = vsub.f32 %v9812_v21, %v11452_v30  ;;  %7709 = vmatprep.subr.bf16.mxu0 %v7708_v58  ;;  %v11462_v18 = vand.u32 4294901760, %v9838_v2  ;;  %v11463_v16 = vand.u32 4294901760, %v12098_v7  ;;  %v3485_v37 = vsub.f32 %v9825_v35, %v11460_v14  ;;  %v12099_v30 = vld [vmem:[#allocation62_spill] sm:$0xff]  ;;  %v12101_v14 = vld [vmem:[#allocation29_spill] sm:$0xff] }
 0x537   :  { %v10097_v34 = vpack.c.bf16 %v3472_v47, %v3465_v22  ;;  %v3479_v53 = vand.u32 4294901760, %v3478_v23  ;;  %v11466_v63 = vand.u32 4294901760, %v12099_v30  ;;  %v12100_v47 = vld [vmem:[#allocation78_spill] sm:$0xff]  ;;  %v11470_v52 = vand.u32 4294901760, %v12101_v14 }
 0x538   :  { %v3360_v33 = vand.u32 4294901760, %v3359_v20  ;;  %v3366_v58 = vsub.f32 %v9838_v2, %v11462_v18  ;;  %v3373_v13 = vsub.f32 %v12098_v7, %v11463_v16  ;;  %v3486_v22 = vand.u32 4294901760, %v3485_v37 }
 0x539   :  { %v11469_v20 = vand.u32 4294901760, %v12100_v47  ;;  %v3492_v23 = vsub.f32 %v12099_v30, %v11466_v63 }
 0x53a   :  { %v10109_v3 = vpack.c.bf16 %v3360_v33, %v3353_v28  ;;  %v3367_v8 = vand.u32 4294901760, %v3366_v58  ;;  %v3374_v31 = vand.u32 4294901760, %v3373_v13  ;;  %v10116_v18 = vpack.c.bf16 %v3486_v22, %v3479_v53 }
 0x53b   :  { %v3499_v16 = vsub.f32 %v12100_v47, %v11469_v20  ;;  %v11473_v28 = vand.u32 4294901760, %v12102_v42  ;;  %v3493_v37 = vand.u32 4294901760, %v3492_v23  ;;  %v3380_v13 = vsub.f32 %v12101_v14, %v11470_v52 }
 0x53c   :  { %v10122_v33 = vpack.c.bf16 %v3374_v31, %v3367_v8  ;;  %v11472_v58 = vand.u32 4294901760, %v9951_v5  ;;  %v11476_v22 = vand.u32 4294901760, %v9956_v19  ;;  %v11477_v31 = vand.u32 4294901760, %v9972_v59 }
 0x53d   :  { %v3500_v63 = vand.u32 4294901760, %v3499_v16  ;;  %v3387_v53 = vsub.f32 %v12102_v42, %v11473_v28  ;;  %v3381_v48 = vand.u32 4294901760, %v3380_v13  ;;  %v11478_v23 = vand.u32 4294901760, %v9977_v51 }
 0x53e   :  { %v3506_v8 = vsub.f32 %v9951_v5, %v11472_v58  ;;  %v3513_v16 = vsub.f32 %v9956_v19, %v11476_v22  ;;  %v3394_v13 = vsub.f32 %v9972_v59, %v11477_v31  ;;  %v11479_v28 = vand.u32 4294901760, %v9990_v45  ;;  %v12136_v59 = vld [vmem:[#allocation39_spill] sm:$0xff] }
 0x53f   :  { %v10137_v20 = vpack.c.bf16 %v3500_v63, %v3493_v37  ;;  %v3388_v52 = vand.u32 4294901760, %v3387_v53  ;;  %v3401_v58 = vsub.f32 %v9977_v51, %v11478_v23  ;;  %v11481_v37 = vand.u32 4294901760, %v9992_v25 }
 0x540   :  { %v3507_v41 = vand.u32 4294901760, %v3506_v8  ;;  %v3514_v63 = vand.u32 4294901760, %v3513_v16  ;;  %v3395_v53 = vand.u32 4294901760, %v3394_v13  ;;  %v3520_v8 = vsub.f32 %v9990_v45, %v11479_v28 }
 0x541   :  { %v10149_v11 = vpack.c.bf16 %v3388_v52, %v3381_v48  ;;  %v3402_v4 = vand.u32 4294901760, %v3401_v58  ;;  %v11482_v22 = vand.u32 4294901760, %v9999_v36  ;;  %v3527_v23 = vsub.f32 %v9992_v25, %v11481_v37 }
 0x542   :  { %v10156_v31 = vpack.c.bf16 %v3514_v63, %v3507_v41  ;;  %v11485_v48 = vand.u32 4294901760, %v10001_v39  ;;  %v3521_v16 = vand.u32 4294901760, %v3520_v8  ;;  %v11484_v13 = vand.u32 4294901760, %v10007_v0 }
 0x543   :  { %v10162_v52 = vpack.c.bf16 %v3402_v4, %v3395_v53  ;;  %v3408_v58 = vsub.f32 %v9999_v36, %v11482_v22  ;;  %v3528_v28 = vand.u32 4294901760, %v3527_v23  ;;  %v11488_v63 = vand.u32 4294901760, %v10009_v27 }
 0x544   :  { %v3415_v41 = vsub.f32 %v10001_v39, %v11485_v48  ;;  %v3534_v4 = vsub.f32 %v10007_v0, %v11484_v13  ;;  %v11491_v53 = vand.u32 4294901760, %v10015_v24  ;;  %v11489_v8 = vand.u32 4294901760, %v10017_v38  ;;  %v12116_v39 = vld [vmem:[#allocation20_spill] sm:$0xff] }
 0x545   :  { %v3409_v61 = vand.u32 4294901760, %v3408_v58  ;;  %v10177_v37 = vpack.c.bf16 %v3528_v28, %v3521_v16  ;;  %v3541_v23 = vsub.f32 %v10009_v27, %v11488_v63  ;;  %v11490_v48 = vand.u32 4294901760, %v10028_v62  ;;  %v12114_v27 = vld [vmem:[#allocation96_spill] sm:$0xff] }
 0x546   :  { %v3416_v22 = vand.u32 4294901760, %v3415_v41  ;;  %v3535_v54 = vand.u32 4294901760, %v3534_v4  ;;  %v3422_v58 = vsub.f32 %v10015_v24, %v11491_v53  ;;  %v3429_v13 = vsub.f32 %v10017_v38, %v11489_v8 }
 0x547   :  { %v3542_v28 = vand.u32 4294901760, %v3541_v23  ;;  %v11493_v16 = vand.u32 4294901760, %v10030_v10  ;;  %v3548_v4 = vsub.f32 %v10028_v62, %v11490_v48  ;;  %v11492_v63 = vand.u32 4294901760, %v10040_v57 }
 0x548   :  { %v10189_v50 = vpack.c.bf16 %v3416_v22, %v3409_v61  ;;  %v3423_v41 = vand.u32 4294901760, %v3422_v58  ;;  %v3430_v32 = vand.u32 4294901760, %v3429_v13  ;;  %v11494_v22 = vand.u32 4294901760, %v10043_v12 }
 0x549   :  { %v10198_v8 = vpack.c.bf16 %v3542_v28, %v3535_v54  ;;  %v3555_v61 = vsub.f32 %v10030_v10, %v11493_v16  ;;  %v3549_v23 = vand.u32 4294901760, %v3548_v4  ;;  %v3436_v58 = vsub.f32 %v10040_v57, %v11492_v63 }
 0x54a   :  { %v10205_v13 = vpack.c.bf16 %v3430_v32, %v3423_v41  ;;  %v3443_v54 = vsub.f32 %v10043_v12, %v11494_v22  ;;  %v11536_v51 = vand.u32 4294901760, %v12136_v59  ;;  %v12187_v59 = vld [vmem:[#allocation23_spill] sm:$0xff] }
 0x54b   :  { %v3556_v53 = vand.u32 4294901760, %v3555_v61  ;;  %v3437_v28 = vand.u32 4294901760, %v3436_v58 }
 0x54c   :  { %v3444_v4 = vand.u32 4294901760, %v3443_v54 }
 0x54d   :  { %v10220_v41 = vpack.c.bf16 %v3556_v53, %v3549_v23  ;;  %v12103_v53 = vld [vmem:[#allocation85_spill] sm:$0xff] }
 0x54e   :  { %s10196_s25 = spop %8241  ;;  %v10224_v16 = vpack.c.bf16 %v3444_v4, %v3437_v28 }
 0x54f   :  { %s3100_s26 = smul.f32 0.00390625, %s10196_s25 }
 0x551   :  { %s3101_s27 = smul.f32 %s10196_s25, %s3100_s26 }
 0x552   :  { %s8244_s0 = spop %8243 }
 0x553   :  { %s3102_s30 = ssub.f32 %s8244_s0, %s3101_s27 }
 0x555   :  { %s3103_s6 = smul.f32 0.003921569, %s3102_s30 }
 0x557   :  { %v3104_v32 = vstv %s3103_s6 }
 0x558   :  { %8263 = vrsqrt.f32 %v3104_v32  ;;  %vm3107_vm4 = vcmp.eq.f32.partialorder %v3104_v32, inf  ;;  %v3110_v23 = vand.u32 2147483648, %v3104_v32  ;;  %vm3109_vm5 = vcmp.eq.f32.partialorder %v3104_v32, 0.0 }
 0x562   :  { %v8264_v58 = vpop.eup %8263 }
 0x563   :  { %v3106_v61 = vmul.f32 %v8264_v58, %v3104_v32  ;;  %v3113_v58 = vstv %s3100_s26 }
 0x564   :  { %v10255_v28 = vsub.f32 %v12103_v53, %v3113_v58 }
 0x565   :  { %v3108_v63 = vsel %vm3107_vm4, %v3104_v32, %v3106_v61 }
 0x566   :  { %v3111_v48 = vsel %vm3109_vm5, %v3110_v23, %v3108_v63  ;;  %12104 = vst [vmem:[#allocation93_spill] sm:$0xff] %v10255_v28 }
 0x567   :  { %8245 = vpush %v3111_v48 }
 0x598   :  { %s8246_s7 = spop %8245 }
 0x599   :  { %s3115_s8 = smul.f32 -2.02, %s8246_s7 }
 0x59a   :  { %s3119_s9 = smul.f32 -0.765, %s8246_s7 }
 0x59b   :  { %v3116_v0 = vstv %s3115_s8  ;;  %s3123_s11 = smul.f32 -0.195, %s8246_s7 }
 0x59c   :  { %v3117_v32 = vsub.f32 %v10255_v28, %v3116_v0  ;;  %v3120_v63 = vstv %s3119_s9  ;;  %s3127_s12 = smul.f32 0.315, %s8246_s7 }
 0x59d   :  { %v3121_v48 = vsub.f32 %v10255_v28, %v3120_v63  ;;  %v3124_v61 = vstv %s3123_s11  ;;  %s3131_s13 = smul.f32 0.93, %s8246_s7 }
 0x59e   :  { %v3118_v23 = vmax.f32 %v3117_v32, 0.0  ;;  %v3125_v22 = vsub.f32 %v10255_v28, %v3124_v61  ;;  %v3128_v4 = vstv %s3127_s12 }
 0x59f   :  { %v3122_v54 = vmax.f32 %v3121_v48, 0.0  ;;  %v3129_v57 = vsub.f32 %v10255_v28, %v3128_v4  ;;  %v10261_v53 = vstv %s3131_s13 }
 0x5a0   :  { %12105 = vst [vmem:[#allocation100_spill] sm:$0xff] %v10261_v53  ;;  %v3126_v58 = vmax.f32 %v3125_v22, 0.0  ;;  %v10265_v0 = vand.u32 4294901760, %v3118_v23 }
 0x5a1   :  { %v3130_v62 = vmax.f32 %v3129_v57, 0.0  ;;  %v10267_v10 = vand.u32 4294901760, %v3122_v54 }
 0x5a2   :  { %12106 = vst [vmem:[#allocation50_spill] sm:$0xff] %v10265_v0  ;;  %v10270_v63 = vsub.f32 %v3118_v23, %v10265_v0  ;;  %v10272_v32 = vand.u32 4294901760, %v3126_v58 }
 0x5a3   :  { %12107 = vst [vmem:[#allocation60_spill] sm:$0xff] %v10267_v10  ;;  %v10274_v61 = vand.u32 4294901760, %v3130_v62  ;;  %v10277_v4 = vsub.f32 %v3122_v54, %v10267_v10 }
 0x5a4   :  { %12108 = vst [vmem:[#allocation62_spill] sm:$0xff] %v10270_v63  ;;  %12109 = vst [vmem:[#allocation78_spill] sm:$0xff] %v10272_v32  ;;  %v10280_v22 = vsub.f32 %v3126_v58, %v10272_v32  ;;  %v11513_v48 = vand.u32 4294901760, %v10270_v63 }
 0x5a5   :  { %12110 = vst [vmem:[#allocation29_spill] sm:$0xff] %v10274_v61  ;;  %v11520_v12 = vand.u32 4294901760, %v10277_v4  ;;  %v10285_v57 = vsub.f32 %v3130_v62, %v10274_v61 }
 0x5a6   :  { %12111 = vst [vmem:[#allocation36_spill] sm:$0xff] %v10280_v22  ;;  %v3327_v23 = vsub.f32 %v10270_v63, %v11513_v48  ;;  %v11525_v53 = vand.u32 4294901760, %v10280_v22  ;;  %v12113_v63 = vld [vmem:[#allocation92_spill] sm:$0xff] }
 0x5a7   :  { %12112 = vst [vmem:[#allocation85_spill] sm:$0xff] %v10285_v57  ;;  %v3321_v54 = vsub.f32 %v10277_v4, %v11520_v12  ;;  %v11526_v58 = vand.u32 4294901760, %v10285_v57  ;;  %v7934_v36 = vpack.c.bf16 %v12114_v27, %v12113_v63  ;;  %v12115_v12 = vld [vmem:[#allocation34_spill] sm:$0xff] }
 0x5a8   :  { %v3328_v28 = vand.u32 4294901760, %v3327_v23  ;;  %v4189_v32 = vsub.f32 %v10280_v22, %v11525_v53  ;;  %v7936_v45 = vpack.c.bf16 %v12116_v39, %v12115_v12  ;;  %v12117_v23 = vld [vmem:[#allocation24_spill] sm:$0xff] }
 0x5a9   :  { %v3322_v24 = vand.u32 4294901760, %v3321_v54  ;;  %v4183_v62 = vsub.f32 %v10285_v57, %v11526_v58  ;;  %v12119_v54 = vld [vmem:[#allocation51_spill] sm:$0xff]  ;;  %v12124_v53 = vld [vmem:[#allocation84_spill] sm:$0xff] }
 0x5aa   :  { %v4190_v38 = vand.u32 4294901760, %v4189_v32  ;;  %v12118_v32 = vld [vmem:[#allocation32_spill] sm:$0xff] }
 0x5ab   :  { %3323 = vmatprep.mubr.f32.mxu0 %v3322_v24  ;;  %v4184_v48 = vand.u32 4294901760, %v4183_v62  ;;  %v7938_v24 = vpack.c.bf16 %v12118_v32, %v12117_v23 }
 0x5ac   :  { %3329 = vmatmul.mubr.f32.vlgmr.msra.gmra.mrb[20].mxu0 %v3328_v28  ;;  %v12120_v28 = vld [vmem:[#allocation56_spill] sm:$0xff] }
 0x5ad   :  { %4185 = vmatprep.mubr.f32.mxu1 %v4184_v48  ;;  %7711 = vmatpush3.bf16.msra.mxu0 %v10085_v15  ;;  %v7940_v62 = vpack.c.bf16 %v12120_v28, %v12119_v54  ;;  %v12121_v15 = vld [vmem:[#allocation19_spill] sm:$0xff] }
 0x5ae   :  { %4191 = vmatmul.mubr.f32.vlgmr.msra.gmra.mrb[10].mxu1 %v4190_v38  ;;  %3559 = vmatprep.mubr.f32.mxu0 %v10267_v10  ;;  %v12122_v38 = vld [vmem:[#allocation22_spill] sm:$0xff]  ;;  %v12134_v10 = vld [vmem:[#allocation53_spill] sm:$0xff] }
 0x5af   :  { %7935 = vmatpush3.bf16.msra.mxu1 %v7934_v36  ;;  %4558 = vmatprep.mubr.f32.mxu1 %v10285_v57  ;;  %v7942_v48 = vpack.c.bf16 %v12122_v38, %v12121_v15  ;;  %v12123_v36 = vld [vmem:[#allocation27_spill] sm:$0xff] }
 0x5b0   :  { %7713 = vmatprep.subr.bf16.mxu0 %v10097_v34  ;;  %7937 = vmatprep.subr.bf16.mxu1 %v7936_v45  ;;  %v7944_v58 = vpack.c.bf16 %v12124_v53, %v12123_v36  ;;  %v12125_v45 = vld [vmem:[#allocation91_spill] sm:$0xff]  ;;  %v12126_v34 = vld [vmem:[#allocation42_spill] sm:$0xff] }
 0x5b1   :  { %7715 = vmatpush3.bf16.msra.mxu0 %v10109_v3  ;;  %v7946_v57 = vpack.c.bf16 %v12126_v34, %v12125_v45  ;;  %v7948_v3 = vpack.c.bf16 %v9966_v17, %v9961_v56 }
 0x5b2   :  { %7717 = vmatprep.subr.bf16.mxu0 %v10116_v18  ;;  %v12127_v18 = vld [vmem:[#allocation76_spill] sm:$0xff] }
 0x5b3   :  { %7939 = vmatpush3.bf16.msra.mxu1 %v7938_v24  ;;  %v7950_v24 = vpack.c.bf16 %v9987_v44, %v12127_v18 }
 0x5b4   :  { %7941 = vmatprep.subr.bf16.mxu1 %v7940_v62  ;;  %v12130_v62 = vld [vmem:[#allocation74_spill] sm:$0xff] }
 0x5b5   :  { %7719 = vmatpush3.bf16.msra.mxu0 %v10122_v33  ;;  %v12128_v33 = vld [vmem:[#allocation71_spill] sm:$0xff] }
 0x5b6   :  { %7721 = vmatprep.subr.bf16.mxu0 %v10137_v20  ;;  %v7952_v20 = vpack.c.bf16 %v9996_v9, %v9994_v43 }
 0x5b7   :  { %7943 = vmatpush3.bf16.msra.mxu1 %v7942_v48  ;;  %v12132_v48 = vld [vmem:[#allocation52_spill] sm:$0xff] }
 0x5b8   :  { %7945 = vmatprep.subr.bf16.mxu1 %v7944_v58  ;;  %v7954_v58 = vpack.c.bf16 %v12128_v33, %v10003_v40 }
 0x5b9   :  { %7723 = vmatpush3.bf16.msra.mxu0 %v10149_v11  ;;  %v12129_v11 = vld [vmem:[#allocation70_spill] sm:$0xff] }
 0x5ba   :  { %7725 = vmatprep.subr.bf16.mxu0 %v10156_v31  ;;  %v7956_v31 = vpack.c.bf16 %v12130_v62, %v12129_v11 }
 0x5bb   :  { %7947 = vmatpush3.bf16.msra.mxu1 %v7946_v57  ;;  %v12131_v57 = vld [vmem:[#allocation21_spill] sm:$0xff] }
 0x5bc   :  { %7949 = vmatprep.subr.bf16.mxu1 %v7948_v3  ;;  %v7958_v3 = vpack.c.bf16 %v12132_v48, %v12131_v57  ;;  %v11540_v48 = vand.u32 4294901760, %v12114_v27  ;;  %v10526_v27 = vld [vmem:[#allocation8 + $0x248] sm:$0xff] }
 0x5bd   :  { %7727 = vmatpush3.bf16.msra.mxu0 %v10162_v52  ;;  %v12133_v52 = vld [vmem:[#allocation41_spill] sm:$0xff] }
 0x5be   :  { %7729 = vmatprep.subr.bf16.mxu0 %v10177_v37  ;;  %v7960_v37 = vpack.c.bf16 %v12134_v10, %v12133_v52  ;;  %v11539_v10 = vand.u32 4294901760, %v12115_v12  ;;  %v10524_v12 = vld [vmem:[#allocation8 + $0x240] sm:$0xff] }
 0x5bf   :  { %7951 = vmatpush3.bf16.msra.mxu1 %v7950_v24  ;;  %v12135_v24 = vld [vmem:[#allocation33_spill] sm:$0xff] }
 0x5c0   :  { %7953 = vmatprep.subr.bf16.mxu1 %v7952_v20  ;;  %v11537_v25 = vand.u32 4294901760, %v12135_v24  ;;  %v12138_v20 = vld [vmem:[#allocation87_spill] sm:$0xff] }
 0x5c1   :  { %7731 = vmatpush3.bf16.msra.mxu0 %v10189_v50  ;;  %v12137_v50 = vld [vmem:[#allocation63_spill] sm:$0xff] }
 0x5c2   :  { %7733 = vmatprep.subr.bf16.mxu0 %v10198_v8  ;;  %v7962_v8 = vpack.c.bf16 %v12138_v20, %v12137_v50 }
 0x5c3   :  { %7955 = vmatpush3.bf16.msra.mxu1 %v7954_v58  ;;  %v11541_v58 = vand.u32 4294901760, %v12113_v63  ;;  %v12186_v63 = vld [vmem:[#allocation58_spill] sm:$0xff] }
 0x5c4   :  { %7957 = vmatprep.subr.bf16.mxu1 %v7956_v31  ;;  %v7996_v31 = vpack.c.bf16 %v11536_v51, %v11537_v25  ;;  %v11542_v51 = vand.u32 4294901760, %v12118_v32  ;;  %v12140_v25 = vpack.c.bf16 %v9783_v55, %v9780_v46  ;;  %v3205_v32 = vld [vmem:[#allocation8 + $0x230] sm:$0xff] }
 0x5c5   :  { %7735 = vmatpush3.bf16.msra.mxu0 %v10205_v13  ;;  %v11538_v13 = vand.u32 4294901760, %v12116_v39 }
 0x5c6   :  { %7737 = vmatprep.subr.bf16.mxu0 %v10220_v41  ;;  %v12139_v41 = vpack.c.bf16 %v9770_v26, %v9768_v49 }
 0x5c7   :  { %7959 = vmatpush3.bf16.msra.mxu1 %v7958_v3  ;;  %v7998_v3 = vpack.c.bf16 %v11540_v48, %v11541_v58  ;;  %v12142_v58 = vpack.c.bf16 %v9812_v21, %v9806_v60 }
 0x5c8   :  { %7961 = vmatprep.subr.bf16.mxu1 %v7960_v37  ;;  %v11545_v37 = vand.u32 4294901760, %v12117_v23  ;;  %v10515_v23 = vld [vmem:[#allocation8 + $0x238] sm:$0xff] }
 0x5c9   :  { %7739 = vmatpush3.bf16.msra.mxu0 %v10224_v16  ;;  %v8000_v16 = vpack.c.bf16 %v11538_v13, %v11539_v10  ;;  %v11549_v10 = vand.u32 4294901760, %v12121_v15  ;;  %v4968_v39 = vand.u32 4294901760, %v10515_v23 }
 0x5ca   :  { %7741 = vmatprep.subr.bf16.mxu0 %v12139_v41  ;;  %v11544_v41 = vand.u32 4294901760, %v12119_v54  ;;  %v8002_v13 = vpack.c.bf16 %v11542_v51, %v11545_v37  ;;  %v12143_v51 = vpack.c.bf16 %v9825_v35, %v9822_v1  ;;  %v11552_v37 = vand.u32 4294901760, %v9961_v56  ;;  %v12159_v56 = vld [vmem:[#allocation89_spill] sm:$0xff] }
 0x5cb   :  { %7963 = vmatpush3.bf16.msra.mxu1 %v7962_v8  ;;  %v11543_v8 = vand.u32 4294901760, %v12120_v28  ;;  %v12182_v54 = vmov 0.0  }
 0x5cc   :  { %3561 = vmatmul.mubr.f32.vlgmr.msra.gmra.mrb[22].mxu0 %v10265_v0  ;;  %7997 = vmatprep.subr.bf16.mxu1 %v7996_v31  ;;  %v12141_v31 = vpack.c.bf16 %v9797_v6, %v9793_v29 }
 0x5cd   :  { %7743 = vmatpush3.bf16.msra.mxu0 %v12140_v25  ;;  %3696 = vmatprep.mubr.f32.mxu0 %v10277_v4  ;;  %v11546_v25 = vand.u32 4294901760, %v12122_v38  ;;  %v8004_v48 = vpack.c.bf16 %v11543_v8, %v11544_v41  ;;  %v11553_v8 = vand.u32 4294901760, %v12125_v45  ;;  %v11550_v41 = vand.u32 4294901760, %v12126_v34  ;;  %v12168_v34 = vld [vmem:[#allocation30_spill] sm:$0xff] }
 0x5ce   :  { %4561 = vmatmul.mubr.f32.vlgmr.msra.gmra.mrb[12].mxu1 %v10280_v22  ;;  %7745 = vmatprep.subr.bf16.mxu0 %v12141_v31  ;;  %v11548_v31 = vand.u32 4294901760, %v12123_v36  ;;  %v12149_v22 = vld [vmem:[#allocation73_spill] sm:$0xff]  ;;  %v12178_v36 = vand.u32 4294901760, %v10277_v4  ;;  %v12180_v38 = vld [vmem:[#allocation98_spill] sm:$0xff]  ;;  %v12183_v4 = vld [vmem:[#allocation75_spill] sm:$0xff] }
 0x5cf   :  { %7999 = vmatpush3.bf16.msra.mxu1 %v7998_v3  ;;  %4835 = vmatprep.mubr.f32.mxu1 %v10274_v61  ;;  %v11547_v3 = vand.u32 4294901760, %v12124_v53  ;;  %v12164_v61 = vld [vmem:[#allocation18_spill] sm:$0xff] }
 0x5d0   :  { %8001 = vmatprep.subr.bf16.mxu1 %v8000_v16  ;;  %v8006_v16 = vpack.c.bf16 %v11546_v25, %v11549_v10  ;;  %v12145_v25 = vpack.c.bf16 %v12100_v47, %v12099_v30  ;;  %v11561_v10 = vand.u32 4294901760, %v9994_v43  ;;  %v11585_v43 = vand.u32 4294901760, %v12133_v52  ;;  %v12171_v52 = vld [vmem:[#allocation59_spill] sm:$0xff] }
 0x5d1   :  { %7747 = vmatpush3.bf16.msra.mxu0 %v12142_v58  ;;  %v8008_v58 = vpack.c.bf16 %v11547_v3, %v11548_v31  ;;  %v11559_v3 = vand.u32 4294901760, %v12127_v18  ;;  %v11558_v31 = vand.u32 4294901760, %v9987_v44  ;;  %v12151_v44 = vld [vmem:[#allocation83_spill] sm:$0xff] }
 0x5d2   :  { %7749 = vmatprep.subr.bf16.mxu0 %v12143_v51  ;;  %v11551_v51 = vand.u32 4294901760, %v9966_v17  ;;  %v12157_v17 = vld [vmem:[#allocation53_spill] sm:$0xff] }
 0x5d3   :  { %8003 = vmatpush3.bf16.msra.mxu1 %v8002_v13  ;;  %v12144_v13 = vpack.c.bf16 %v12098_v7, %v9838_v2 }
 0x5d4   :  { %8005 = vmatprep.subr.bf16.mxu1 %v8004_v48  ;;  %v8010_v48 = vpack.c.bf16 %v11550_v41, %v11553_v8  ;;  %v12147_v41 = vpack.c.bf16 %v9956_v19, %v9951_v5 }
 0x5d5   :  { %7751 = vmatpush3.bf16.msra.mxu0 %v12144_v13  ;;  %v8012_v13 = vpack.c.bf16 %v11551_v51, %v11552_v37  ;;  %v11574_v51 = vand.u32 4294901760, %v10003_v40  ;;  %v11573_v37 = vand.u32 4294901760, %v12128_v33  ;;  %v12161_v33 = vld [vmem:[#allocation101_spill] sm:$0xff] }
 0x5d6   :  { %7753 = vmatprep.subr.bf16.mxu0 %v12145_v25  ;;  %v11560_v25 = vand.u32 4294901760, %v9996_v9  ;;  %v12156_v9 = vand.u32 4294901760, %v12130_v62  ;;  %v3199_v62 = vld [vmem:[#allocation8 + $0x200] sm:$0xff] }
 0x5d7   :  { %8007 = vmatpush3.bf16.msra.mxu1 %v8006_v16  ;;  %v12146_v16 = vpack.c.bf16 %v12102_v42, %v12101_v14 }
 0x5d8   :  { %8009 = vmatprep.subr.bf16.mxu1 %v8008_v58  ;;  %v8014_v58 = vpack.c.bf16 %v11558_v31, %v11559_v3  ;;  %v12152_v31 = vld [vmem:[#allocation82_spill] sm:$0xff] }
 0x5d9   :  { %7755 = vmatpush3.bf16.msra.mxu0 %v12146_v16  ;;  %v8016_v16 = vpack.c.bf16 %v11560_v25, %v11561_v10  ;;  %v12153_v3 = vpack.c.bf16 %v12151_v44, %v12152_v31  ;;  %v11583_v25 = vand.u32 4294901760, %v12131_v57  ;;  %v12154_v10 = vld [vmem:[#allocation52_spill] sm:$0xff]  ;;  %v12167_v57 = vld [vmem:[#allocation35_spill] sm:$0xff] }
 0x5da   :  { %7757 = vmatprep.subr.bf16.mxu0 %v12147_v41  ;;  %v11582_v8 = vand.u32 4294901760, %v12154_v10  ;;  %v12155_v41 = vand.u32 4294901760, %v12129_v11  ;;  %v3200_v11 = vld [vmem:[#allocation8 + $0x208] sm:$0xff]  ;;  %v12169_v10 = vpack.c.bf16 %v12167_v57, %v12168_v34  ;;  %v10557_v34 = vld [vmem:[#allocation8 + $0x260] sm:$0xff] }
 0x5db   :  { %8011 = vmatpush3.bf16.msra.mxu1 %v8010_v48  ;;  %v12148_v48 = vld [vmem:[#allocation67_spill] sm:$0xff] }
 0x5dc   :  { %8013 = vmatprep.subr.bf16.mxu1 %v8012_v13  ;;  %v12150_v18 = vpack.c.bf16 %v12148_v48, %v12149_v22  ;;  %v8018_v13 = vpack.c.bf16 %v11573_v37, %v11574_v51  ;;  %v12162_v37 = vld [vmem:[#allocation99_spill] sm:$0xff] }
 0x5dd   :  { %v12163_v51 = vpack.c.bf16 %v12161_v33, %v12162_v37 }
 0x5de   :  { %7759 = vmatpush3.bf16.msra.mxu0 %v12150_v18  ;;  %v8020_v18 = vpack.c.bf16 %v12156_v9, %v12155_v41  ;;  %v11593_v9 = vand.u32 4294901760, %v12137_v50  ;;  %v11592_v41 = vand.u32 4294901760, %v12138_v20  ;;  %v12175_v50 = vld [vmem:[#allocation62_spill] sm:$0xff]  ;;  %v12176_v20 = vmov 0.0|0.0  }
 0x5df   :  { %7761 = vmatprep.subr.bf16.mxu0 %v12153_v3  ;;  %8015 = vmatpush3.bf16.msra.mxu1 %v8014_v58  ;;  %v11584_v3 = vand.u32 4294901760, %v12157_v17  ;;  %v12158_v58 = vld [vmem:[#allocation94_spill] sm:$0xff]  ;;  %v12170_v17 = vld [vmem:[#allocation61_spill] sm:$0xff] }
 0x5e0   :  { %8017 = vmatprep.subr.bf16.mxu1 %v8016_v16  ;;  %v12160_v40 = vpack.c.bf16 %v12158_v58, %v12159_v56  ;;  %v8022_v16 = vpack.c.bf16 %v11582_v8, %v11583_v25  ;;  %v4947_v8 = vand.u32 4294901760, %v3199_v62  ;;  %v4950_v25 = vand.u32 4294901760, %v3200_v11 }
 0x5e1   :  { %v12172_v45 = vpack.c.bf16 %v12170_v17, %v12171_v52  ;;  %v10541_v17 = vld [vmem:[#allocation8 + $0x258] sm:$0xff]  ;;  %v12195_v52 = vld [vmem:[#allocation43_spill] sm:$0xff] }
 0x5e2   :  { %7763 = vmatpush3.bf16.msra.mxu0 %v12160_v40  ;;  %v8024_v40 = vpack.c.bf16 %v11584_v3, %v11585_v43  ;;  %v3201_v3 = vld [vmem:[#allocation8 + $0x210] sm:$0xff]  ;;  %v3202_v43 = vld [vmem:[#allocation8 + $0x218] sm:$0xff]  ;;  %v10497_v53 = vpack.c.bf16 %v4950_v25, %v4947_v8 }
 0x5e3   :  { %7765 = vmatprep.subr.bf16.mxu0 %v12163_v51  ;;  %8019 = vmatpush3.bf16.msra.mxu1 %v8018_v13  ;;  %v12165_v51 = vld [vmem:[#allocation79_spill] sm:$0xff] }
 0x5e4   :  { %8021 = vmatprep.subr.bf16.mxu1 %v8020_v18  ;;  %v12166_v13 = vpack.c.bf16 %v12164_v61, %v12165_v51  ;;  %v8026_v18 = vpack.c.bf16 %v11592_v41, %v11593_v9  ;;  %12174 = vst [vmem:[#allocation67_spill] sm:$0xff] %v10497_v53  ;;  %v3203_v41 = vld [vmem:[#allocation8 + $0x220] sm:$0xff]  ;;  %v10501_v9 = vld [vmem:[#allocation8 + $0x228] sm:$0xff] }
 0x5e5   :  { %v4959_v15 = vand.u32 4294901760, %v3203_v41  ;;  %v4962_v28 = vand.u32 4294901760, %v10501_v9 }
 0x5e6   :  { %7767 = vmatpush3.bf16.msra.mxu0 %v12166_v13  ;;  %v12173_v13 = vld [vmem:[#allocation45_spill] sm:$0xff] }
 0x5e7   :  { %7769 = vmatprep.subr.bf16.mxu0 %v12169_v10  ;;  %8023 = vmatpush3.bf16.msra.mxu1 %v8022_v16  ;;  %v4953_v10 = vand.u32 4294901760, %v3201_v3  ;;  %v4956_v16 = vand.u32 4294901760, %v3202_v43 }
 0x5e8   :  { %8025 = vmatprep.subr.bf16.mxu1 %v8024_v40  ;;  %v12177_v40 = vld [vmem:[#allocation86_spill] sm:$0xff] }
 0x5ea   :  { %7771 = vmatpush3.bf16.msra.mxu0 %v12172_v45  ;;  %v12179_v45 = vld [vmem:[#allocation78_spill] sm:$0xff] }
 0x5eb   :  { %7773 = vmatprep.subr.bf16.mxu0 %v12173_v13  ;;  %8027 = vmatpush3.bf16.msra.mxu1 %v8026_v18  ;;  %v10509_v18 = vpack.c.bf16 %v4956_v16, %v4953_v10  ;;  %v10539_v13 = vld [vmem:[#allocation8 + $0x250] sm:$0xff] }
 0x5ec   :  { %8060 = vmatprep.subr.bf16.mxu1 %v12176_v20 }
 0x5ed   :  { %3699 = vmatmul.mubr.f32.vlgmr.msra.gmra.mrb[24].mxu0 %v12175_v50  ;;  %12181 = vst [vmem:[#allocation73_spill] sm:$0xff] %v10509_v18 }
 0x5ee   :  { %7775 = vmatpush3.bf16.msra.mxu0 %v12177_v40  ;;  %3803 = vmatprep.mubr.f32.mxu0 %v12178_v36  ;;  %v12184_v36 = vld [vmem:[#allocation38_spill] sm:$0xff] }
 0x5ef   :  { %4837 = vmatmul.mubr.f32.vlgmr.msra.gmra.mrb[14].mxu1 %v12179_v45  ;;  %7777 = vmatprep.subr.bf16.mxu0 %v12180_v38  ;;  %v10520_v45 = vpack.c.bf16 %v4962_v28, %v4959_v15  ;;  %v12190_v38 = vld [vmem:[#allocation100_spill] sm:$0xff] }
 0x5f0   :  { %8062 = vmatpush3.bf16.msra.mxu1 %v10497_v53  ;;  %6952 = vmatprep.mubr.msk.f32.mxu1 %vm8390_vm0, %v12182_v54  ;;  %v4965_v53 = vand.u32 4294901760, %v3205_v32 }
 0x5f1   :  { %8063 = vmatprep.subr.bf16.mxu1 %v12176_v20  ;;  %12185 = vst [vmem:[#allocation83_spill] sm:$0xff] %v10520_v45 }
 0x5f2   :  { %7779 = vmatpush3.bf16.msra.mxu0 %v12183_v4  ;;  %v10531_v24 = vpack.c.bf16 %v4968_v39, %v4965_v53  ;;  %v12189_v4 = vld [vmem:[#allocation93_spill] sm:$0xff] }
 0x5f3   :  { %7781 = vmatprep.subr.bf16.mxu0 %v12184_v36  ;;  %v4974_v36 = vand.u32 4294901760, %v10526_v27  ;;  %v12191_v40 = vsub.f32 %v12189_v4, %v12190_v38  ;;  %v12204_v38 = vld [vmem:[#allocation80_spill] sm:$0xff] }
 0x5f4   :  { %8065 = vmatpush3.bf16.msra.mxu1 %v10509_v18  ;;  %12188 = vst [vmem:[#allocation82_spill] sm:$0xff] %v10531_v24  ;;  %v4971_v18 = vand.u32 4294901760, %v10524_v12 }
 0x5f5   :  { %8066 = vmatprep.subr.bf16.mxu1 %v12176_v20  ;;  %v3134_v0 = vmax.f32 %v12191_v40, 0.0  ;;  %v10586_v40 = vsub.f32 %v3203_v41, %v4959_v15  ;;  %v12208_v15 = vand.u32 4294901760, %v10557_v34 }
 0x5f6   :  { %7783 = vmatpush3.bf16.msra.mxu0 %v12186_v63  ;;  %v12192_v63 = vld [vmem:[#allocation31_spill] sm:$0xff]  ;;  %v10550_v57 = vpack.c.bf16 %v4974_v36, %v4971_v18 }
 0x5f7   :  { %7785 = vmatprep.subr.bf16.mxu0 %v12187_v59  ;;  %v10544_v59 = vsub.f32 %v3199_v62, %v4947_v8  ;;  %v10554_v4 = vand.u32 4294901760, %v3134_v0  ;;  %v10559_v62 = vld [vmem:[#allocation8 + $0x268] sm:$0xff]  ;;  %v10562_v8 = vsub.f32 %v3201_v3, %v4953_v10  ;;  %v10582_v10 = vld [vmem:[#allocation8 + $0x270] sm:$0xff] }
 0x5f8   :  { %8068 = vmatpush3.bf16.msra.mxu1 %v10520_v45  ;;  %v10546_v45 = vsub.f32 %v3200_v11, %v4950_v25  ;;  %12196 = vst [vmem:[#allocation101_spill] sm:$0xff] %v10550_v57  ;;  %v12198_v11 = vld [vmem:[#allocation49_spill] sm:$0xff]  ;;  %v10564_v25 = vsub.f32 %v3202_v43, %v4956_v16  ;;  %v12209_v41 = vand.u32 4294901760, %v10559_v62 }
 0x5f9   :  { %8069 = vmatprep.subr.bf16.mxu1 %v12176_v20  ;;  %12193 = vst [vmem:[#allocation94_spill] sm:$0xff] %v10544_v59  ;;  %12197 = vst [vmem:[#allocation99_spill] sm:$0xff] %v10554_v4  ;;  %v10579_v43 = vsub.f32 %v3134_v0, %v10554_v4  ;;  %v10584_v16 = vld [vmem:[#allocation8 + $0x278] sm:$0xff]  ;;  %v10599_v4 = vsub.f32 %v10501_v9, %v4962_v28  ;;  %v12211_v28 = vld [vmem:[#allocation68_spill] sm:$0xff]  ;;  %v12212_v9 = vand.u32 4294901760, %v9768_v49  ;;  %v12217_v49 = vand.u32 4294901760, %v10582_v10 }
 0x5fa   :  { %7787 = vmatpush3.bf16.msra.mxu0 %v12192_v63  ;;  %12194 = vst [vmem:[#allocation89_spill] sm:$0xff] %v10546_v45  ;;  %v12201_v63 = vand.u32 4294901760, %v10541_v17  ;;  %v12207_v3 = vand.u32 4294901760, %v10546_v45 }
 0x5fb   :  { %7789 = vmatprep.subr.bf16.mxu0 %v12195_v52  ;;  %v12200_v52 = vand.u32 4294901760, %v10539_v13  ;;  %12203 = vst [vmem:[#allocation62_spill] sm:$0xff] %v10579_v43 }
 0x5fc   :  { %8071 = vmatpush3.bf16.msra.mxu1 %v10531_v24  ;;  %v12199_v24 = vld [vmem:[#allocation55_spill] sm:$0xff]  ;;  %v5048_v0 = vsub.f32 %v10546_v45, %v12207_v3  ;;  %v11629_v3 = vand.u32 4294901760, %v10579_v43  ;;  %v12214_v45 = vld [vmem:[#allocation25_spill] sm:$0xff] }
 0x5fd   :  { %8072 = vmatprep.subr.bf16.mxu1 %v12176_v20  ;;  %v10574_v61 = vpack.c.bf16 %v12201_v63, %v12200_v52  ;;  %v12206_v63 = vand.u32 4294901760, %v10544_v59 }
 0x5fe   :  { %7791 = vmatpush3.bf16.msra.mxu0 %v12198_v11  ;;  %v12213_v11 = vand.u32 4294901760, %v9770_v26  ;;  %v12218_v26 = vand.u32 4294901760, %v10584_v16 }
 0x5ff   :  { %7793 = vmatprep.subr.bf16.mxu0 %v12199_v24  ;;  %12202 = vst [vmem:[#allocation79_spill] sm:$0xff] %v10574_v61  ;;  %v5041_v52 = vsub.f32 %v10544_v59, %v12206_v63  ;;  %v10612_v24 = vsub.f32 %v3205_v32, %v4965_v53  ;;  %v12215_v63 = vand.u32 4294901760, %v10562_v8  ;;  %v12216_v59 = vand.u32 4294901760, %v10564_v25 }
 0x600   :  { %8074 = vmatpush3.bf16.msra.mxu1 %v10550_v57  ;;  %v12205_v57 = vld [vmem:[#allocation65_spill] sm:$0xff]  ;;  %v10627_v32 = vsub.f32 %v10515_v23, %v4968_v39  ;;  %v10643_v39 = vsub.f32 %v10524_v12, %v4971_v18  ;;  %v10646_v23 = vsub.f32 %v10526_v27, %v4974_v36  ;;  %v12224_v27 = vand.u32 4294901760, %v10586_v40 }
 0x601   :  { %8075 = vmatprep.subr.bf16.mxu1 %v12176_v20  ;;  %v5062_v53 = vsub.f32 %v10564_v25, %v12216_v59  ;;  %v5030_v59 = vsub.f32 %v10579_v43, %v11629_v3 }
 0x602   :  { %7795 = vmatpush3.bf16.msra.mxu0 %v12204_v38  ;;  %v5055_v38 = vsub.f32 %v10562_v8, %v12215_v63  ;;  %v12219_v63 = vld [vmem:[#allocation57_spill] sm:$0xff]  ;;  %v5069_v18 = vsub.f32 %v10586_v40, %v12224_v27  ;;  %v5089_v36 = vand.u32 4294901760, %v10627_v32 }
 0x603   :  { %7797 = vmatprep.subr.bf16.mxu0 %v12205_v57  ;;  %v10606_v57 = vpack.c.bf16 %v12209_v41, %v12208_v15  ;;  %v5042_v15 = vand.u32 4294901760, %v5041_v52  ;;  %v5049_v41 = vand.u32 4294901760, %v5048_v0  ;;  %v12222_v52 = vand.u32 4294901760, %v9793_v29 }
 0x604   :  { %8077 = vmatpush3.bf16.msra.mxu1 %v10574_v61  ;;  %v7804_v61 = vpack.c.bf16 %v12213_v11, %v12212_v9  ;;  %v10634_v11 = vpack.c.bf16 %v12218_v26, %v12217_v49  ;;  %v12220_v9 = vand.u32 4294901760, %v9780_v46  ;;  %v12221_v49 = vand.u32 4294901760, %v9783_v55 }
 0x605   :  { %12210 = vst [vmem:[#allocation93_spill] sm:$0xff] %v10606_v57  ;;  %8078 = vmatprep.subr.bf16.mxu1 %v12176_v20  ;;  %v8085_v0 = vpack.c.bf16 %v5049_v41, %v5042_v15  ;;  %v5056_v43 = vand.u32 4294901760, %v5055_v38  ;;  %v5063_v12 = vand.u32 4294901760, %v5062_v53  ;;  %v12225_v46 = vand.u32 4294901760, %v10599_v4  ;;  %v12229_v53 = vld [vmem:[#allocation60_spill] sm:$0xff] }
 0x606   :  { %7799 = vmatpush3.bf16.msra.mxu0 %v12211_v28  ;;  %v7806_v26 = vpack.c.bf16 %v12221_v49, %v12220_v9  ;;  %v12226_v29 = vand.u32 4294901760, %v12175_v50  ;;  %v12228_v15 = vand.u32 4294901760, %v10541_v17  ;;  %v12231_v50 = vand.u32 4294901760, %v9812_v21 }
 0x607   :  { %7801 = vmatprep.subr.bf16.mxu0 %v12214_v45  ;;  %v5076_v55 = vsub.f32 %v10599_v4, %v12225_v46  ;;  %v8088_v9 = vpack.c.bf16 %v5063_v12, %v5056_v43  ;;  %v12232_v49 = vand.u32 4294901760, %v9822_v1  ;;  %v5096_v46 = vand.u32 4294901760, %v10643_v39 }
 0x608   :  { %8080 = vmatpush3.bf16.msra.mxu1 %v10606_v57  ;;  %v12223_v57 = vand.u32 4294901760, %v9797_v6  ;;  %v5031_v6 = vand.u32 4294901760, %v5030_v59  ;;  %v10677_v41 = vsub.f32 %v10541_v17, %v12228_v15  ;;  %v5103_v17 = vand.u32 4294901760, %v10646_v23 }
 0x609   :  { %8081 = vmatprep.subr.bf16.mxu1 %v12176_v20  ;;  %v5090_v21 = vsub.f32 %v10627_v32, %v5089_v36  ;;  %v12234_v1 = vand.u32 4294901760, %v10557_v34  ;;  %v12235_v43 = vand.u32 4294901760, %v9838_v2  ;;  %v12237_v12 = vand.u32 4294901760, %v12099_v30 }
 0x60a   :  { %7803 = vmatpush3.bf16.msra.mxu0 %v12219_v63  ;;  %v7808_v3 = vpack.c.bf16 %v12223_v57, %v12222_v52  ;;  %v12227_v57 = vand.u32 4294901760, %v10539_v13  ;;  %v12230_v52 = vand.u32 4294901760, %v9806_v60  ;;  %v5117_v2 = vand.u32 4294901760, %v10677_v41 }
 0x60b   :  { %7805 = vmatprep.subr.bf16.mxu0 %v7804_v61  ;;  %v5082_v61 = vand.u32 4294901760, %v10612_v24 }
 0x60c   :  { %8083 = vmatpush3.bf16.msra.mxu1 %v10634_v11  ;;  %v10672_v38 = vsub.f32 %v10539_v13, %v12227_v57  ;;  %v7810_v59 = vpack.c.bf16 %v12231_v50, %v12230_v52  ;;  %v12233_v13 = vand.u32 4294901760, %v9825_v35  ;;  %v10702_v35 = vsub.f32 %v10557_v34, %v12234_v1 }
 0x60d   :  { %3807 = vmatmul.mubr.f32.vlgmr.msra.gmra.mrb[26].mxu0 %v12226_v29  ;;  %8084 = vmatprep.subr.bf16.mxu1 %v12176_v20  ;;  %v5077_v29 = vand.u32 4294901760, %v5076_v55  ;;  %v5083_v60 = vsub.f32 %v10612_v24, %v5082_v61  ;;  %v5104_v34 = vsub.f32 %v10646_v23, %v5103_v17  ;;  %v5091_v52 = vand.u32 4294901760, %v5090_v21 }
 0x60e   :  { %7807 = vmatpush3.bf16.msra.mxu0 %v7806_v26  ;;  %3973 = vmatprep.mubr.f32.mxu0 %v12229_v53  ;;  %v7812_v27 = vpack.c.bf16 %v12233_v13, %v12232_v49  ;;  %v5070_v26 = vand.u32 4294901760, %v5069_v18  ;;  %v12238_v18 = vand.u32 4294901760, %v12100_v47  ;;  %v5110_v57 = vand.u32 4294901760, %v10672_v38 }
 0x60f   :  { %6953 = vmatmul.mubr.f32.vlgmr.msra.gmra.mrb[16].mxu1 %v5031_v6  ;;  %7809 = vmatprep.subr.bf16.mxu0 %v7808_v3  ;;  %v12236_v3 = vand.u32 4294901760, %v12098_v7  ;;  %v5097_v6 = vsub.f32 %v10643_v39, %v5096_v46  ;;  %v12239_v7 = vand.u32 4294901760, %v10559_v62  ;;  %v5084_v15 = vand.u32 4294901760, %v5083_v60 }
 0x610   :  { %8086 = vmatpush3.bf16.msra.mxu1 %v8085_v0  ;;  %6987 = vmatprep.mubr.msk.f32.mxu1 %vm8390_vm0, %v12182_v54  ;;  %v7816_v55 = vpack.c.bf16 %v12238_v18, %v12237_v12  ;;  %v8091_v47 = vpack.c.bf16 %v5077_v29, %v5070_v26  ;;  %v12240_v50 = vand.u32 4294901760, %v10582_v10  ;;  %v12241_v49 = vand.u32 4294901760, %v12101_v14 }
 0x611   :  { %8087 = vmatprep.subr.bf16.mxu1 %v12176_v20  ;;  %v7814_v0 = vpack.c.bf16 %v12236_v3, %v12235_v43  ;;  %v10723_v30 = vsub.f32 %v10559_v62, %v12239_v7  ;;  %v12242_v13 = vand.u32 4294901760, %v12102_v42  ;;  %v12243_v62 = vand.u32 4294901760, %v9951_v5 }
 0x612   :  { %7811 = vmatpush3.bf16.msra.mxu0 %v7810_v59  ;;  %v10729_v59 = vsub.f32 %v10582_v10, %v12240_v50  ;;  %v5098_v29 = vand.u32 4294901760, %v5097_v6  ;;  %v5105_v60 = vand.u32 4294901760, %v5104_v34  ;;  %v5111_v21 = vsub.f32 %v10672_v38, %v5110_v57 }
 0x613   :  { %7813 = vmatprep.subr.bf16.mxu0 %v7812_v27  ;;  %v7818_v27 = vpack.c.bf16 %v12242_v13, %v12241_v49  ;;  %v5118_v10 = vsub.f32 %v10677_v41, %v5117_v2  ;;  %v12245_v14 = vand.u32 4294901760, %v10584_v16  ;;  %v8094_v5 = vpack.c.bf16 %v5091_v52, %v5084_v15 }
 0x614   :  { %8089 = vmatpush3.bf16.msra.mxu1 %v8088_v9  ;;  %v12244_v9 = vand.u32 4294901760, %v9956_v19  ;;  %v5124_v19 = vand.u32 4294901760, %v10702_v35  ;;  %v5131_v1 = vand.u32 4294901760, %v10723_v30  ;;  %v12246_v43 = vand.u32 4294901760, %v12149_v22 }
 0x615   :  { %8090 = vmatprep.subr.bf16.mxu1 %v12176_v20  ;;  %v10748_v42 = vsub.f32 %v10584_v16, %v12245_v14  ;;  %v12247_v3 = vand.u32 4294901760, %v12148_v48  ;;  %v8097_v12 = vpack.c.bf16 %v5105_v60, %v5098_v29  ;;  %v12248_v18 = vand.u32 4294901760, %v12152_v31  ;;  %v12257_v29 = vld [vmem:[#allocation30_spill] sm:$0xff] }
 0x616   :  { %7815 = vmatpush3.bf16.msra.mxu0 %v7814_v0  ;;  %v7820_v26 = vpack.c.bf16 %v12244_v9, %v12243_v62  ;;  %v12249_v16 = vand.u32 4294901760, %v12151_v44  ;;  %v5112_v6 = vand.u32 4294901760, %v5111_v21  ;;  %v5119_v34 = vand.u32 4294901760, %v5118_v10  ;;  %v12259_v21 = vld [vmem:[#allocation35_spill] sm:$0xff] }
 0x617   :  { %7817 = vmatprep.subr.bf16.mxu0 %v7816_v55  ;;  %v7822_v0 = vpack.c.bf16 %v12247_v3, %v12246_v43  ;;  %v5125_v7 = vsub.f32 %v10702_v35, %v5124_v19  ;;  %v5132_v22 = vsub.f32 %v10723_v30, %v5131_v1  ;;  %v5138_v48 = vand.u32 4294901760, %v10729_v59 }
 0x618   :  { %8092 = vmatpush3.bf16.msra.mxu1 %v8091_v47  ;;  %v7824_v55 = vpack.c.bf16 %v12249_v16, %v12248_v18  ;;  %v5145_v47 = vand.u32 4294901760, %v10748_v42  ;;  %v12250_v44 = vand.u32 4294901760, %v12159_v56  ;;  %v12251_v31 = vand.u32 4294901760, %v12158_v58  ;;  %v12263_v18 = vld [vmem:[#allocation61_spill] sm:$0xff] }
 0x619   :  { %8093 = vmatprep.subr.bf16.mxu1 %v12176_v20  ;;  %v8100_v52 = vpack.c.bf16 %v5119_v34, %v5112_v6  ;;  %v12252_v50 = vand.u32 4294901760, %v12162_v37  ;;  %v12253_v49 = vand.u32 4294901760, %v12161_v33  ;;  %v5133_v62 = vand.u32 4294901760, %v5132_v22  ;;  %v12255_v37 = vld [vmem:[#allocation18_spill] sm:$0xff]  ;;  %v12265_v6 = vld [vmem:[#allocation45_spill] sm:$0xff] }
 0x61a   :  { %7819 = vmatpush3.bf16.msra.mxu0 %v7818_v27  ;;  %v7826_v15 = vpack.c.bf16 %v12251_v31, %v12250_v44  ;;  %v5126_v27 = vand.u32 4294901760, %v5125_v7  ;;  %v5139_v9 = vsub.f32 %v10729_v59, %v5138_v48  ;;  %v5146_v56 = vsub.f32 %v10748_v42, %v5145_v47  ;;  %v12266_v34 = vld [vmem:[#allocation94_spill] sm:$0xff]  ;;  %v12267_v7 = vld [vmem:[#allocation89_spill] sm:$0xff] }
 0x61b   :  { %7821 = vmatprep.subr.bf16.mxu0 %v7820_v26  ;;  %v7828_v13 = vpack.c.bf16 %v12253_v49, %v12252_v50  ;;  %v12254_v58 = vand.u32 4294901760, %v12165_v51  ;;  %v12256_v26 = vand.u32 4294901760, %v12255_v37  ;;  %v12258_v60 = vand.u32 4294901760, %v12257_v29  ;;  %v12268_v44 = vld [vmem:[#allocation50_spill] sm:$0xff]  ;;  %v12272_v49 = vld [vmem:[#allocation75_spill] sm:$0xff]  ;;  %v12280_v29 = vld [vmem:[#allocation33_spill] sm:$0xff] }
 0x61c   :  { %8095 = vmatpush3.bf16.msra.mxu1 %v8094_v5  ;;  %v12260_v10 = vand.u32 4294901760, %v12259_v21  ;;  %v8103_v5 = vpack.c.bf16 %v5133_v62, %v5126_v27  ;;  %v5140_v43 = vand.u32 4294901760, %v5139_v9  ;;  %v5147_v3 = vand.u32 4294901760, %v5146_v56  ;;  %v12269_v31 = vld [vmem:[#allocation86_spill] sm:$0xff]  ;;  %v12275_v62 = vld [vmem:[#allocation23_spill] sm:$0xff] }
 0x61d   :  { %8096 = vmatprep.subr.bf16.mxu1 %v12176_v20  ;;  %v7830_v33 = vpack.c.bf16 %v12256_v26, %v12254_v58  ;;  %v12264_v51 = vand.u32 4294901760, %v12263_v18  ;;  %v8109_v22 = vpack.c.bf16 %v12267_v7, %v12266_v34  ;;  %v8112_v50 = vpack.c.bf16 %v10564_v25, %v10562_v8  ;;  %v12274_v27 = vld [vmem:[#allocation58_spill] sm:$0xff]  ;;  %v12276_v56 = vld [vmem:[#allocation31_spill] sm:$0xff]  ;;  %v12278_v26 = vld [vmem:[#allocation49_spill] sm:$0xff] }
 0x61e   :  { %7823 = vmatpush3.bf16.msra.mxu0 %v7822_v0  ;;  %v7832_v14 = vpack.c.bf16 %v12260_v10, %v12258_v60  ;;  %v12261_v0 = vld [vmem:[#allocation59_spill] sm:$0xff]  ;;  %v8118_v9 = vpack.c.bf16 %v10627_v32, %v10612_v24  ;;  %v8121_v37 = vpack.c.bf16 %v10646_v23, %v10643_v39  ;;  %v12281_v60 = vand.u32 4294901760, %v12280_v29  ;;  %v12286_v18 = vld [vmem:[#allocation96_spill] sm:$0xff]  ;;  %v12375_v24 = vld [vmem:[#allocation46_spill] sm:$0xff] }
 0x61f   :  { %7825 = vmatprep.subr.bf16.mxu0 %v7824_v55  ;;  %v8106_v55 = vpack.c.bf16 %v5147_v3, %v5140_v43  ;;  %v12277_v58 = vld [vmem:[#allocation43_spill] sm:$0xff]  ;;  %v8124_v43 = vpack.c.bf16 %v10677_v41, %v10672_v38  ;;  %v12284_v3 = vld [vmem:[#allocation92_spill] sm:$0xff]  ;;  %v8175_v38 = vpack.c.bf16 %v5131_v1, %v5124_v19 }
 0x620   :  { %8098 = vmatpush3.bf16.msra.mxu1 %v8097_v12  ;;  %v12262_v12 = vand.u32 4294901760, %v12261_v0  ;;  %v4312_v21 = vsub.f32 %v12280_v29, %v12281_v60  ;;  %v12282_v10 = vld [vmem:[#allocation39_spill] sm:$0xff]  ;;  %v12285_v0 = vand.u32 4294901760, %v12284_v3  ;;  %v12376_v23 = vld [vmem:[#allocation64_spill] sm:$0xff] }
 0x621   :  { %8099 = vmatprep.subr.bf16.mxu1 %v12176_v20  ;;  %v12378_v41 = vld [vmem:[#allocation40_spill] sm:$0xff] }
 0x622   :  { %7827 = vmatpush3.bf16.msra.mxu0 %v7826_v15  ;;  %v7834_v16 = vpack.c.bf16 %v12264_v51, %v12262_v12  ;;  %v12270_v15 = vld [vmem:[#allocation99_spill] sm:$0xff]  ;;  %v4200_v12 = vsub.f32 %v12284_v3, %v12285_v0  ;;  %v12287_v51 = vand.u32 4294901760, %v12286_v18 }
 0x623   :  { %7829 = vmatprep.subr.bf16.mxu0 %v7828_v13  ;;  %v12273_v13 = vld [vmem:[#allocation38_spill] sm:$0xff] }
 0x624   :  { %8101 = vmatpush3.bf16.msra.mxu1 %v8100_v52  ;;  %v12271_v52 = vld [vmem:[#allocation98_spill] sm:$0xff] }
 0x625   :  { %8102 = vmatprep.subr.bf16.mxu1 %v12176_v20 }
 0x626   :  { %7831 = vmatpush3.bf16.msra.mxu0 %v7830_v33  ;;  %v12279_v33 = vld [vmem:[#allocation55_spill] sm:$0xff] }
 0x627   :  { %7833 = vmatprep.subr.bf16.mxu0 %v7832_v14  ;;  %v12283_v14 = vand.u32 4294901760, %v12282_v10 }
 0x628   :  { %8104 = vmatpush3.bf16.msra.mxu1 %v8103_v5 }
 0x629   :  { %8105 = vmatprep.subr.bf16.mxu1 %v12176_v20  ;;  %v4319_v5 = vsub.f32 %v12282_v10, %v12283_v14 }
 0x62a   :  { %7835 = vmatpush3.bf16.msra.mxu0 %v7834_v16  ;;  %v4207_v16 = vsub.f32 %v12286_v18, %v12287_v51  ;;  %v8130_v18 = vpack.c.bf16 %v10748_v42, %v10729_v59 }
 0x62b   :  { %7837 = vmatprep.subr.bf16.mxu0 %v12265_v6  ;;  %v12289_v6 = vld [vmem:[#allocation65_spill] sm:$0xff] }
 0x62c   :  { %8107 = vmatpush3.bf16.msra.mxu1 %v8106_v55  ;;  %v12288_v55 = vld [vmem:[#allocation80_spill] sm:$0xff] }
 0x62d   :  { %3975 = vmatmul.mubr.f32.vlgmr.msra.gmra.mrb[28].mxu0 %v12268_v44  ;;  %8108 = vmatprep.subr.bf16.mxu1 %v12176_v20 }
 0x62e   :  { %7839 = vmatpush3.bf16.msra.mxu0 %v12269_v31  ;;  %4077 = vmatprep.mubr.f32.mxu0 %v12229_v53  ;;  %v8115_v53 = vpack.c.bf16 %v10599_v4, %v10586_v40  ;;  %v4320_v31 = vand.u32 4294901760, %v4319_v5  ;;  %v12300_v5 = vld [vmem:[#allocation56_spill] sm:$0xff] }
 0x62f   :  { %6988 = vmatmul.mubr.f32.vlgmr.msra.gmra.mrb[16].mxu1 %v12270_v15  ;;  %7841 = vmatprep.subr.bf16.mxu0 %v12271_v52  ;;  %v12290_v52 = vld [vmem:[#allocation34_spill] sm:$0xff] }
 0x630   :  { %8110 = vmatpush3.bf16.msra.mxu1 %v8109_v22  ;;  %7022 = vmatprep.mubr.msk.f32.mxu1 %vm8390_vm0, %v12182_v54  ;;  %v4313_v22 = vand.u32 4294901760, %v4312_v21  ;;  %v12298_v21 = vld [vmem:[#allocation51_spill] sm:$0xff] }
 0x631   :  { %8111 = vmatprep.subr.bf16.mxu1 %v12176_v20  ;;  %v12299_v10 = vand.u32 4294901760, %v12298_v21 }
 0x632   :  { %7843 = vmatpush3.bf16.msra.mxu0 %v12272_v49  ;;  %v7900_v0 = vpack.c.bf16 %v4320_v31, %v4313_v22 }
 0x633   :  { %7845 = vmatprep.subr.bf16.mxu0 %v12273_v13  ;;  %v12292_v13 = vld [vmem:[#allocation20_spill] sm:$0xff]  ;;  %v4340_v14 = vsub.f32 %v12298_v21, %v12299_v10  ;;  %v12312_v21 = vld [vmem:[#allocation42_spill] sm:$0xff] }
 0x634   :  { %8113 = vmatpush3.bf16.msra.mxu1 %v8112_v50  ;;  %v12291_v50 = vand.u32 4294901760, %v12290_v52  ;;  %v12313_v10 = vand.u32 4294901760, %v12312_v21 }
 0x635   :  { %8114 = vmatprep.subr.bf16.mxu1 %v12176_v20  ;;  %v4341_v31 = vand.u32 4294901760, %v4340_v14 }
 0x636   :  { %7847 = vmatpush3.bf16.msra.mxu0 %v12274_v27  ;;  %v4326_v49 = vsub.f32 %v12290_v52, %v12291_v50  ;;  %v12304_v52 = vld [vmem:[#allocation22_spill] sm:$0xff]  ;;  %v4249_v14 = vsub.f32 %v12312_v21, %v12313_v10  ;;  %v12329_v21 = vld [vmem:[#allocation73_spill] sm:$0xff] }
 0x637   :  { %7849 = vmatprep.subr.bf16.mxu0 %v12275_v62  ;;  %v8127_v62 = vpack.c.bf16 %v10723_v30, %v10702_v35  ;;  %v12305_v50 = vand.u32 4294901760, %v12304_v52  ;;  %v12381_v35 = vld [vmem:[#allocation36_spill] sm:$0xff] }
 0x638   :  { %8116 = vmatpush3.bf16.msra.mxu1 %v8115_v53  ;;  %v12293_v53 = vand.u32 4294901760, %v12292_v13  ;;  %v12382_v30 = vand.u32 4294901760, %v12381_v35 }
 0x639   :  { %8117 = vmatprep.subr.bf16.mxu1 %v12176_v20 }
 0x63a   :  { %7851 = vmatpush3.bf16.msra.mxu0 %v12276_v56  ;;  %v4333_v27 = vsub.f32 %v12292_v13, %v12293_v53  ;;  %v4208_v56 = vand.u32 4294901760, %v4207_v16  ;;  %v12302_v16 = vld [vmem:[#allocation19_spill] sm:$0xff]  ;;  %v4235_v13 = vsub.f32 %v12304_v52, %v12305_v50 }
 0x63b   :  { %7853 = vmatprep.subr.bf16.mxu0 %v12277_v58  ;;  %v12294_v58 = vld [vmem:[#allocation24_spill] sm:$0xff]  ;;  %v12320_v50 = vld [vmem:[#allocation67_spill] sm:$0xff] }
 0x63c   :  { %8119 = vmatpush3.bf16.msra.mxu1 %v8118_v9  ;;  %v4201_v9 = vand.u32 4294901760, %v4200_v12  ;;  %v4334_v12 = vand.u32 4294901760, %v4333_v27  ;;  %v12306_v27 = vld [vmem:[#allocation27_spill] sm:$0xff] }
 0x63d   :  { %8120 = vmatprep.subr.bf16.mxu1 %v12176_v20 }
 0x63e   :  { %7855 = vmatpush3.bf16.msra.mxu0 %v12278_v26  ;;  %v7902_v51 = vpack.c.bf16 %v4208_v56, %v4201_v9  ;;  %v12308_v56 = vld [vmem:[#allocation84_spill] sm:$0xff] }
 0x63f   :  { %7857 = vmatprep.subr.bf16.mxu0 %v12279_v33  ;;  %v12296_v33 = vld [vmem:[#allocation32_spill] sm:$0xff] }
 0x640   :  { %8122 = vmatpush3.bf16.msra.mxu1 %v8121_v37  ;;  %v12295_v37 = vand.u32 4294901760, %v12294_v58  ;;  %v12297_v29 = vand.u32 4294901760, %v12296_v33 }
 0x641   :  { %8123 = vmatprep.subr.bf16.mxu1 %v12176_v20 }
 0x642   :  { %7859 = vmatpush3.bf16.msra.mxu0 %v12288_v55  ;;  %v4214_v26 = vsub.f32 %v12294_v58, %v12295_v37  ;;  %v4221_v60 = vsub.f32 %v12296_v33, %v12297_v29  ;;  %v12303_v55 = vand.u32 4294901760, %v12302_v16  ;;  %v12309_v58 = vand.u32 4294901760, %v12308_v56  ;;  %v12310_v33 = vld [vmem:[#allocation91_spill] sm:$0xff] }
 0x643   :  { %7861 = vmatprep.subr.bf16.mxu0 %v12289_v6  ;;  %v12311_v29 = vand.u32 4294901760, %v12310_v33 }
 0x644   :  { %8125 = vmatpush3.bf16.msra.mxu1 %v8124_v43  ;;  %v12301_v43 = vand.u32 4294901760, %v12300_v5  ;;  %v4228_v6 = vsub.f32 %v12302_v16, %v12303_v55  ;;  %v4222_v22 = vand.u32 4294901760, %v4221_v60  ;;  %v4361_v37 = vsub.f32 %v12308_v56, %v12309_v58  ;;  %v12318_v55 = vld [vmem:[#allocation72_spill] sm:$0xff] }
 0x645   :  { %8126 = vmatprep.subr.bf16.mxu1 %v12176_v20  ;;  %v4242_v60 = vsub.f32 %v12310_v33, %v12311_v29 }
 0x646   :  { %7863 = vmatpush3.bf16.msra.mxu0 %v12211_v28  ;;  %v4347_v3 = vsub.f32 %v12300_v5, %v12301_v43  ;;  %v4327_v28 = vand.u32 4294901760, %v4326_v49  ;;  %v12314_v5 = vld [vmem:[#allocation29_spill] sm:$0xff] }
 0x647   :  { %7865 = vmatprep.subr.bf16.mxu0 %v12214_v45  ;;  %v4215_v45 = vand.u32 4294901760, %v4214_v26  ;;  %v4236_v26 = vand.u32 4294901760, %v4235_v13  ;;  %v4243_v13 = vand.u32 4294901760, %v4242_v60 }
 0x648   :  { %8128 = vmatpush3.bf16.msra.mxu1 %v8127_v62  ;;  %v4348_v49 = vand.u32 4294901760, %v4347_v3  ;;  %v7904_v53 = vpack.c.bf16 %v4334_v12, %v4327_v28  ;;  %v12307_v62 = vand.u32 4294901760, %v12306_v27  ;;  %v4362_v28 = vand.u32 4294901760, %v4361_v37  ;;  %v12316_v12 = vld [vmem:[#allocation69_spill] sm:$0xff]  ;;  %v12327_v37 = vld [vmem:[#allocation88_spill] sm:$0xff] }
 0x649   :  { %8129 = vmatprep.subr.bf16.mxu1 %v12176_v20  ;;  %v7906_v43 = vpack.c.bf16 %v4222_v22, %v4215_v45  ;;  %v4250_v45 = vand.u32 4294901760, %v4249_v14  ;;  %v12321_v22 = vld [vmem:[#allocation76_spill] sm:$0xff]  ;;  %v12328_v33 = vand.u32 4294901760, %v12327_v37  ;;  %v12330_v14 = vld [vmem:[#allocation95_spill] sm:$0xff] }
 0x64a   :  { %7867 = vmatpush3.bf16.msra.mxu0 %v12219_v63  ;;  %v4354_v9 = vsub.f32 %v12306_v27, %v12307_v62  ;;  %v4229_v63 = vand.u32 4294901760, %v4228_v6  ;;  %v7908_v3 = vpack.c.bf16 %v4348_v49, %v4341_v31  ;;  %v12319_v6 = vand.u32 4294901760, %v12318_v55 }
 0x64b   :  { %7901 = vmatprep.subr.bf16.mxu0 %v7900_v0  ;;  %v12315_v0 = vld [vmem:[#allocation62_spill] sm:$0xff]  ;;  %v12322_v31 = vand.u32 4294901760, %v12321_v22  ;;  %v4389_v29 = vsub.f32 %v12327_v37, %v12328_v33  ;;  %v7914_v10 = vpack.c.bf16 %v4250_v45, %v4243_v13 }
 0x64c   :  { %8131 = vmatpush3.bf16.msra.mxu1 %v8130_v18  ;;  %v12317_v18 = vand.u32 4294901760, %v12316_v12  ;;  %v4375_v52 = vsub.f32 %v12318_v55, %v12319_v6  ;;  %v12336_v13 = vld [vmem:[#allocation74_spill] sm:$0xff] }
 0x64d   :  { %4079 = vmatmul.mubr.f32.vlgmr.msra.gmra.mrb[30].mxu0 %v12268_v44  ;;  %8132 = vmatprep.subr.bf16.mxu1 %v12176_v20  ;;  %v4355_v44 = vand.u32 4294901760, %v4354_v9  ;;  %v4256_v49 = vsub.f32 %v12321_v22, %v12322_v31  ;;  %v12325_v9 = vld [vmem:[#allocation66_spill] sm:$0xff]  ;;  %v12337_v45 = vand.u32 4294901760, %v12336_v13 }
 0x64e   :  { %7903 = vmatpush3.bf16.msra.mxu0 %v7902_v51  ;;  %4421 = vmatprep.mubr.f32.mxu0 %v12314_v5  ;;  %v4368_v16 = vsub.f32 %v12316_v12, %v12317_v18  ;;  %v7910_v51 = vpack.c.bf16 %v4236_v26, %v4229_v63  ;;  %v12326_v56 = vand.u32 4294901760, %v12325_v9  ;;  %v4376_v60 = vand.u32 4294901760, %v4375_v52  ;;  %v12332_v18 = vld [vmem:[#allocation71_spill] sm:$0xff] }
 0x64f   :  { %7023 = vmatmul.mubr.f32.vlgmr.msra.gmra.mrb[16].mxu1 %v12315_v0  ;;  %7905 = vmatprep.subr.bf16.mxu0 %v7904_v53  ;;  %v12323_v53 = vld [vmem:[#allocation77_spill] sm:$0xff]  ;;  %v7912_v63 = vpack.c.bf16 %v4362_v28, %v4355_v44  ;;  %v12333_v55 = vand.u32 4294901760, %v12332_v18  ;;  %v4257_v22 = vand.u32 4294901760, %v4256_v49  ;;  %v4390_v44 = vand.u32 4294901760, %v4389_v29  ;;  %v12341_v29 = vld [vmem:[#allocation52_spill] sm:$0xff] }
 0x650   :  { %8134 = vmatpush3.bf16.msra.mxu1 %v12320_v50  ;;  %7057 = vmatprep.mubr.msk.f32.mxu1 %vm8390_vm0, %v12182_v54  ;;  %v12324_v27 = vand.u32 4294901760, %v12323_v53  ;;  %v4382_v58 = vsub.f32 %v12325_v9, %v12326_v56  ;;  %v4369_v26 = vand.u32 4294901760, %v4368_v16  ;;  %v12334_v16 = vld [vmem:[#allocation70_spill] sm:$0xff]  ;;  %v12338_v9 = vld [vmem:[#allocation83_spill] sm:$0xff] }
 0x651   :  { %8135 = vmatprep.subr.bf16.mxu1 %v12176_v20  ;;  %v4277_v6 = vsub.f32 %v12332_v18, %v12333_v55  ;;  %v12335_v52 = vand.u32 4294901760, %v12334_v16 }
 0x652   :  { %7907 = vmatpush3.bf16.msra.mxu0 %v7906_v43  ;;  %v4263_v62 = vsub.f32 %v12323_v53, %v12324_v27  ;;  %v12331_v43 = vand.u32 4294901760, %v12330_v14  ;;  %v7916_v28 = vpack.c.bf16 %v4376_v60, %v4369_v26  ;;  %v4403_v27 = vsub.f32 %v12336_v13, %v12337_v45 }
 0x653   :  { %7909 = vmatprep.subr.bf16.mxu0 %v7908_v3  ;;  %v4383_v3 = vand.u32 4294901760, %v4382_v58  ;;  %v4396_v53 = vsub.f32 %v12334_v16, %v12335_v52  ;;  %v12339_v58 = vld [vmem:[#allocation21_spill] sm:$0xff]  ;;  %v12348_v16 = vld [vmem:[#allocation63_spill] sm:$0xff] }
 0x654   :  { %8137 = vmatpush3.bf16.msra.mxu1 %v12329_v21  ;;  %v4270_v12 = vsub.f32 %v12330_v14, %v12331_v43  ;;  %v4264_v31 = vand.u32 4294901760, %v4263_v62  ;;  %v12340_v37 = vand.u32 4294901760, %v12339_v58  ;;  %v4404_v14 = vand.u32 4294901760, %v4403_v27  ;;  %v12343_v43 = vld [vmem:[#allocation41_spill] sm:$0xff] }
 0x655   :  { %8138 = vmatprep.subr.bf16.mxu1 %v12176_v20  ;;  %v7920_v62 = vpack.c.bf16 %v4390_v44, %v4383_v3  ;;  %v4397_v60 = vand.u32 4294901760, %v4396_v53  ;;  %v12344_v18 = vand.u32 4294901760, %v12343_v43  ;;  %v12350_v53 = vld [vmem:[#allocation87_spill] sm:$0xff] }
 0x656   :  { %7911 = vmatpush3.bf16.msra.mxu0 %v7910_v51  ;;  %v4271_v56 = vand.u32 4294901760, %v4270_v12  ;;  %v4278_v51 = vand.u32 4294901760, %v4277_v6  ;;  %v7918_v49 = vpack.c.bf16 %v4264_v31, %v4257_v22  ;;  %v4284_v33 = vsub.f32 %v12339_v58, %v12340_v37  ;;  %v12345_v12 = vld [vmem:[#allocation53_spill] sm:$0xff]  ;;  %v12347_v22 = vld [vmem:[#allocation82_spill] sm:$0xff] }
 0x657   :  { %7913 = vmatprep.subr.bf16.mxu0 %v7912_v63  ;;  %v12342_v63 = vand.u32 4294901760, %v12341_v29  ;;  %v4410_v55 = vsub.f32 %v12343_v43, %v12344_v18  ;;  %v12346_v6 = vand.u32 4294901760, %v12345_v12  ;;  %v12351_v13 = vand.u32 4294901760, %v12350_v53 }
 0x658   :  { %8140 = vmatpush3.bf16.msra.mxu1 %v12338_v9  ;;  %v7922_v31 = vpack.c.bf16 %v4278_v51, %v4271_v56  ;;  %v4285_v3 = vand.u32 4294901760, %v4284_v33  ;;  %v7924_v27 = vpack.c.bf16 %v4404_v14, %v4397_v60  ;;  %v12355_v60 = vld [vmem:[#allocation97_spill] sm:$0xff]  ;;  %v12356_v14 = vand.u32 4294901760, %v12266_v34 }
 0x659   :  { %8141 = vmatprep.subr.bf16.mxu1 %v12176_v20  ;;  %v4291_v26 = vsub.f32 %v12341_v29, %v12342_v63  ;;  %v4305_v45 = vsub.f32 %v12350_v53, %v12351_v13  ;;  %v4411_v58 = vand.u32 4294901760, %v4410_v55  ;;  %v12352_v29 = vld [vmem:[#allocation101_spill] sm:$0xff]  ;;  %v12353_v63 = vld [vmem:[#allocation79_spill] sm:$0xff]  ;;  %v12357_v43 = vand.u32 4294901760, %v12267_v7  ;;  %v12358_v55 = vld [vmem:[#allocation78_spill] sm:$0xff] }
 0x65a   :  { %7915 = vmatpush3.bf16.msra.mxu0 %v7914_v10  ;;  %v4417_v10 = vsub.f32 %v12345_v12, %v12346_v6  ;;  %v12359_v12 = vld [vmem:[#allocation90_spill] sm:$0xff]  ;;  %v12360_v6 = vld [vmem:[#allocation85_spill] sm:$0xff]  ;;  %v12364_v34 = vand.u32 4294901760, %v10562_v8  ;;  %v12365_v7 = vand.u32 4294901760, %v10564_v25  ;;  %v8166_v13 = vpack.c.bf16 %v5089_v36, %v5082_v61 }
 0x65b   :  { %7917 = vmatprep.subr.bf16.mxu0 %v7916_v28  ;;  %v4292_v44 = vand.u32 4294901760, %v4291_v26  ;;  %v12349_v28 = vand.u32 4294901760, %v12348_v16  ;;  %v8157_v18 = vpack.c.bf16 %v12357_v43, %v12356_v14  ;;  %v12370_v8 = vld [vmem:[#allocation17_spill] sm:$0xff]  ;;  %v12371_v25 = vld [vmem:[#allocation26_spill] sm:$0xff]  ;;  %v8172_v61 = vpack.c.bf16 %v5117_v2, %v5110_v57  ;;  %v12379_v57 = vld [vmem:[#allocation47_spill] sm:$0xff] }
 0x65c   :  { %8143 = vmatpush3.bf16.msra.mxu1 %v12347_v22  ;;  %v4418_v37 = vand.u32 4294901760, %v4417_v10  ;;  %v12361_v10 = vand.u32 4294901760, %v12360_v6  ;;  %v8178_v2 = vpack.c.bf16 %v5145_v47, %v5138_v48 }
 0x65d   :  { %8144 = vmatprep.subr.bf16.mxu1 %v12176_v20  ;;  %v4298_v52 = vsub.f32 %v12348_v16, %v12349_v28  ;;  %v7926_v56 = vpack.c.bf16 %v4292_v44, %v4285_v3  ;;  %v12363_v3 = vld [vmem:[#allocation16_spill] sm:$0xff]  ;;  %v8160_v44 = vpack.c.bf16 %v12365_v7, %v12364_v34 }
 0x65e   :  { %7919 = vmatpush3.bf16.msra.mxu0 %v7918_v49  ;;  %v4306_v49 = vand.u32 4294901760, %v4305_v45  ;;  %v7928_v33 = vpack.c.bf16 %v4418_v37, %v4411_v58  ;;  %v12366_v16 = vld [vmem:[#allocation28_spill] sm:$0xff]  ;;  %v12372_v45 = vld [vmem:[#allocation37_spill] sm:$0xff] }
 0x65f   :  { %7921 = vmatprep.subr.bf16.mxu0 %v7920_v62  ;;  %v4299_v51 = vand.u32 4294901760, %v4298_v52  ;;  %v12354_v62 = vld [vmem:[#allocation93_spill] sm:$0xff]  ;;  %v12367_v28 = vld [vmem:[#allocation44_spill] sm:$0xff]  ;;  %v12369_v52 = vand.u32 4294901760, %v10599_v4  ;;  %v8169_v4 = vpack.c.bf16 %v5103_v17, %v5096_v46  ;;  %v12377_v17 = vld [vmem:[#allocation15_spill] sm:$0xff] }
 0x660   :  { %8146 = vmatpush3.bf16.msra.mxu1 %v12352_v29 }
 0x661   :  { %8147 = vmatprep.subr.bf16.mxu1 %v12176_v20  ;;  %v7930_v26 = vpack.c.bf16 %v4306_v49, %v4299_v51 }
 0x662   :  { %7923 = vmatpush3.bf16.msra.mxu0 %v7922_v31  ;;  %v12362_v31 = vand.u32 4294901760, %v12315_v0  ;;  %v12368_v0 = vand.u32 4294901760, %v10586_v40  ;;  %v12373_v40 = vld [vmem:[#allocation48_spill] sm:$0xff] }
 0x663   :  { %7925 = vmatprep.subr.bf16.mxu0 %v7924_v27  ;;  %v12374_v27 = vld [vmem:[#allocation54_spill] sm:$0xff] }
 0x664   :  { %8149 = vmatpush3.bf16.msra.mxu1 %v12353_v63  ;;  %v8163_v53 = vpack.c.bf16 %v12369_v52, %v12368_v0 }
 0x665   :  { %8150 = vmatprep.subr.bf16.mxu1 %v12176_v20 }
 0x666   :  { %7927 = vmatpush3.bf16.msra.mxu0 %v7926_v56  ;;  %v12380_v56 = vld [vmem:[#allocation81_spill] sm:$0xff] }
 0x667   :  { %7929 = vmatprep.subr.bf16.mxu0 %v7928_v33 }
 0x668   :  { %8152 = vmatpush3.bf16.msra.mxu1 %v12354_v62 }
 0x669   :  { %8153 = vmatprep.subr.bf16.mxu1 %v12176_v20 }
 0x66a   :  { %7931 = vmatpush3.bf16.msra.mxu0 %v7930_v26 }
 0x66b   :  { %7965 = vmatprep.subr.bf16.mxu0 %v12355_v60 }
 0x66c   :  { %8155 = vmatpush3.bf16.msra.mxu1 %v10634_v11 }
 0x66d   :  { %4423 = vmatmul.mubr.f32.vlgmr.msra.gmra.mrb[32].mxu0 %v12358_v55  ;;  %8156 = vmatprep.subr.bf16.mxu1 %v12176_v20 }
 0x66e   :  { %7967 = vmatpush3.bf16.msra.mxu0 %v12359_v12  ;;  %4665 = vmatprep.mubr.f32.mxu0 %v12361_v10 }
 0x66f   :  { %7058 = vmatmul.mubr.f32.vlgmr.msra.gmra.mrb[16].mxu1 %v12362_v31  ;;  %7969 = vmatprep.subr.bf16.mxu0 %v12363_v3 }
 0x670   :  { %8158 = vmatpush3.bf16.msra.mxu1 %v8157_v18  ;;  %7092 = vmatprep.mubr.msk.f32.mxu1 %vm8390_vm0, %v12182_v54 }
 0x671   :  { %8159 = vmatprep.subr.bf16.mxu1 %v12176_v20 }
 0x672   :  { %7971 = vmatpush3.bf16.msra.mxu0 %v12366_v16 }
 0x673   :  { %7973 = vmatprep.subr.bf16.mxu0 %v12367_v28 }
 0x674   :  { %8161 = vmatpush3.bf16.msra.mxu1 %v8160_v44 }
 0x675   :  { %8162 = vmatprep.subr.bf16.mxu1 %v12176_v20 }
 0x676   :  { %7975 = vmatpush3.bf16.msra.mxu0 %v12370_v8 }
 0x677   :  { %7977 = vmatprep.subr.bf16.mxu0 %v12371_v25 }
 0x678   :  { %8164 = vmatpush3.bf16.msra.mxu1 %v8163_v53 }
 0x679   :  { %8165 = vmatprep.subr.bf16.mxu1 %v12176_v20 }
 0x67a   :  { %7979 = vmatpush3.bf16.msra.mxu0 %v12372_v45 }
 0x67b   :  { %7981 = vmatprep.subr.bf16.mxu0 %v12373_v40 }
 0x67c   :  { %8167 = vmatpush3.bf16.msra.mxu1 %v8166_v13 }
 0x67d   :  { %8168 = vmatprep.subr.bf16.mxu1 %v12176_v20 }
 0x67e   :  { %7983 = vmatpush3.bf16.msra.mxu0 %v12374_v27 }
 0x67f   :  { %7985 = vmatprep.subr.bf16.mxu0 %v12375_v24  ;;  %v6178_v32 = vpop.f32.mrb[20].mxu0 }
 0x680   :  { %8170 = vmatpush3.bf16.msra.mxu1 %v8169_v4  ;;  %v6179_v36 = vpop.f32.mrb[21].mxu0 }
 0x681   :  { %8171 = vmatprep.subr.bf16.mxu1 %v12176_v20  ;;  %v6388_v39 = vpop.f32.mrb[10].mxu1  ;;  %v6180_v58 = vadd.f32 %v6179_v36, %v6178_v32 }
 0x682   :  { %7987 = vmatpush3.bf16.msra.mxu0 %v12376_v23  ;;  %v6389_v46 = vpop.f32.mrb[11].mxu1 }
 0x683   :  { %7989 = vmatprep.subr.bf16.mxu0 %v12377_v17  ;;  %v11011_v37 = vadd.f32 %v6389_v46, %v6388_v39 }
 0x684   :  { %8173 = vmatpush3.bf16.msra.mxu1 %v8172_v61 }
 0x685   :  { %8174 = vmatprep.subr.bf16.mxu1 %v12176_v20 }
 0x686   :  { %7991 = vmatpush3.bf16.msra.mxu0 %v12378_v41 }
 0x687   :  { %7993 = vmatprep.subr.bf16.mxu0 %v12379_v57 }
 0x688   :  { %8176 = vmatpush3.bf16.msra.mxu1 %v8175_v38 }
 0x689   :  { %8177 = vmatprep.subr.bf16.mxu1 %v12176_v20 }
 0x68a   :  { %7995 = vmatpush3.bf16.msra.mxu0 %v12380_v56 }
 0x68b   :  { %8029 = vmatprep.subr.bf16.mxu0 %v12355_v60 }
 0x68c   :  { %8179 = vmatpush3.bf16.msra.mxu1 %v8178_v2 }
 0x68d   :  { %4669 = vmatmul.mubr.f32.vlgmr.msra.gmra.mrb[34].mxu0 %v12382_v30  ;;  %8180 = vmatprep.subr.bf16.mxu1 %v12176_v20 }
 0x68e   :  { %8031 = vmatpush3.bf16.msra.mxu0 %v12359_v12  ;;  %4939 = vmatprep.mubr.f32.mxu0 %v12314_v5 }
 0x68f   :  { %7093 = vmatmul.mubr.f32.vlgmr.msra.gmra.mrb[16].mxu1 %v12270_v15  ;;  %8033 = vmatprep.subr.bf16.mxu0 %v12363_v3 }
 0x690   :  { %8182 = vmatpush3.bf16.msra.mxu1 %v12320_v50  ;;  %7127 = vmatprep.mubr.msk.f32.mxu1 %vm8390_vm0, %v12182_v54  ;;  %v5605_v54 = vld [vmem:[%s11086_s4] ss:$0 sm:$0xff]  ;;  %s8392_s4 = smov [#allocation10]  }
 0x691   :  { %8183 = vmatprep.subr.bf16.mxu1 %v12176_v20  ;;  %v3331_v19 = vadd.f32 %v6180_v58, %v5605_v54  ;;  %s5594_s16 = sshll.u32 %s8392_s4, 4  ;;  %s5595_s16 = int_to_ptr.vmem [resolvable:$true] %s5594_s16 }
 0x692   :  { %8035 = vmatpush3.bf16.msra.mxu0 %v12366_v16  ;;  %s8353_s2 = scalar_lea.vmem %s5595_s16, 128  ;;  %p8358_p5 = scmp.lt.s32.totalorder %s5595_s16, %s5595_s16 }
 0x693   :  { %8037 = vmatprep.subr.bf16.mxu0 %v12367_v28  ;;  %p8354_p4 = scmp.ne.s32.totalorder %s5595_s16, %s8353_s2  ;;  %p8359_p6 = scmp.lt.s32.totalorder %s8353_s2, %s8353_s2 }
 0x694   :  { %8185 = vmatpush3.bf16.msra.mxu1 %v12329_v21 }
 0x695   :  { %8186 = vmatprep.subr.bf16.mxu1 %v12176_v20  ;;  %p8360_p7 = por %p8359_p6, %p8358_p5 }
 0x696   :  { %8039 = vmatpush3.bf16.msra.mxu0 %v12370_v8 }
 0x697   :  { %8041 = vmatprep.subr.bf16.mxu0 %v12371_v25  ;;  %p8361_p8 = pnand %p8360_p7, %p8354_p4 }
 0x698   :  { %8188 = vmatpush3.bf16.msra.mxu1 %v12338_v9 }
 0x699   :  { %8189 = vmatprep.subr.bf16.mxu1 %v12176_v20 }
 0x69a   :  { %8043 = vmatpush3.bf16.msra.mxu0 %v12372_v45 }
 0x69b   :  { %8045 = vmatprep.subr.bf16.mxu0 %v12373_v40 }
 0x69c   :  { %8191 = vmatpush3.bf16.msra.mxu1 %v12347_v22 }
 0x69d   :  { %8192 = vmatprep.subr.bf16.mxu1 %v12176_v20 }
 0x69e   :  { %8047 = vmatpush3.bf16.msra.mxu0 %v12374_v27 }
 0x69f   :  { %8049 = vmatprep.subr.bf16.mxu0 %v12375_v24  ;;  %v6213_v59 = vpop.f32.mrb[22].mxu0 }
 0x6a0   :  { %8194 = vmatpush3.bf16.msra.mxu1 %v12352_v29  ;;  %v6214_v42 = vpop.f32.mrb[23].mxu0 }
 0x6a1   :  { %8195 = vmatprep.subr.bf16.mxu1 %v12176_v20  ;;  %v6458_v1 = vpop.f32.mrb[12].mxu1  ;;  %v6215_v48 = vadd.f32 %v6214_v42, %v6213_v59 }
 0x6a2   :  { %8051 = vmatpush3.bf16.msra.mxu0 %v12376_v23  ;;  %v6459_v47 = vpop.f32.mrb[13].mxu1 }
 0x6a3   :  { %8053 = vmatprep.subr.bf16.mxu0 %v12377_v17  ;;  %v3563_v5 = vadd.f32 %v6215_v48, %v3331_v19  ;;  %v6460_v50 = vadd.f32 %v6459_v47, %v6458_v1 }
 0x6a4   :  { %8197 = vmatpush3.bf16.msra.mxu1 %v12353_v63 }
 0x6a5   :  { %8198 = vmatprep.subr.bf16.mxu1 %v12176_v20 }
 0x6a6   :  { %8055 = vmatpush3.bf16.msra.mxu0 %v12378_v41 }
 0x6a7   :  { %8057 = vmatprep.subr.bf16.mxu0 %v12379_v57 }
 0x6a8   :  { %8200 = vmatpush3.bf16.msra.mxu1 %v12354_v62 }
 0x6a9   :  { %8201 = vmatprep.subr.bf16.mxu1 %v12176_v20 }
 0x6aa   :  { %8059 = vmatpush3.bf16.msra.mxu0 %v12380_v56 }
 0x6ac   :  { %8203 = vmatpush3.bf16.msra.mxu1 %v10634_v11 }
 0x6ad   :  { %4941 = vmatmul.mubr.f32.vlgmr.msra.gmra.mrb[36].mxu0 %v12358_v55 }
 0x6af   :  { %7128 = vmatmul.mubr.f32.vlgmr.msra.gmra.mrb[16].mxu1 %v12270_v15 }
 0x6c0   :  { %v6248_v21 = vpop.f32.mrb[24].mxu0 }
 0x6c1   :  { %v6249_v9 = vpop.f32.mrb[25].mxu0 }
 0x6c2   :  { %v6528_v22 = vpop.f32.mrb[14].mxu1  ;;  %v6250_v29 = vadd.f32 %v6249_v9, %v6248_v21 }
 0x6c3   :  { %v6529_v51 = vpop.f32.mrb[15].mxu1 }
 0x6c4   :  { %v3701_v49 = vadd.f32 %v6250_v29, %v3563_v5  ;;  %v6530_v33 = vadd.f32 %v6529_v51, %v6528_v22 }
 0x6e0   :  { %v6283_v63 = vpop.f32.mrb[26].mxu0 }
 0x6e1   :  { %v6284_v26 = vpop.f32.mrb[27].mxu0 }
 0x6e2   :  { %v6285_v62 = vadd.f32 %v6284_v26, %v6283_v63 }
 0x6e4   :  { %v3809_v60 = vadd.f32 %v6285_v62, %v3701_v49 }
 0x700   :  { %v6318_v20 = vpop.f32.mrb[28].mxu0 }
 0x701   :  { %v6319_v14 = vpop.f32.mrb[29].mxu0 }
 0x702   :  { %v6320_v43 = vadd.f32 %v6319_v14, %v6318_v20 }
 0x704   :  { %v3977_v18 = vadd.f32 %v6320_v43, %v3809_v60 }
 0x720   :  { %v6353_v11 = vpop.f32.mrb[30].mxu0 }
 0x721   :  { %v6354_v12 = vpop.f32.mrb[31].mxu0 }
 0x722   :  { %v6355_v55 = vadd.f32 %v6354_v12, %v6353_v11 }
 0x724   :  { %v4081_v6 = vadd.f32 %v6355_v55, %v3977_v18 }
 0x726   :  { %v4193_v15 = vadd.f32 %v11011_v37, %v4081_v6 }
 0x740   :  { %v6423_v10 = vpop.f32.mrb[32].mxu0 }
 0x741   :  { %v6424_v31 = vpop.f32.mrb[33].mxu0 }
 0x742   :  { %v6425_v3 = vadd.f32 %v6424_v31, %v6423_v10 }
 0x744   :  { %v4425_v34 = vadd.f32 %v6425_v3, %v4193_v15 }
 0x746   :  { %v4563_v7 = vadd.f32 %v6460_v50, %v4425_v34 }
 0x760   :  { %v6493_v44 = vpop.f32.mrb[34].mxu0 }
 0x761   :  { %v6494_v16 = vpop.f32.mrb[35].mxu0 }
 0x762   :  { %v6495_v28 = vadd.f32 %v6494_v16, %v6493_v44 }
 0x764   :  { %v4671_v0 = vadd.f32 %v6495_v28, %v4563_v7 }
 0x766   :  { %v4839_v52 = vadd.f32 %v6530_v33, %v4671_v0 }
 0x780   :  { %v6563_v53 = vpop.f32.mrb[36].mxu0 }
 0x781   :  { %v6564_v8 = vpop.f32.mrb[37].mxu0 }
 0x782   :  { %v5583_v25 = vpop.f32.mrb[16].mxu1  ;;  %v6565_v13 = vadd.f32 %v6564_v8, %v6563_v53 }
 0x783   :  { %v7129_v45 = vpop.f32.mrb[17].mxu1 }
 0x784   :  { %v4943_v40 = vadd.f32 %v6565_v13, %v4839_v52 }
 0x786   :  { %v8206_v4 = vadd.f32 %v5583_v25, %v4943_v40 }
 0x788   :  { %5587 = vst [vmem:[#allocation10] sm:$0xff] %v8206_v4 }
 0x789   :  { %8364 = shalt.err (!%p8361_p8)
}
 0x78a   :  { %s8365_s28 = scalar_lea.hbm %s11087_s5, 128 }
 0x78b   :  { %p8366_p9 = scmp.ne.s32.totalorder %s11087_s5, %s8365_s28  ;;  %p8369_p10 = scmp.lt.u32.totalorder %s8365_s28, %s11087_s5 }
 0x78d   :  { %p8371_p11 = pnand %p8369_p10, %p8366_p9 }
 0x78f   :  { %8374 = shalt.err (!%p8371_p11)
}
 0x790   :  { %5597 = dma.vmem_to_hbm [thread:$0]  %s5595_s16, 128, %s11087_s5, [#allocation4]  }
 0x791   :  { %8381 = dma.done.wait [#allocation4], 128  }
 0x792   :  { %8382 = vsyncadd [#allocation4], 4294967168 }
 0x793   :  { %5601 = vsyncpa [#allocation3], 1 }
 0x794   :  { %5602 = vsyncpa [#allocation6], 1 }
 0x795   :  { %5603 = vsyncpa [#allocation9], 1 }
 0x796   :  { %5604 = vsyncpa [#allocation4], 1 }

</bundles_post_ra>
